<compile_context>
chip_gen: v6e
topology: v6e:2x2x1
jax: 0.10.0
libtpu: 0.0.40
codegen_flags: <defaults>
</compile_context>

<pallas_src>
import math
from functools import partial

import jax
import jax.numpy as jnp
from jax import lax
from jax.experimental import pallas as pl
from jax.experimental.pallas import tpu as pltpu


def _belief_encoder_kernel(
    x_ref,      # (TB, A, D)  belief states for this batch block
    wqkv_ref,   # (D, 3D)     fused in_proj weight, pre-transposed, Q cols pre-scaled
    wo_ref,     # (D, D)      attention out_proj weight, pre-transposed
    ff1_ref,    # (D, 4D)     feedforward[0].weight, pre-transposed
    ff2_ref,    # (4D, D)     feedforward[2].weight, pre-transposed
    wout_ref,   # (D, D)      final out_proj weight, pre-transposed, pre-scaled by 1/A
    vecs_ref,   # (16, 4D)    packed bias / LayerNorm row vectors (f32)
    o_ref,      # (TB, D)     group representation E for this batch block
    *, n_heads: int,
):
    eps = 1e-5
    x = x_ref[...].astype(jnp.float32)            # (TB, A, D)
    tb, a, d = x.shape
    hd = d // n_heads
    r = tb * a
    xr = x.reshape(r, d)                          # all rows of this block

    # --- unpack the single packed parameter slab (static row/lane slices) ---
    vecs = vecs_ref[...]                          # (16, 4D) f32
    b_qkv   = vecs[0:1, :3 * d]                   # (1, 3D)  (Q part pre-scaled)
    ff1_b   = vecs[1:2, :]                        # (1, 4D)
    attn_ob = vecs[2:3, :d]
    ln1_g   = vecs[3:4, :d]
    ln1_b   = vecs[4:5, :d]
    ff2_b   = vecs[5:6, :d]
    ln2_g   = vecs[6:7, :d]
    ln2_b   = vecs[7:8, :d]
    out_b   = vecs[8:9, :d]

    def mm(lhs, w):
        # Weights may be pre-cast to bf16 (v6e/v7x); always accumulate in f32.
        return jnp.dot(lhs.astype(w.dtype), w, preferred_element_type=jnp.float32)

    # --- fused QKV projection: one (r, D) @ (D, 3D) matmul, bias added once ---
    qkv = mm(xr, wqkv_ref[...]) + b_qkv           # (r, 3D)

    # --- per-head attention core (A = hd is tiny -> VPU/XLU-bound) ---
    ctx_heads = []
    for h in range(n_heads):                      # static, unrolled (H small)
        q3 = qkv[:, h * hd:(h + 1) * hd].reshape(tb, a, hd)
        k3 = qkv[:, d + h * hd: d + (h + 1) * hd].reshape(tb, a, hd)
        v3 = qkv[:, 2 * d + h * hd: 2 * d + (h + 1) * hd].reshape(tb, a, hd)
        s = jnp.einsum("bqd,bkd->bqk", q3, k3,
                       preferred_element_type=jnp.float32)   # scale pre-folded
        s = s - jnp.max(s, axis=-1, keepdims=True)
        p = jnp.exp(s)
        p = p * pl.reciprocal(jnp.sum(p, axis=-1, keepdims=True), approx=True)
        o3 = jnp.einsum("bqk,bkd->bqd", p, v3,
                        preferred_element_type=jnp.float32)  # (TB, A, hd)
        ctx_heads.append(o3.reshape(r, hd))
    ctx = jnp.concatenate(ctx_heads, axis=-1)     # (r, D), heads contiguous

    # --- single attention out-projection ---
    attn = mm(ctx, wo_ref[...]) + attn_ob

    # --- residual + LayerNorm 1 ---
    x1 = xr + attn
    mu1 = jnp.mean(x1, axis=-1, keepdims=True)
    xc1 = x1 - mu1
    var1 = jnp.mean(xc1 * xc1, axis=-1, keepdims=True)
    y = xc1 * lax.rsqrt(var1 + eps) * ln1_g + ln1_b

    # --- feedforward: Linear -> ReLU -> Linear (single matmuls over all rows) ---
    h1 = mm(y, ff1_ref[...]) + ff1_b
    h1 = jnp.maximum(h1, 0.0)
    ff = mm(h1, ff2_ref[...]) + ff2_b

    # --- residual + LayerNorm 2 ---
    z = y + ff
    mu2 = jnp.mean(z, axis=-1, keepdims=True)
    zc = z - mu2
    var2 = jnp.mean(zc * zc, axis=-1, keepdims=True)
    z = zc * lax.rsqrt(var2 + eps) * ln2_g + ln2_b

    # --- agent sum (1/A folded into wout) + final out_proj ---
    g = jnp.sum(z.reshape(tb, a, d), axis=1)      # (TB, D)
    out = mm(g, wout_ref[...]) + out_b
    o_ref[...] = out.astype(o_ref.dtype)


def init_params(key, belief_dim: int):
    """PyTorch-layout parameters (same conventions as nn.MultiheadAttention etc.)."""
    D = belief_dim
    keys = jax.random.split(key, 8)
    s = 0.1
    return {
        "in_w": jax.random.normal(keys[0], (3 * D, D), jnp.float32) * s,
        "in_b": jax.random.normal(keys[1], (1, 3 * D), jnp.float32) * s,
        "attn_ow": jax.random.normal(keys[2], (D, D), jnp.float32) * s,
        "attn_ob": jnp.zeros((1, D), jnp.float32),
        "ln1_g": jnp.ones((1, D), jnp.float32),
        "ln1_b": jnp.zeros((1, D), jnp.float32),
        "ff1_w": jax.random.normal(keys[3], (4 * D, D), jnp.float32) * s,
        "ff1_b": jax.random.normal(keys[4], (1, 4 * D), jnp.float32) * s,
        "ff2_w": jax.random.normal(keys[5], (D, 4 * D), jnp.float32) * s,
        "ff2_b": jax.random.normal(keys[6], (1, D), jnp.float32) * s,
        "ln2_g": jnp.ones((1, D), jnp.float32),
        "ln2_b": jnp.zeros((1, D), jnp.float32),
        "out_w": jax.random.normal(keys[7], (D, D), jnp.float32) * s,
        "out_b": jnp.zeros((1, D), jnp.float32),
    }


def prepare_kernel_params(params, n_heads: int, n_agents: int, compute_dtype):
    """Pre-transpose / fuse / fold constants into the weights (wrapper-side,
    done once), and pack all tiny bias / LayerNorm vectors into one slab."""
    D = params["attn_ow"].shape[0]
    hd = D // n_heads
    scale = 1.0 / math.sqrt(hd)
    f32 = jnp.float32

    in_w = params["in_w"].astype(f32)                     # (3D, D)
    in_b = params["in_b"].astype(f32)                     # (1, 3D)
    # fold 1/sqrt(hd) into the Q columns of the fused projection (weight + bias)
    col_scale = jnp.concatenate(
        [jnp.full((D,), scale, f32), jnp.ones((2 * D,), f32)])
    w_qkv_t = in_w.T * col_scale[None, :]                 # (D, 3D), x @ w layout
    b_qkv = in_b * col_scale[None, :]                     # (1, 3D)

    W4 = 4 * D
    vecs = jnp.zeros((16, W4), f32)
    vecs = vecs.at[0, :3 * D].set(b_qkv[0])
    vecs = vecs.at[1, :].set(params["ff1_b"][0].astype(f32))
    vecs = vecs.at[2, :D].set(params["attn_ob"][0].astype(f32))
    vecs = vecs.at[3, :D].set(params["ln1_g"][0].astype(f32))
    vecs = vecs.at[4, :D].set(params["ln1_b"][0].astype(f32))
    vecs = vecs.at[5, :D].set(params["ln2_g"][0].astype(f32) * 0 + params["ff2_b"][0].astype(f32))
    vecs = vecs.at[6, :D].set(params["ln2_g"][0].astype(f32))
    vecs = vecs.at[7, :D].set(params["ln2_b"][0].astype(f32))
    vecs = vecs.at[8, :D].set(params["out_b"][0].astype(f32))

    cd = compute_dtype
    return {
        "wqkv": w_qkv_t.astype(cd),
        "wo": params["attn_ow"].astype(f32).T.astype(cd),
        "ff1": params["ff1_w"].astype(f32).T.astype(cd),
        "ff2": params["ff2_w"].astype(f32).T.astype(cd),
        # fold the 1/A agent-mean into the final projection weight
        "wout": (params["out_w"].astype(f32).T / float(n_agents)).astype(cd),
        "vecs": vecs,
    }


_WEIGHT_ORDER = ["wqkv", "wo", "ff1", "ff2", "wout", "vecs"]


def _tpu_kind() -> str:
    try:
        dev = jax.devices()[0]
        return dev.device_kind.lower() if dev.platform == "tpu" else ""
    except Exception:
        return ""


def _default_compute_dtype(kind: str):
    # bf16-native MXUs: v6e / v7x.  v5e and older keep f32 matmul operands.
    return jnp.bfloat16 if any(t in kind for t in ("v6", "v7", "7x")) else jnp.float32


def _pick_batch_block(B: int, kind: str) -> int:
    # v7x: 2 TensorCores/chip -> two balanced "parallel" grid steps.
    if any(t in kind for t in ("v7", "7x")) and B % 2 == 0 and (B // 2) % 8 == 0:
        return B // 2
    # v5e / v6e: 1 TC -> the grid is a serial loop with ~0.35us/step overhead,
    # so prefer a single step (the whole block fits VMEM at these shapes);
    # only cap for very large batches.
    if B % 8 == 0:
        for cap in (4096, 2048, 1024):
            if B > cap and B % cap == 0:
                return cap
    return B


def belief_encoder_forward(belief_states, params, n_heads: int, *,
                           compute_dtype=None, block_b=None):
    B, A, D = belief_states.shape
    assert D % n_heads == 0
    kind = _tpu_kind()
    if compute_dtype is None:
        compute_dtype = _default_compute_dtype(kind)
    kp = prepare_kernel_params(params, n_heads, A, compute_dtype)

    tb = _pick_batch_block(B, kind) if block_b is None else block_b
    assert B % tb == 0, "batch block must divide the batch"
    grid = (B // tb,)

    def const_spec(shape):
        nd = len(shape)
        return pl.BlockSpec(shape, lambda b, _nd=nd: (0,) * _nd)

    in_specs = [pl.BlockSpec((tb, A, D), lambda b: (b, 0, 0))]
    in_specs += [const_spec(kp[name].shape) for name in _WEIGHT_ORDER]
    out_spec = pl.BlockSpec((tb, D), lambda b: (b, 0))

    # NOTE: at D=32 all weights are a few KiB; if D grows large (v7x has only
    # 64 MiB VMEM) set pltpu.CompilerParams(vmem_limit_bytes=...) and
    # single-buffer the grid-invariant weight specs (pipeline_mode=pl.Buffered(1)).
    kernel = partial(_belief_encoder_kernel, n_heads=n_heads)
    return pl.pallas_call(
        kernel,
        out_shape=jax.ShapeDtypeStruct((B, D), belief_states.dtype),
        grid=grid,
        in_specs=in_specs,
        out_specs=out_spec,
        compiler_params=pltpu.CompilerParams(dimension_semantics=("parallel",)),
    )(belief_states, *[kp[name] for name in _WEIGHT_ORDER])


def reference_forward(x, p, n_heads: int):
    """Pure-JAX reference matching torch.nn.MultiheadAttention semantics."""
    B, A, D = x.shape
    hd = D // n_heads
    qkv = jnp.einsum("bad,ed->bae", x, p["in_w"]) + p["in_b"][0]
    q, k, v = jnp.split(qkv, 3, axis=-1)

    def split_heads(t):
        return t.reshape(B, A, n_heads, hd).transpose(0, 2, 1, 3)

    qh, kh, vh = map(split_heads, (q, k, v))
    s = jnp.einsum("bhad,bhed->bhae", qh, kh) / jnp.sqrt(hd)
    pa = jax.nn.softmax(s, axis=-1)
    o = jnp.einsum("bhae,bhed->bhad", pa, vh).transpose(0, 2, 1, 3).reshape(B, A, D)
    attn = o @ p["attn_ow"].T + p["attn_ob"][0]

    def ln(t, g, b):
        mu = t.mean(-1, keepdims=True)
        var = ((t - mu) ** 2).mean(-1, keepdims=True)
        return (t - mu) / jnp.sqrt(var + 1e-5) * g[0] + b[0]

    y = ln(x + attn, p["ln1_g"], p["ln1_b"])
    ff = jax.nn.relu(y @ p["ff1_w"].T + p["ff1_b"][0]) @ p["ff2_w"].T + p["ff2_b"][0]
    z = ln(y + ff, p["ln2_g"], p["ln2_b"])
    g = z.mean(axis=1)
    return g @ p["out_w"].T + p["out_b"][0]


if __name__ == "__main__":
    # small shapes consistent with the module; B=16 exercises both the single
    # grid-step path (v5e/v6e) and the two parallel blocks path (v7x).
    batch_size, n_agents, belief_dim, n_heads = 16, 8, 32, 4

    key = jax.random.PRNGKey(0)
    k_x, k_p = jax.random.split(key)
    belief_states = jax.random.normal(k_x, (batch_size, n_agents, belief_dim), jnp.float32)
    params = init_params(k_p, belief_dim)

    ref = reference_forward(belief_states, params, n_heads)

    # exact (f32-operand) path: tight check against the PyTorch-equivalent
    # reference (approx EUP reciprocal in the softmax -> slightly relaxed tol).
    out_f32 = belief_encoder_forward(belief_states, params, n_heads,
                                     compute_dtype=jnp.float32)
    out_f32 = jax.block_until_ready(out_f32)
    assert out_f32.shape == (batch_size, belief_dim)
    assert jnp.allclose(out_f32, ref, rtol=2e-3, atol=2e-3), "f32 kernel mismatch"

    # auto path: bf16 matmul operands (f32 accumulation) on v6e/v7x, f32 on
    # v5e; generation-aware batch blocking.  Looser tolerance covers the bf16
    # operand rounding noted in the review.
    out_auto = belief_encoder_forward(belief_states, params, n_heads)
    out_auto = jax.block_until_ready(out_auto)
    assert out_auto.shape == (batch_size, belief_dim)
    assert jnp.allclose(out_auto, ref, rtol=5e-2, atol=5e-2), "auto kernel mismatch"

    print("KERNEL_OK")
</pallas_src>

<mosaic_0001>
module attributes {stable_mosaic.version = 11 : i64} {
  func.func @_belief_encoder_kernel(%arg0: i32, %arg1: memref<16x8x32xf32, #tpu.memory_space<vmem>>, %arg2: memref<32x96xf32, #tpu.memory_space<vmem>>, %arg3: memref<32x32xf32, #tpu.memory_space<vmem>>, %arg4: memref<32x128xf32, #tpu.memory_space<vmem>>, %arg5: memref<128x32xf32, #tpu.memory_space<vmem>>, %arg6: memref<32x32xf32, #tpu.memory_space<vmem>>, %arg7: memref<16x128xf32, #tpu.memory_space<vmem>>, %arg8: memref<16x32xf32, #tpu.memory_space<vmem>>) attributes {dimension_semantics = [#tpu.dimension_semantics<parallel>], iteration_bounds = array<i64: 1>, scalar_prefetch = 0 : i64, scratch_operands = 0 : i64, tpu.core_type = #tpu.core_type<tc>, window_params = [{transform_indices = @transform_0, window_bounds = array<i64: 16, 8, 32>}, {pipeline_mode = #tpu.pipeline_mode<synchronous>, transform_indices = @transform_1, window_bounds = array<i64: 32, 96>}, {pipeline_mode = #tpu.pipeline_mode<synchronous>, transform_indices = @transform_2, window_bounds = array<i64: 32, 32>}, {pipeline_mode = #tpu.pipeline_mode<synchronous>, transform_indices = @transform_3, window_bounds = array<i64: 32, 128>}, {pipeline_mode = #tpu.pipeline_mode<synchronous>, transform_indices = @transform_4, window_bounds = array<i64: 128, 32>}, {pipeline_mode = #tpu.pipeline_mode<synchronous>, transform_indices = @transform_5, window_bounds = array<i64: 32, 32>}, {pipeline_mode = #tpu.pipeline_mode<synchronous>, transform_indices = @transform_6, window_bounds = array<i64: 16, 128>}, {transform_indices = @transform_7, window_bounds = array<i64: 16, 32>}]} {
    %c0 = arith.constant 0 : index
    %c0_0 = arith.constant 0 : index
    %c0_1 = arith.constant 0 : index
    %0 = vector.load %arg1[%c0, %c0_0, %c0_1] : memref<16x8x32xf32, #tpu.memory_space<vmem>>, vector<16x8x32xf32>
    %1 = vector.shape_cast %0 : vector<16x8x32xf32> to vector<128x32xf32>
    %c0_2 = arith.constant 0 : index
    %c0_3 = arith.constant 0 : index
    %2 = vector.load %arg7[%c0_2, %c0_3] : memref<16x128xf32, #tpu.memory_space<vmem>>, vector<16x128xf32>
    %3 = vector.extract_strided_slice %2 {offsets = [0, 0], sizes = [1, 96], strides = [1, 1]} : vector<16x128xf32> to vector<1x96xf32>
    %4 = vector.extract_strided_slice %2 {offsets = [1, 0], sizes = [1, 128], strides = [1, 1]} : vector<16x128xf32> to vector<1x128xf32>
    %5 = vector.extract_strided_slice %2 {offsets = [2, 0], sizes = [1, 32], strides = [1, 1]} : vector<16x128xf32> to vector<1x32xf32>
    %6 = vector.extract_strided_slice %2 {offsets = [3, 0], sizes = [1, 32], strides = [1, 1]} : vector<16x128xf32> to vector<1x32xf32>
    %7 = vector.extract_strided_slice %2 {offsets = [4, 0], sizes = [1, 32], strides = [1, 1]} : vector<16x128xf32> to vector<1x32xf32>
    %8 = vector.extract_strided_slice %2 {offsets = [5, 0], sizes = [1, 32], strides = [1, 1]} : vector<16x128xf32> to vector<1x32xf32>
    %9 = vector.extract_strided_slice %2 {offsets = [6, 0], sizes = [1, 32], strides = [1, 1]} : vector<16x128xf32> to vector<1x32xf32>
    %10 = vector.extract_strided_slice %2 {offsets = [7, 0], sizes = [1, 32], strides = [1, 1]} : vector<16x128xf32> to vector<1x32xf32>
    %11 = vector.extract_strided_slice %2 {offsets = [8, 0], sizes = [1, 32], strides = [1, 1]} : vector<16x128xf32> to vector<1x32xf32>
    %c0_4 = arith.constant 0 : index
    %c0_5 = arith.constant 0 : index
    %12 = vector.load %arg2[%c0_4, %c0_5] : memref<32x96xf32, #tpu.memory_space<vmem>>, vector<32x96xf32>
    %cst = arith.constant dense<0.000000e+00> : vector<128x96xf32>
    %13 = tpu.matmul %1, %12, %cst {dimension_numbers = #tpu.dot_dimension_numbers<[1], [0], [0], [1], [0, 0, 1, 1], [], []>} : vector<128x32xf32>, vector<32x96xf32>, vector<128x96xf32> -> vector<128x96xf32>
    %14 = vector.broadcast %3 : vector<1x96xf32> to vector<128x96xf32>
    %15 = arith.addf %13, %14 : vector<128x96xf32>
    %16 = vector.extract_strided_slice %15 {offsets = [0, 0], sizes = [128, 8], strides = [1, 1]} : vector<128x96xf32> to vector<128x8xf32>
    %17 = vector.shape_cast %16 : vector<128x8xf32> to vector<16x8x8xf32>
    %18 = vector.extract_strided_slice %15 {offsets = [0, 32], sizes = [128, 8], strides = [1, 1]} : vector<128x96xf32> to vector<128x8xf32>
    %19 = vector.shape_cast %18 : vector<128x8xf32> to vector<16x8x8xf32>
    %20 = vector.extract_strided_slice %15 {offsets = [0, 64], sizes = [128, 8], strides = [1, 1]} : vector<128x96xf32> to vector<128x8xf32>
    %21 = vector.shape_cast %20 : vector<128x8xf32> to vector<16x8x8xf32>
    "tpu.trace_start"() <{level = 10 : i32, message = "bqd,bkd->bqk"}> : () -> ()
    %cst_6 = arith.constant dense<0.000000e+00> : vector<16x8x8xf32>
    %22 = tpu.matmul %17, %19, %cst_6 {dimension_numbers = #tpu.dot_dimension_numbers<[2], [2], [1], [1], [0, 0, 0, 1, 1, 1], [0], [0]>} : vector<16x8x8xf32>, vector<16x8x8xf32>, vector<16x8x8xf32> -> vector<16x8x8xf32>
    "tpu.trace_stop"() : () -> ()
    %cst_7 = arith.constant dense<0xFF800000> : vector<16x8xf32>
    %23 = vector.multi_reduction <maximumf>, %22, %cst_7 [2] : vector<16x8x8xf32> to vector<16x8xf32>
    %24 = vector.shape_cast %23 : vector<16x8xf32> to vector<16x8x1xf32>
    %25 = vector.broadcast %24 : vector<16x8x1xf32> to vector<16x8x8xf32>
    %26 = arith.subf %22, %25 : vector<16x8x8xf32>
    %27 = math.exp %26 : vector<16x8x8xf32>
    %cst_8 = arith.constant dense<0.000000e+00> : vector<16x8xf32>
    %28 = vector.multi_reduction <add>, %27, %cst_8 [2] : vector<16x8x8xf32> to vector<16x8xf32>
    %29 = vector.shape_cast %28 : vector<16x8xf32> to vector<16x8x1xf32>
    %30 = tpu.reciprocal %29 {approx = true} : vector<16x8x1xf32> -> vector<16x8x1xf32>
    %31 = vector.broadcast %30 : vector<16x8x1xf32> to vector<16x8x8xf32>
    %32 = arith.mulf %27, %31 : vector<16x8x8xf32>
    "tpu.trace_start"() <{level = 10 : i32, message = "bqk,bkd->bqd"}> : () -> ()
    %cst_9 = arith.constant dense<0.000000e+00> : vector<16x8x8xf32>
    %33 = tpu.matmul %32, %21, %cst_9 {dimension_numbers = #tpu.dot_dimension_numbers<[2], [1], [1], [2], [0, 0, 0, 1, 1, 2], [0], [0]>} : vector<16x8x8xf32>, vector<16x8x8xf32>, vector<16x8x8xf32> -> vector<16x8x8xf32>
    "tpu.trace_stop"() : () -> ()
    %34 = vector.shape_cast %33 : vector<16x8x8xf32> to vector<128x8xf32>
    %35 = vector.extract_strided_slice %15 {offsets = [0, 8], sizes = [128, 8], strides = [1, 1]} : vector<128x96xf32> to vector<128x8xf32>
    %36 = vector.shape_cast %35 : vector<128x8xf32> to vector<16x8x8xf32>
    %37 = vector.extract_strided_slice %15 {offsets = [0, 40], sizes = [128, 8], strides = [1, 1]} : vector<128x96xf32> to vector<128x8xf32>
    %38 = vector.shape_cast %37 : vector<128x8xf32> to vector<16x8x8xf32>
    %39 = vector.extract_strided_slice %15 {offsets = [0, 72], sizes = [128, 8], strides = [1, 1]} : vector<128x96xf32> to vector<128x8xf32>
    %40 = vector.shape_cast %39 : vector<128x8xf32> to vector<16x8x8xf32>
    "tpu.trace_start"() <{level = 10 : i32, message = "bqd,bkd->bqk"}> : () -> ()
    %cst_10 = arith.constant dense<0.000000e+00> : vector<16x8x8xf32>
    %41 = tpu.matmul %36, %38, %cst_10 {dimension_numbers = #tpu.dot_dimension_numbers<[2], [2], [1], [1], [0, 0, 0, 1, 1, 1], [0], [0]>} : vector<16x8x8xf32>, vector<16x8x8xf32>, vector<16x8x8xf32> -> vector<16x8x8xf32>
    "tpu.trace_stop"() : () -> ()
    %cst_11 = arith.constant dense<0xFF800000> : vector<16x8xf32>
    %42 = vector.multi_reduction <maximumf>, %41, %cst_11 [2] : vector<16x8x8xf32> to vector<16x8xf32>
    %43 = vector.shape_cast %42 : vector<16x8xf32> to vector<16x8x1xf32>
    %44 = vector.broadcast %43 : vector<16x8x1xf32> to vector<16x8x8xf32>
    %45 = arith.subf %41, %44 : vector<16x8x8xf32>
    %46 = math.exp %45 : vector<16x8x8xf32>
    %cst_12 = arith.constant dense<0.000000e+00> : vector<16x8xf32>
    %47 = vector.multi_reduction <add>, %46, %cst_12 [2] : vector<16x8x8xf32> to vector<16x8xf32>
    %48 = vector.shape_cast %47 : vector<16x8xf32> to vector<16x8x1xf32>
    %49 = tpu.reciprocal %48 {approx = true} : vector<16x8x1xf32> -> vector<16x8x1xf32>
    %50 = vector.broadcast %49 : vector<16x8x1xf32> to vector<16x8x8xf32>
    %51 = arith.mulf %46, %50 : vector<16x8x8xf32>
    "tpu.trace_start"() <{level = 10 : i32, message = "bqk,bkd->bqd"}> : () -> ()
    %cst_13 = arith.constant dense<0.000000e+00> : vector<16x8x8xf32>
    %52 = tpu.matmul %51, %40, %cst_13 {dimension_numbers = #tpu.dot_dimension_numbers<[2], [1], [1], [2], [0, 0, 0, 1, 1, 2], [0], [0]>} : vector<16x8x8xf32>, vector<16x8x8xf32>, vector<16x8x8xf32> -> vector<16x8x8xf32>
    "tpu.trace_stop"() : () -> ()
    %53 = vector.shape_cast %52 : vector<16x8x8xf32> to vector<128x8xf32>
    %54 = vector.extract_strided_slice %15 {offsets = [0, 16], sizes = [128, 8], strides = [1, 1]} : vector<128x96xf32> to vector<128x8xf32>
    %55 = vector.shape_cast %54 : vector<128x8xf32> to vector<16x8x8xf32>
    %56 = vector.extract_strided_slice %15 {offsets = [0, 48], sizes = [128, 8], strides = [1, 1]} : vector<128x96xf32> to vector<128x8xf32>
    %57 = vector.shape_cast %56 : vector<128x8xf32> to vector<16x8x8xf32>
    %58 = vector.extract_strided_slice %15 {offsets = [0, 80], sizes = [128, 8], strides = [1, 1]} : vector<128x96xf32> to vector<128x8xf32>
    %59 = vector.shape_cast %58 : vector<128x8xf32> to vector<16x8x8xf32>
    "tpu.trace_start"() <{level = 10 : i32, message = "bqd,bkd->bqk"}> : () -> ()
    %cst_14 = arith.constant dense<0.000000e+00> : vector<16x8x8xf32>
    %60 = tpu.matmul %55, %57, %cst_14 {dimension_numbers = #tpu.dot_dimension_numbers<[2], [2], [1], [1], [0, 0, 0, 1, 1, 1], [0], [0]>} : vector<16x8x8xf32>, vector<16x8x8xf32>, vector<16x8x8xf32> -> vector<16x8x8xf32>
    "tpu.trace_stop"() : () -> ()
    %cst_15 = arith.constant dense<0xFF800000> : vector<16x8xf32>
    %61 = vector.multi_reduction <maximumf>, %60, %cst_15 [2] : vector<16x8x8xf32> to vector<16x8xf32>
    %62 = vector.shape_cast %61 : vector<16x8xf32> to vector<16x8x1xf32>
    %63 = vector.broadcast %62 : vector<16x8x1xf32> to vector<16x8x8xf32>
    %64 = arith.subf %60, %63 : vector<16x8x8xf32>
    %65 = math.exp %64 : vector<16x8x8xf32>
    %cst_16 = arith.constant dense<0.000000e+00> : vector<16x8xf32>
    %66 = vector.multi_reduction <add>, %65, %cst_16 [2] : vector<16x8x8xf32> to vector<16x8xf32>
    %67 = vector.shape_cast %66 : vector<16x8xf32> to vector<16x8x1xf32>
    %68 = tpu.reciprocal %67 {approx = true} : vector<16x8x1xf32> -> vector<16x8x1xf32>
    %69 = vector.broadcast %68 : vector<16x8x1xf32> to vector<16x8x8xf32>
    %70 = arith.mulf %65, %69 : vector<16x8x8xf32>
    "tpu.trace_start"() <{level = 10 : i32, message = "bqk,bkd->bqd"}> : () -> ()
    %cst_17 = arith.constant dense<0.000000e+00> : vector<16x8x8xf32>
    %71 = tpu.matmul %70, %59, %cst_17 {dimension_numbers = #tpu.dot_dimension_numbers<[2], [1], [1], [2], [0, 0, 0, 1, 1, 2], [0], [0]>} : vector<16x8x8xf32>, vector<16x8x8xf32>, vector<16x8x8xf32> -> vector<16x8x8xf32>
    "tpu.trace_stop"() : () -> ()
    %72 = vector.shape_cast %71 : vector<16x8x8xf32> to vector<128x8xf32>
    %73 = vector.extract_strided_slice %15 {offsets = [0, 24], sizes = [128, 8], strides = [1, 1]} : vector<128x96xf32> to vector<128x8xf32>
    %74 = vector.shape_cast %73 : vector<128x8xf32> to vector<16x8x8xf32>
    %75 = vector.extract_strided_slice %15 {offsets = [0, 56], sizes = [128, 8], strides = [1, 1]} : vector<128x96xf32> to vector<128x8xf32>
    %76 = vector.shape_cast %75 : vector<128x8xf32> to vector<16x8x8xf32>
    %77 = vector.extract_strided_slice %15 {offsets = [0, 88], sizes = [128, 8], strides = [1, 1]} : vector<128x96xf32> to vector<128x8xf32>
    %78 = vector.shape_cast %77 : vector<128x8xf32> to vector<16x8x8xf32>
    "tpu.trace_start"() <{level = 10 : i32, message = "bqd,bkd->bqk"}> : () -> ()
    %cst_18 = arith.constant dense<0.000000e+00> : vector<16x8x8xf32>
    %79 = tpu.matmul %74, %76, %cst_18 {dimension_numbers = #tpu.dot_dimension_numbers<[2], [2], [1], [1], [0, 0, 0, 1, 1, 1], [0], [0]>} : vector<16x8x8xf32>, vector<16x8x8xf32>, vector<16x8x8xf32> -> vector<16x8x8xf32>
    "tpu.trace_stop"() : () -> ()
    %cst_19 = arith.constant dense<0xFF800000> : vector<16x8xf32>
    %80 = vector.multi_reduction <maximumf>, %79, %cst_19 [2] : vector<16x8x8xf32> to vector<16x8xf32>
    %81 = vector.shape_cast %80 : vector<16x8xf32> to vector<16x8x1xf32>
    %82 = vector.broadcast %81 : vector<16x8x1xf32> to vector<16x8x8xf32>
    %83 = arith.subf %79, %82 : vector<16x8x8xf32>
    %84 = math.exp %83 : vector<16x8x8xf32>
    %cst_20 = arith.constant dense<0.000000e+00> : vector<16x8xf32>
    %85 = vector.multi_reduction <add>, %84, %cst_20 [2] : vector<16x8x8xf32> to vector<16x8xf32>
    %86 = vector.shape_cast %85 : vector<16x8xf32> to vector<16x8x1xf32>
    %87 = tpu.reciprocal %86 {approx = true} : vector<16x8x1xf32> -> vector<16x8x1xf32>
    %88 = vector.broadcast %87 : vector<16x8x1xf32> to vector<16x8x8xf32>
    %89 = arith.mulf %84, %88 : vector<16x8x8xf32>
    "tpu.trace_start"() <{level = 10 : i32, message = "bqk,bkd->bqd"}> : () -> ()
    %cst_21 = arith.constant dense<0.000000e+00> : vector<16x8x8xf32>
    %90 = tpu.matmul %89, %78, %cst_21 {dimension_numbers = #tpu.dot_dimension_numbers<[2], [1], [1], [2], [0, 0, 0, 1, 1, 2], [0], [0]>} : vector<16x8x8xf32>, vector<16x8x8xf32>, vector<16x8x8xf32> -> vector<16x8x8xf32>
    "tpu.trace_stop"() : () -> ()
    %91 = vector.shape_cast %90 : vector<16x8x8xf32> to vector<128x8xf32>
    %92 = tpu.concatenate %34, %53, %72, %91 in 1 : vector<128x8xf32>, vector<128x8xf32>, vector<128x8xf32>, vector<128x8xf32> -> vector<128x32xf32>
    %c0_22 = arith.constant 0 : index
    %c0_23 = arith.constant 0 : index
    %93 = vector.load %arg3[%c0_22, %c0_23] : memref<32x32xf32, #tpu.memory_space<vmem>>, vector<32x32xf32>
    %cst_24 = arith.constant dense<0.000000e+00> : vector<128x32xf32>
    %94 = tpu.matmul %92, %93, %cst_24 {dimension_numbers = #tpu.dot_dimension_numbers<[1], [0], [0], [1], [0, 0, 1, 1], [], []>} : vector<128x32xf32>, vector<32x32xf32>, vector<128x32xf32> -> vector<128x32xf32>
    %95 = vector.broadcast %5 : vector<1x32xf32> to vector<128x32xf32>
    %96 = arith.addf %94, %95 : vector<128x32xf32>
    %97 = arith.addf %1, %96 : vector<128x32xf32>
    %cst_25 = arith.constant dense<0.000000e+00> : vector<128xf32>
    %98 = vector.multi_reduction <add>, %97, %cst_25 [1] : vector<128x32xf32> to vector<128xf32>
    %99 = vector.shape_cast %98 : vector<128xf32> to vector<128x1xf32>
    %cst_26 = arith.constant 3.200000e+01 : f32
    %100 = vector.broadcast %cst_26 : f32 to vector<128x1xf32>
    %101 = arith.divf %99, %100 : vector<128x1xf32>
    %102 = vector.broadcast %101 : vector<128x1xf32> to vector<128x32xf32>
    %103 = arith.subf %97, %102 : vector<128x32xf32>
    %104 = arith.mulf %103, %103 : vector<128x32xf32>
    %cst_27 = arith.constant dense<0.000000e+00> : vector<128xf32>
    %105 = vector.multi_reduction <add>, %104, %cst_27 [1] : vector<128x32xf32> to vector<128xf32>
    %106 = vector.shape_cast %105 : vector<128xf32> to vector<128x1xf32>
    %cst_28 = arith.constant 3.200000e+01 : f32
    %107 = vector.broadcast %cst_28 : f32 to vector<128x1xf32>
    %108 = arith.divf %106, %107 : vector<128x1xf32>
    %cst_29 = arith.constant 9.99999974E-6 : f32
    %109 = vector.broadcast %cst_29 : f32 to vector<128x1xf32>
    %110 = arith.addf %108, %109 : vector<128x1xf32>
    %111 = math.rsqrt %110 : vector<128x1xf32>
    %112 = vector.broadcast %111 : vector<128x1xf32> to vector<128x32xf32>
    %113 = arith.mulf %103, %112 : vector<128x32xf32>
    %114 = vector.broadcast %6 : vector<1x32xf32> to vector<128x32xf32>
    %115 = arith.mulf %113, %114 : vector<128x32xf32>
    %116 = vector.broadcast %7 : vector<1x32xf32> to vector<128x32xf32>
    %117 = arith.addf %115, %116 : vector<128x32xf32>
    %c0_30 = arith.constant 0 : index
    %c0_31 = arith.constant 0 : index
    %118 = vector.load %arg4[%c0_30, %c0_31] : memref<32x128xf32, #tpu.memory_space<vmem>>, vector<32x128xf32>
    %cst_32 = arith.constant dense<0.000000e+00> : vector<128x128xf32>
    %119 = tpu.matmul %117, %118, %cst_32 {dimension_numbers = #tpu.dot_dimension_numbers<[1], [0], [0], [1], [0, 0, 1, 1], [], []>} : vector<128x32xf32>, vector<32x128xf32>, vector<128x128xf32> -> vector<128x128xf32>
    %120 = vector.broadcast %4 : vector<1x128xf32> to vector<128x128xf32>
    %121 = arith.addf %119, %120 : vector<128x128xf32>
    %cst_33 = arith.constant 0.000000e+00 : f32
    %122 = vector.broadcast %cst_33 : f32 to vector<128x128xf32>
    %123 = arith.maximumf %121, %122 : vector<128x128xf32>
    %c0_34 = arith.constant 0 : index
    %c0_35 = arith.constant 0 : index
    %124 = vector.load %arg5[%c0_34, %c0_35] : memref<128x32xf32, #tpu.memory_space<vmem>>, vector<128x32xf32>
    %cst_36 = arith.constant dense<0.000000e+00> : vector<128x32xf32>
    %125 = tpu.matmul %123, %124, %cst_36 {dimension_numbers = #tpu.dot_dimension_numbers<[1], [0], [0], [1], [0, 0, 1, 1], [], []>} : vector<128x128xf32>, vector<128x32xf32>, vector<128x32xf32> -> vector<128x32xf32>
    %126 = vector.broadcast %8 : vector<1x32xf32> to vector<128x32xf32>
    %127 = arith.addf %125, %126 : vector<128x32xf32>
    %128 = arith.addf %117, %127 : vector<128x32xf32>
    %cst_37 = arith.constant dense<0.000000e+00> : vector<128xf32>
    %129 = vector.multi_reduction <add>, %128, %cst_37 [1] : vector<128x32xf32> to vector<128xf32>
    %130 = vector.shape_cast %129 : vector<128xf32> to vector<128x1xf32>
    %cst_38 = arith.constant 3.200000e+01 : f32
    %131 = vector.broadcast %cst_38 : f32 to vector<128x1xf32>
    %132 = arith.divf %130, %131 : vector<128x1xf32>
    %133 = vector.broadcast %132 : vector<128x1xf32> to vector<128x32xf32>
    %134 = arith.subf %128, %133 : vector<128x32xf32>
    %135 = arith.mulf %134, %134 : vector<128x32xf32>
    %cst_39 = arith.constant dense<0.000000e+00> : vector<128xf32>
    %136 = vector.multi_reduction <add>, %135, %cst_39 [1] : vector<128x32xf32> to vector<128xf32>
    %137 = vector.shape_cast %136 : vector<128xf32> to vector<128x1xf32>
    %cst_40 = arith.constant 3.200000e+01 : f32
    %138 = vector.broadcast %cst_40 : f32 to vector<128x1xf32>
    %139 = arith.divf %137, %138 : vector<128x1xf32>
    %cst_41 = arith.constant 9.99999974E-6 : f32
    %140 = vector.broadcast %cst_41 : f32 to vector<128x1xf32>
    %141 = arith.addf %139, %140 : vector<128x1xf32>
    %142 = math.rsqrt %141 : vector<128x1xf32>
    %143 = vector.broadcast %142 : vector<128x1xf32> to vector<128x32xf32>
    %144 = arith.mulf %134, %143 : vector<128x32xf32>
    %145 = vector.broadcast %9 : vector<1x32xf32> to vector<128x32xf32>
    %146 = arith.mulf %144, %145 : vector<128x32xf32>
    %147 = vector.broadcast %10 : vector<1x32xf32> to vector<128x32xf32>
    %148 = arith.addf %146, %147 : vector<128x32xf32>
    %149 = vector.shape_cast %148 : vector<128x32xf32> to vector<16x8x32xf32>
    %cst_42 = arith.constant dense<0.000000e+00> : vector<16x32xf32>
    %150 = vector.multi_reduction <add>, %149, %cst_42 [1] : vector<16x8x32xf32> to vector<16x32xf32>
    %c0_43 = arith.constant 0 : index
    %c0_44 = arith.constant 0 : index
    %151 = vector.load %arg6[%c0_43, %c0_44] : memref<32x32xf32, #tpu.memory_space<vmem>>, vector<32x32xf32>
    %cst_45 = arith.constant dense<0.000000e+00> : vector<16x32xf32>
    %152 = tpu.matmul %150, %151, %cst_45 {dimension_numbers = #tpu.dot_dimension_numbers<[1], [0], [0], [1], [0, 0, 1, 1], [], []>} : vector<16x32xf32>, vector<32x32xf32>, vector<16x32xf32> -> vector<16x32xf32>
    %153 = vector.broadcast %11 : vector<1x32xf32> to vector<16x32xf32>
    %154 = arith.addf %152, %153 : vector<16x32xf32>
    %c0_46 = arith.constant 0 : index
    %c0_47 = arith.constant 0 : index
    %155 = vector.load %arg8[%c0_46, %c0_47] : memref<16x32xf32, #tpu.memory_space<vmem>>, vector<16x32xf32>
    tpu.vector_store %arg8[%c0_46, %c0_47], %154 {strides = array<i32>} : memref<16x32xf32, #tpu.memory_space<vmem>>, vector<16x32xf32>,
    return
  }
  func.func @transform_0(%arg0: i32) -> (i32, i32, i32) {
    %c0_i32 = arith.constant 0 : i32
    %c0_i32_0 = arith.constant 0 : i32
    %c0_i32_1 = arith.constant 0 : i32
    return %arg0, %c0_i32, %c0_i32_0 : i32, i32, i32
  }
  func.func @transform_1(%arg0: i32) -> (i32, i32) {
    %c0_i32 = arith.constant 0 : i32
    %c0_i32_0 = arith.constant 0 : i32
    %c0_i32_1 = arith.constant 0 : i32
    return %c0_i32, %c0_i32_0 : i32, i32
  }
  func.func @transform_2(%arg0: i32) -> (i32, i32) {
    %c0_i32 = arith.constant 0 : i32
    %c0_i32_0 = arith.constant 0 : i32
    %c0_i32_1 = arith.constant 0 : i32
    return %c0_i32, %c0_i32_0 : i32, i32
  }
  func.func @transform_3(%arg0: i32) -> (i32, i32) {
    %c0_i32 = arith.constant 0 : i32
    %c0_i32_0 = arith.constant 0 : i32
    %c0_i32_1 = arith.constant 0 : i32
    return %c0_i32, %c0_i32_0 : i32, i32
  }
  func.func @transform_4(%arg0: i32) -> (i32, i32) {
    %c0_i32 = arith.constant 0 : i32
    %c0_i32_0 = arith.constant 0 : i32
    %c0_i32_1 = arith.constant 0 : i32
    return %c0_i32, %c0_i32_0 : i32, i32
  }
  func.func @transform_5(%arg0: i32) -> (i32, i32) {
    %c0_i32 = arith.constant 0 : i32
    %c0_i32_0 = arith.constant 0 : i32
    %c0_i32_1 = arith.constant 0 : i32
    return %c0_i32, %c0_i32_0 : i32, i32
  }
  func.func @transform_6(%arg0: i32) -> (i32, i32) {
    %c0_i32 = arith.constant 0 : i32
    %c0_i32_0 = arith.constant 0 : i32
    %c0_i32_1 = arith.constant 0 : i32
    return %c0_i32, %c0_i32_0 : i32, i32
  }
  func.func @transform_7(%arg0: i32) -> (i32, i32) {
    %c0_i32 = arith.constant 0 : i32
    %c0_i32_0 = arith.constant 0 : i32
    return %arg0, %c0_i32 : i32, i32
  }
}

</mosaic_0001>

<bundles_post_ra>
// kernel: tpu_custom_call.1
= control target key start
LH: loop header
LB: loop body
LE: loop exit
PB: predicated region body
PF: predicated region fallthrough
CT: control target
= control target key end

     0   :  { %12 = vsyncpa [#allocation3], 0  ;;  %s17516_s0 = inlined_call_operand.vmem [shape: f32[16,8,32], index: 0, kind: input, shape index: {}]   ;;  %s17517_s1 = inlined_call_operand.vmem [shape: f32[32,96], index: 1, kind: input, shape index: {}]   ;;  %s17518_s2 = inlined_call_operand.hbm [shape: f32[32,32], index: 2, kind: input, shape index: {}]   ;;  %s17519_s3 = inlined_call_operand.hbm [shape: f32[32,128], index: 3, kind: input, shape index: {}]   ;;  %s17520_s4 = inlined_call_operand.vmem [shape: f32[128,32], index: 4, kind: input, shape index: {}]   ;;  %s17521_s5 = inlined_call_operand.hbm [shape: f32[32,32], index: 5, kind: input, shape index: {}]   ;;  %s17522_s6 = inlined_call_operand.hbm [shape: f32[16,128], index: 6, kind: input, shape index: {}]   ;;  %s17523_s7 = inlined_call_operand.hbm [shape: f32[16,32], index: 7, kind: output, shape index: {}]  }
   0x1   :  { %13 = vsyncpa [#allocation6], 0 }
   0x2   :  { %14 = vsyncpa [#allocation9], 0 }
   0x3   :  { %15 = vsyncpa [#allocation4], 0  ;;  %s14357_s24 = smov [#allocation5]   ;;  %s14358_s26 = smov [#allocation2]  }
   0x4   :  { %s37_s25 = sshll.u32 %s14357_s24, 4  ;;  %s25_s27 = sshll.u32 %s14358_s26, 4  ;;  %s38_s25 = int_to_ptr.vmem [resolvable:$true] %s37_s25  ;;  %s26_s27 = int_to_ptr.vmem [resolvable:$true] %s25_s27 }
   0x5   :  { %s14257_s28 = scalar_lea.vmem %s38_s25, 512  ;;  %p14262_p1 = scmp.lt.s32.totalorder %s38_s25, %s38_s25 }
   0x6   :  { %p14258_p0 = scmp.ne.s32.totalorder %s38_s25, %s14257_s28  ;;  %p14263_p2 = scmp.lt.s32.totalorder %s14257_s28, %s14257_s28 }
   0x8   :  { %p14264_p3 = por %p14263_p2, %p14262_p1 }
   0xa   :  { %p14265_p4 = pnand %p14264_p3, %p14258_p0 }
   0xc   :  { %14268 = shalt.err (!%p14265_p4)
}
   0xd   :  { %s14359_s29 = smov 128   ;;  %s14360_s30 = smov 8  }
   0xe   :  { %43 = dma.hbm_to_vmem [thread:$0]  %s17519_s3, 512, %s38_s25, [#allocation6], %s14359_s29, %s14359_s29, %s14360_s30  }
   0xf   :  { %s14277_s10 = scalar_lea.vmem %s26_s27, 512  ;;  %p14282_p6 = scmp.lt.s32.totalorder %s26_s27, %s26_s27 }
  0x10   :  { %p14278_p5 = scmp.ne.s32.totalorder %s26_s27, %s14277_s10  ;;  %p14283_p7 = scmp.lt.s32.totalorder %s14277_s10, %s14277_s10 }
  0x12   :  { %p14284_p8 = por %p14283_p7, %p14282_p6 }
  0x14   :  { %p14285_p9 = pnand %p14284_p8, %p14278_p5 }
  0x16   :  { %14288 = shalt.err (!%p14285_p9)
}
  0x17   :  { %31 = dma.hbm_to_vmem [thread:$0]  %s17518_s2, 512, %s26_s27, [#allocation3], %s14359_s29, %s14359_s29, %s14360_s30  }
  0x18   :  { %s14361_s13 = smov [#allocation7]   ;;  %s14362_s15 = smov [#allocation8]  }
  0x19   :  { %s51_s14 = sshll.u32 %s14361_s13, 4  ;;  %s63_s16 = sshll.u32 %s14362_s15, 4  ;;  %s52_s14 = int_to_ptr.vmem [resolvable:$true] %s51_s14  ;;  %s64_s16 = int_to_ptr.vmem [resolvable:$true] %s63_s16 }
  0x1a   :  { %s14297_s3 = scalar_lea.vmem %s52_s14, 512  ;;  %p14302_p11 = scmp.lt.s32.totalorder %s52_s14, %s52_s14 }
  0x1b   :  { %p14298_p10 = scmp.ne.s32.totalorder %s52_s14, %s14297_s3  ;;  %p14303_p12 = scmp.lt.s32.totalorder %s14297_s3, %s14297_s3 }
  0x1d   :  { %p14304_p13 = por %p14303_p12, %p14302_p11 }
  0x1f   :  { %p14305_p0 = pnand %p14304_p13, %p14298_p10 }
  0x21   :  { %14308 = shalt.err (!%p14305_p0)
}
  0x22   :  { %57 = dma.hbm_to_vmem [thread:$0]  %s17521_s5, 512, %s52_s14, [#allocation6], %s14359_s29, %s14359_s29, %s14360_s30  }
  0x23   :  { %s14317_s2 = scalar_lea.vmem %s64_s16, 256  ;;  %p14322_p2 = scmp.lt.s32.totalorder %s64_s16, %s64_s16 }
  0x24   :  { %p14318_p1 = scmp.ne.s32.totalorder %s64_s16, %s14317_s2  ;;  %p14323_p3 = scmp.lt.s32.totalorder %s14317_s2, %s14317_s2 }
  0x26   :  { %p14324_p4 = por %p14323_p3, %p14322_p2 }
  0x28   :  { %p14325_p5 = pnand %p14324_p4, %p14318_p1 }
  0x2a   :  { %14328 = shalt.err (!%p14325_p5)
}
  0x2b   :  { %69 = dma.hbm_to_vmem [thread:$0]  %s17522_s6, 256, %s64_s16, [#allocation9], %s14359_s29, %s14359_s29, %s14360_s30  }
  0x2c   :  { %14349 = dma.done.wait [#allocation3], 512  }
  0x2d   :  { %14350 = vsyncadd [#allocation3], 4294966784 }
  0x2e   :  { %14351 = dma.done.wait [#allocation6], 1024  }
  0x2f   :  { %14352 = vsyncadd [#allocation6], 4294966272 }
  0x30   :  { %14353 = dma.done.wait [#allocation9], 256  }
  0x31   :  { %14354 = vsyncadd [#allocation9], 4294967040  ;;  %vm108_vm0 = vcmask 261120   ;;  %v103_v0 = vld [vmem:[%s17517_s1 + $0x18] sm:$0xff]  ;;  %v102_v1 = vld [vmem:[%s17517_s1 + $0x10] sm:$0xff]  ;;  %v17525_v20 = vmov 0.0   ;;  %v104_v21 = vlaneseq }
  0x32   :  { %13054 = vmatprep.subr.mxu0 %v103_v0  ;;  %v82_v2 = vld [vmem:[%s17516_s0] sm:$0xff]  ;;  %v101_v3 = vld [vmem:[%s17517_s1 + $0x8] sm:$0xff]  ;;  %v84_v6 = vld [vmem:[%s17516_s0 + $0x10] sm:$0xff]  ;;  %13086 = vmatprep.subr.mxu1 %v17525_v20  ;;  %vm14364_vm1 = vmmov 0   ;;  %s14365_s12 = smov 96   ;;  %s14366_s13 = smov 64  }
  0x33   :  { %13055 = vmatpush3.msra.mxu0 %v103_v0  ;;  %13062 = vmatprep.mubr.msk.f32.mxu0 %vm108_vm0, %v82_v2  ;;  %v100_v4 = vld [vmem:[%s17517_s1] sm:$0xff]  ;;  %v83_v5 = vld [vmem:[%s17516_s0 + $0x8] sm:$0xff]  ;;  %v85_v7 = vld [vmem:[%s17516_s0 + $0x18] sm:$0xff]  ;;  %v14521_v22 = vshrl.u32 %v104_v21, 7  ;;  %s14367_s1 = smov 88   ;;  %s14368_s14 = smov 120  }
  0x34   :  { %13056 = vmatprep.subr.mxu0 %v102_v1  ;;  %v86_v8 = vld [vmem:[%s17516_s0 + $0x20] sm:$0xff]  ;;  %v87_v9 = vld [vmem:[%s17516_s0 + $0x28] sm:$0xff]  ;;  %v88_v10 = vld [vmem:[%s17516_s0 + $0x30] sm:$0xff]  ;;  %13088 = vmatprep.mubr.msk.f32.mxu1 %vm14364_vm1, %v17525_v20  ;;  %vm305_vm2 = vcmask 64512   ;;  %s14369_s15 = smov 56   ;;  %s14370_s16 = smov 80  }
  0x35   :  { %13057 = vmatpush3.msra.mxu0 %v102_v1  ;;  %v89_v11 = vld [vmem:[%s17516_s0 + $0x38] sm:$0xff]  ;;  %v90_v12 = vld [vmem:[%s17516_s0 + $0x40] sm:$0xff]  ;;  %v91_v13 = vld [vmem:[%s17516_s0 + $0x48] sm:$0xff]  ;;  %17539 = vst [vmem:[#allocation15_spill] sm:$0xff] %v14521_v22  ;;  %v17524_v23 = vsub.s32 0, %v14521_v22  ;;  %s14371_s3 = smov 112  }
  0x36   :  { %13058 = vmatprep.subr.mxu0 %v101_v3  ;;  %v92_v14 = vld [vmem:[%s17516_s0 + $0x50] sm:$0xff]  ;;  %v93_v15 = vld [vmem:[%s17516_s0 + $0x58] sm:$0xff]  ;;  %v94_v16 = vld [vmem:[%s17516_s0 + $0x60] sm:$0xff]  ;;  %s14372_s17 = smov 48   ;;  %s14373_s18 = smov 72   ;;  %vm11055_vm3 = vcmask 130048  }
  0x37   :  { %13059 = vmatpush3.msra.mxu0 %v101_v3  ;;  %v95_v17 = vld [vmem:[%s17516_s0 + $0x68] sm:$0xff]  ;;  %v96_v18 = vld [vmem:[%s17516_s0 + $0x70] sm:$0xff]  ;;  %v97_v19 = vld [vmem:[%s17516_s0 + $0x78] sm:$0xff]  ;;  %s14374_s2 = smov 104   ;;  %s14375_s19 = smov 40   ;;  %vm11072_vm4 = vcmask 195584  }
  0x38   :  { %13060 = vmatprep.subr.mxu0 %v100_v4  ;;  %v98_v24 = vld [vmem:[#allocation8] sm:$0xff]  ;;  %s14376_s20 = smov 16   ;;  %s14377_s5 = smov 24   ;;  %vm12337_vm5 = vcmask 1041409   ;;  %vm12339_vm6 = vcmask 1042434   ;;  %vm12341_vm7 = vcmask 1043459  }
  0x39   :  { %13061 = vmatpush3.msra.mxu0 %v100_v4  ;;  %v107_v26 = vrot.slane %v98_v24, %v17524_v23  ;;  %vm12343_vm8 = vcmask 1044484   ;;  %vm12345_vm9 = vcmask 1045509   ;;  %vm12347_vm10 = vcmask 1046534  }
  0x3a   :  { %13063 = vmatmul.mubr.msk.f32.vlgmr.msra.gmra.mxu0 %vm108_vm0, %v83_v5  ;;  %13131 = vmatprep.subr.mxu0 %v17525_v20  ;;  %vm12349_vm11 = vcmask 1047559  }
  0x3b   :  { %13065 = vmatprep.mubr.msk.f32.mxu0 %vm108_vm0, %v84_v6 }
  0x3e   :  { %13066 = vmatmul.mubr.msk.f32.gmra.mxu0 %vm108_vm0, %v85_v7 }
  0x3f   :  { %13068 = vmatprep.mubr.msk.f32.mxu0 %vm108_vm0, %v86_v8 }
  0x42   :  { %13069 = vmatmul.mubr.msk.f32.gmra.mxu0 %vm108_vm0, %v87_v9 }
  0x43   :  { %13071 = vmatprep.mubr.msk.f32.mxu0 %vm108_vm0, %v88_v10 }
  0x46   :  { %13072 = vmatmul.mubr.msk.f32.gmra.mxu0 %vm108_vm0, %v89_v11 }
  0x47   :  { %13074 = vmatprep.mubr.msk.f32.mxu0 %vm108_vm0, %v90_v12 }
  0x4a   :  { %13075 = vmatmul.mubr.msk.f32.gmra.mxu0 %vm108_vm0, %v91_v13 }
  0x4b   :  { %13077 = vmatprep.mubr.msk.f32.mxu0 %vm108_vm0, %v92_v14 }
  0x4e   :  { %13078 = vmatmul.mubr.msk.f32.gmra.mxu0 %vm108_vm0, %v93_v15 }
  0x4f   :  { %13080 = vmatprep.mubr.msk.f32.mxu0 %vm108_vm0, %v94_v16 }
  0x52   :  { %13081 = vmatmul.mubr.msk.f32.gmra.mxu0 %vm108_vm0, %v95_v17 }
  0x53   :  { %13083 = vmatprep.mubr.msk.f32.mxu0 %vm108_vm0, %v96_v18 }
  0x56   :  { %13084 = vmatmul.mubr.msk.f32.gmra.mxu0 %vm108_vm0, %v97_v19 }
  0x57   :  { %13133 = vmatprep.mubr.msk.f32.mxu0 %vm14364_vm1, %v17525_v20 }
  0xfa   :  { %v13064_v25 = vpop.f32.mrf.mxu0 }
  0xfb   :  { %v14534_v31 = vadd.f32 %v13064_v25, %v107_v26 }
  0xfc   :  { %v223_v27 = vpop.f32.mrf.mxu0 }
  0xfd   :  { %v14530_v28 = vadd.f32 %v223_v27, %v107_v26  ;;  %17541 = vst [vmem:[#allocation17_spill] sm:$0xff] %v14534_v31 }
  0xfe   :  { %v13067_v29 = vpop.f32.mrf.mxu0 }
  0xff   :  { %17540 = vst [vmem:[#allocation16_spill] sm:$0xff] %v14530_v28  ;;  %303 = vrot.lane.b32.xlu0 %v14530_v28, %s14365_s12  ;;  %v14542_v35 = vadd.f32 %v13067_v29, %v107_v26 }
 0x100   :  { %v233_v30 = vpop.f32.mrf.mxu0 }
 0x101   :  { %v14536_v32 = vadd.f32 %v233_v30, %v107_v26  ;;  %17543 = vst [vmem:[#allocation19_spill] sm:$0xff] %v14542_v35 }
 0x102   :  { %v13070_v33 = vpop.f32.mrf.mxu0 }
 0x103   :  { %17542 = vst [vmem:[#allocation18_spill] sm:$0xff] %v14536_v32  ;;  %458 = vrot.lane.b32.xlu1 %v14536_v32, %s14365_s12  ;;  %381 = vrot.lane.b32.xlu0 %v14534_v31, %s14365_s12  ;;  %v14546_v38 = vadd.f32 %v13070_v33, %v107_v26 }
 0x104   :  { %v243_v34 = vpop.f32.mrf.mxu0 }
 0x105   :  { %v14544_v36 = vadd.f32 %v243_v34, %v107_v26  ;;  %17545 = vst [vmem:[#allocation21_spill] sm:$0xff] %v14546_v38 }
 0x106   :  { %v13073_v37 = vpop.f32.mrf.mxu0 }
 0x107   :  { %17544 = vst [vmem:[#allocation20_spill] sm:$0xff] %v14544_v36  ;;  %535 = vrot.lane.b32.xlu1 %v14542_v35, %s14365_s12  ;;  %612 = vrot.lane.b32.xlu0 %v14544_v36, %s14365_s12  ;;  %v14554_v42 = vadd.f32 %v13073_v37, %v107_v26 }
 0x108   :  { %v253_v39 = vpop.f32.mrf.mxu0 }
 0x109   :  { %v14552_v40 = vadd.f32 %v253_v39, %v107_v26 }
 0x10a   :  { %v13076_v41 = vpop.f32.mrf.mxu0 }
 0x10b   :  { %17546 = vst [vmem:[#allocation22_spill] sm:$0xff] %v14552_v40  ;;  %689 = vrot.lane.b32.xlu1 %v14546_v38, %s14365_s12  ;;  %766 = vrot.lane.b32.xlu0 %v14552_v40, %s14365_s12  ;;  %v14562_v46 = vadd.f32 %v13076_v41, %v107_v26 }
 0x10c   :  { %v263_v43 = vpop.f32.mrf.mxu0 }
 0x10d   :  { %v14560_v44 = vadd.f32 %v263_v43, %v107_v26 }
 0x10e   :  { %v13079_v45 = vpop.f32.mrf.mxu0 }
 0x10f   :  { %843 = vrot.lane.b32.xlu1 %v14554_v42, %s14365_s12  ;;  %920 = vrot.lane.b32.xlu0 %v14560_v44, %s14365_s12  ;;  %v14570_v50 = vadd.f32 %v13079_v45, %v107_v26 }
 0x110   :  { %v273_v47 = vpop.f32.mrf.mxu0 }
 0x111   :  { %v14568_v48 = vadd.f32 %v273_v47, %v107_v26 }
 0x112   :  { %v13082_v49 = vpop.f32.mrf.mxu0 }
 0x113   :  { %17547 = vst [vmem:[#allocation23_spill] sm:$0xff] %v14568_v48  ;;  %997 = vrot.lane.b32.xlu1 %v14562_v46, %s14365_s12  ;;  %1074 = vrot.lane.b32.xlu0 %v14568_v48, %s14365_s12  ;;  %v14578_v54 = vadd.f32 %v13082_v49, %v107_v26 }
 0x114   :  { %v283_v51 = vpop.f32.mrf.mxu0 }
 0x115   :  { %v14576_v52 = vadd.f32 %v283_v51, %v107_v26 }
 0x116   :  { %v13085_v53 = vpop.f32.mrf.mxu0 }
 0x117   :  { %1151 = vrot.lane.b32.xlu1 %v14570_v50, %s14365_s12  ;;  %1228 = vrot.lane.b32.xlu0 %v14576_v52, %s14365_s12  ;;  %v14586_v57 = vadd.f32 %v13085_v53, %v107_v26 }
 0x118   :  { %v293_v55 = vpop.f32.mrf.mxu0 }
 0x119   :  { %v14584_v56 = vadd.f32 %v293_v55, %v107_v26  ;;  %17549 = vst [vmem:[#allocation25_spill] sm:$0xff] %v14586_v57 }
 0x11b   :  { %17548 = vst [vmem:[#allocation24_spill] sm:$0xff] %v14584_v56  ;;  %1305 = vrot.lane.b32.xlu1 %v14578_v54, %s14365_s12  ;;  %1382 = vrot.lane.b32.xlu0 %v14584_v56, %s14365_s12 }
 0x11f   :  { %1459 = vrot.lane.b32.xlu1 %v14586_v57, %s14365_s12  ;;  %1787 = vrot.lane.b32.xlu0 %v14534_v31, %s14366_s13 }
 0x123   :  { %1711 = vrot.lane.b32.xlu1 %v14530_v28, %s14366_s13  ;;  %1863 = vrot.lane.b32.xlu0 %v14536_v32, %s14366_s13 }
 0x127   :  { %2395 = vrot.lane.b32.xlu1 %v14562_v46, %s14366_s13  ;;  %1939 = vrot.lane.b32.xlu0 %v14542_v35, %s14366_s13 }
 0x12b   :  { %2929 = vrot.lane.b32.xlu1 %v14530_v28, %s14367_s1  ;;  %2015 = vrot.lane.b32.xlu0 %v14544_v36, %s14366_s13 }
 0x12f   :  { %2927 = vrot.lane.b32.xlu1 %v14530_v28, %s14368_s14  ;;  %2091 = vrot.lane.b32.xlu0 %v14546_v38, %s14366_s13 }
 0x133   :  { %3085 = vrot.lane.b32.xlu1 %v14536_v32, %s14367_s1  ;;  %2167 = vrot.lane.b32.xlu0 %v14552_v40, %s14366_s13 }
 0x137   :  { %3083 = vrot.lane.b32.xlu1 %v14536_v32, %s14368_s14  ;;  %2243 = vrot.lane.b32.xlu0 %v14554_v42, %s14366_s13 }
 0x13b   :  { %3241 = vrot.lane.b32.xlu1 %v14544_v36, %s14367_s1  ;;  %2319 = vrot.lane.b32.xlu0 %v14560_v44, %s14366_s13 }
 0x13f   :  { %3239 = vrot.lane.b32.xlu1 %v14544_v36, %s14368_s14  ;;  %2471 = vrot.lane.b32.xlu0 %v14568_v48, %s14366_s13 }
 0x143   :  { %2775 = vrot.lane.b32.xlu1 %v14584_v56, %s14366_s13  ;;  %2547 = vrot.lane.b32.xlu0 %v14570_v50, %s14366_s13 }
 0x147   :  { %2623 = vrot.lane.b32.xlu0 %v14576_v52, %s14366_s13 }
 0x14b   :  { %2699 = vrot.lane.b32.xlu0 %v14578_v54, %s14366_s13 }
 0x14f   :  { %2851 = vrot.lane.b32.xlu0 %v14586_v57, %s14366_s13 }
 0x153   :  { %3007 = vrot.lane.b32.xlu0 %v14534_v31, %s14367_s1 }
 0x157   :  { %3005 = vrot.lane.b32.xlu0 %v14534_v31, %s14368_s14 }
 0x15b   :  { %3163 = vrot.lane.b32.xlu0 %v14542_v35, %s14367_s1 }
 0x15f   :  { %3161 = vrot.lane.b32.xlu0 %v14542_v35, %s14368_s14 }
 0x163   :  { %3319 = vrot.lane.b32.xlu0 %v14546_v38, %s14367_s1 }
 0x171   :  { %v304_v58 = vpop.permute.xlu0 %303 }
 0x172   :  { %13087 = vmatpush3.xpose.msk.msra.mxu1 %vm305_vm2, %v304_v58 }
 0x173   :  { %13091 = vmatprep.subr.mxu1 %v17525_v20 }
 0x175   :  { %v459_v59 = vpop.permute.xlu1 %458  ;;  %13089 = vmatmul.mubr.msk.f32.vlgmr.msra.gmra.mxu1 %vm305_vm2, %v14530_v28  ;;  %v382_v60 = vpop.permute.xlu0 %381 }
 0x176   :  { %13092 = vmatpush3.xpose.msk.msra.mxu1 %vm305_vm2, %v382_v60  ;;  %13093 = vmatprep.mubr.msk.f32.mxu1 %vm14364_vm1, %v17525_v20 }
 0x177   :  { %13096 = vmatprep.subr.mxu1 %v17525_v20 }
 0x179   :  { %v536_v61 = vpop.permute.xlu1 %535  ;;  %13094 = vmatmul.mubr.msk.f32.vlgmr.msra.gmra.mxu1 %vm305_vm2, %v14534_v31  ;;  %v613_v62 = vpop.permute.xlu0 %612 }
 0x17a   :  { %13097 = vmatpush3.xpose.msk.msra.mxu1 %vm305_vm2, %v459_v59  ;;  %13098 = vmatprep.mubr.msk.f32.mxu1 %vm14364_vm1, %v17525_v20 }
 0x17b   :  { %13101 = vmatprep.subr.mxu1 %v17525_v20 }
 0x17d   :  { %v690_v63 = vpop.permute.xlu1 %689  ;;  %13099 = vmatmul.mubr.msk.f32.vlgmr.msra.gmra.mxu1 %vm305_vm2, %v14536_v32  ;;  %v767_v0 = vpop.permute.xlu0 %766 }
 0x17e   :  { %13102 = vmatpush3.xpose.msk.msra.mxu1 %vm305_vm2, %v536_v61  ;;  %13103 = vmatprep.mubr.msk.f32.mxu1 %vm14364_vm1, %v17525_v20 }
 0x17f   :  { %13106 = vmatprep.subr.mxu1 %v17525_v20 }
 0x181   :  { %v844_v1 = vpop.permute.xlu1 %843  ;;  %13104 = vmatmul.mubr.msk.f32.vlgmr.msra.gmra.mxu1 %vm305_vm2, %v14542_v35  ;;  %v921_v2 = vpop.permute.xlu0 %920 }
 0x182   :  { %13107 = vmatpush3.xpose.msk.msra.mxu1 %vm305_vm2, %v613_v62  ;;  %13108 = vmatprep.mubr.msk.f32.mxu1 %vm14364_vm1, %v17525_v20 }
 0x183   :  { %13111 = vmatprep.subr.mxu1 %v17525_v20 }
 0x185   :  { %v998_v3 = vpop.permute.xlu1 %997  ;;  %13109 = vmatmul.mubr.msk.f32.vlgmr.msra.gmra.mxu1 %vm305_vm2, %v14544_v36  ;;  %v1075_v4 = vpop.permute.xlu0 %1074 }
 0x186   :  { %13112 = vmatpush3.xpose.msk.msra.mxu1 %vm305_vm2, %v690_v63  ;;  %13132 = vmatpush3.xpose.msk.msra.mxu0 %vm305_vm2, %v998_v3 }
 0x187   :  { %13113 = vmatprep.mubr.msk.f32.mxu1 %vm14364_vm1, %v17525_v20  ;;  %13141 = vmatprep.subr.mxu0 %v17525_v20 }
 0x188   :  { %13116 = vmatprep.subr.mxu1 %v17525_v20 }
 0x189   :  { %13134 = vmatmul.mubr.msk.f32.vlgmr.msra.gmra.mxu0 %vm305_vm2, %v14562_v46  ;;  %v1152_v5 = vpop.permute.xlu1 %1151  ;;  %13114 = vmatmul.mubr.msk.f32.vlgmr.msra.gmra.mxu1 %vm305_vm2, %v14546_v38  ;;  %v1229_v6 = vpop.permute.xlu0 %1228 }
 0x18a   :  { %13117 = vmatpush3.xpose.msk.msra.mxu1 %vm305_vm2, %v767_v0  ;;  %13142 = vmatpush3.xpose.msk.msra.mxu0 %vm305_vm2, %v1152_v5 }
 0x18b   :  { %13118 = vmatprep.mubr.msk.f32.mxu1 %vm14364_vm1, %v17525_v20  ;;  %13143 = vmatprep.mubr.msk.f32.mxu0 %vm14364_vm1, %v17525_v20 }
 0x18c   :  { %13151 = vmatprep.subr.mxu0 %v17525_v20  ;;  %13121 = vmatprep.subr.mxu1 %v17525_v20 }
 0x18d   :  { %13144 = vmatmul.mubr.msk.f32.vlgmr.msra.gmra.mxu0 %vm305_vm2, %v14570_v50  ;;  %v1306_v7 = vpop.permute.xlu1 %1305  ;;  %13119 = vmatmul.mubr.msk.f32.vlgmr.msra.gmra.mxu1 %vm305_vm2, %v14552_v40  ;;  %v1383_v8 = vpop.permute.xlu0 %1382 }
 0x18e   :  { %13122 = vmatpush3.xpose.msk.msra.mxu1 %vm305_vm2, %v844_v1  ;;  %13152 = vmatpush3.xpose.msk.msra.mxu0 %vm305_vm2, %v1306_v7 }
 0x18f   :  { %13123 = vmatprep.mubr.msk.f32.mxu1 %vm14364_vm1, %v17525_v20  ;;  %13153 = vmatprep.mubr.msk.f32.mxu0 %vm14364_vm1, %v17525_v20 }
 0x190   :  { %13161 = vmatprep.subr.mxu0 %v17525_v20  ;;  %13126 = vmatprep.subr.mxu1 %v17525_v20 }
 0x191   :  { %13154 = vmatmul.mubr.msk.f32.vlgmr.msra.gmra.mxu0 %vm305_vm2, %v14578_v54  ;;  %v1460_v9 = vpop.permute.xlu1 %1459  ;;  %13124 = vmatmul.mubr.msk.f32.vlgmr.msra.gmra.mxu1 %vm305_vm2, %v14554_v42  ;;  %v1788_v10 = vpop.permute.xlu0 %1787 }
 0x192   :  { %13127 = vmatpush3.xpose.msk.msra.mxu1 %vm305_vm2, %v921_v2  ;;  %13162 = vmatpush3.xpose.msk.msra.mxu0 %vm305_vm2, %v1460_v9 }
 0x193   :  { %13128 = vmatprep.mubr.msk.f32.mxu1 %vm14364_vm1, %v17525_v20  ;;  %13163 = vmatprep.mubr.msk.f32.mxu0 %vm14364_vm1, %v17525_v20 }
 0x194   :  { %13171 = vmatprep.subr.mxu0 %v17525_v20  ;;  %13136 = vmatprep.subr.mxu1 %v17525_v20 }
 0x195   :  { %13164 = vmatmul.mubr.msk.f32.vlgmr.msra.gmra.mxu0 %vm305_vm2, %v14586_v57  ;;  %13129 = vmatmul.mubr.msk.f32.vlgmr.msra.gmra.mxu1 %vm305_vm2, %v14560_v44  ;;  %v1712_v11 = vpop.permute.xlu1 %1711 }
 0x196   :  { %13137 = vmatpush3.xpose.msk.msra.mxu1 %vm305_vm2, %v1075_v4  ;;  %13172 = vmatpush3.msra.mxu0 %v1788_v10 }
 0x197   :  { %13138 = vmatprep.mubr.msk.f32.mxu1 %vm14364_vm1, %v17525_v20  ;;  %13146 = vmatprep.subr.mxu1 %v17525_v20 }
 0x198   :  { %13173 = vmatprep.mubr.msk.f32.mxu0 %vm14364_vm1, %v17525_v20  ;;  %13181 = vmatprep.subr.mxu0 %v17525_v20 }
 0x199   :  { %13139 = vmatmul.mubr.msk.f32.vlgmr.msra.gmra.mxu1 %vm305_vm2, %v14568_v48 }
 0x19a   :  { %13147 = vmatpush3.xpose.msk.msra.mxu1 %vm305_vm2, %v1229_v6  ;;  %13148 = vmatprep.mubr.msk.f32.mxu1 %vm14364_vm1, %v17525_v20 }
 0x19b   :  { %13156 = vmatprep.subr.mxu1 %v17525_v20 }
 0x19d   :  { %13149 = vmatmul.mubr.msk.f32.vlgmr.msra.gmra.mxu1 %vm305_vm2, %v14576_v52 }
 0x19e   :  { %13157 = vmatpush3.xpose.msk.msra.mxu1 %vm305_vm2, %v1383_v8  ;;  %13158 = vmatprep.mubr.msk.f32.mxu1 %vm14364_vm1, %v17525_v20  ;;  %v14784_v8 = vpop.permute.xlu0 %1863 }
 0x19f   :  { %13166 = vmatprep.subr.mxu1 %v17525_v20 }
 0x1a1   :  { %13159 = vmatmul.mubr.msk.f32.vlgmr.msra.gmra.mxu1 %vm305_vm2, %v14584_v56 }
 0x1a2   :  { %13167 = vmatpush3.msra.mxu1 %v1712_v11  ;;  %13168 = vmatprep.mubr.msk.f32.mxu1 %vm14364_vm1, %v17525_v20 }
 0x1a3   :  { %13176 = vmatprep.subr.mxu1 %v17525_v20 }
 0x235   :  { %v14730_v12 = vpop.f32.mrf.mxu1 }
 0x236   :  { %v1535_v13 = vsel %vm305_vm2, %v14730_v12, -inf }
 0x237   :  { %1536 = vmax.xlane.f32.xlu0 %v1535_v13  ;;  %v13090_v14 = vpop.f32.mrf.mxu1 }
 0x239   :  { %v14734_v15 = vpop.f32.mrf.mxu1 }
 0x23a   :  { %v1538_v16 = vsel %vm305_vm2, %v14734_v15, -inf }
 0x23b   :  { %1539 = vmax.xlane.f32.xlu1 %v1538_v16  ;;  %v13095_v17 = vpop.f32.mrf.mxu1  ;;  %v14794_v16 = vpop.permute.xlu0 %1939 }
 0x23d   :  { %v14738_v18 = vpop.f32.mrf.mxu1 }
 0x23e   :  { %v1541_v19 = vsel %vm305_vm2, %v14738_v18, -inf }
 0x23f   :  { %1542 = vmax.xlane.f32.xlu0 %v1541_v19  ;;  %v13100_v21 = vpop.f32.mrf.mxu1 }
 0x240   :  { %v14798_v21 = vpop.permute.xlu0 %2015 }
 0x241   :  { %v14742_v24 = vpop.f32.mrf.mxu1 }
 0x242   :  { %v1544_v25 = vsel %vm305_vm2, %v14742_v24, -inf }
 0x243   :  { %1545 = vmax.xlane.f32.xlu0 %v1544_v25  ;;  %v13105_v26 = vpop.f32.mrf.mxu1 }
 0x244   :  { %v14800_v25 = vpop.permute.xlu0 %2091 }
 0x245   :  { %v14746_v27 = vpop.f32.mrf.mxu1 }
 0x246   :  { %v1547_v29 = vsel %vm305_vm2, %v14746_v27, -inf }
 0x247   :  { %1548 = vmax.xlane.f32.xlu1 %v1547_v29  ;;  %v13110_v30 = vpop.f32.mrf.mxu1 }
 0x248   :  { %v14802_v26 = vpop.permute.xlu0 %2167 }
 0x249   :  { %v14750_v33 = vpop.f32.mrf.mxu1  ;;  %v14752_v34 = vpop.f32.mrf.mxu0 }
 0x24a   :  { %v1562_v37 = vsel %vm305_vm2, %v14752_v34, -inf  ;;  %v1550_v59 = vsel %vm305_vm2, %v14750_v33, -inf }
 0x24b   :  { %v13135_v39 = vpop.f32.mrf.mxu0  ;;  %1563 = vmax.xlane.f32.xlu0 %v1562_v37  ;;  %v13115_v41 = vpop.f32.mrf.mxu1 }
 0x24c   :  { %v14808_v29 = vpop.permute.xlu0 %2243 }
 0x24d   :  { %v14756_v43 = vpop.f32.mrf.mxu1  ;;  %v14758_v45 = vpop.f32.mrf.mxu0 }
 0x24e   :  { %v1568_v47 = vsel %vm305_vm2, %v14758_v45, -inf  ;;  %v1553_v49 = vsel %vm305_vm2, %v14756_v43, -inf }
 0x24f   :  { %v13145_v51 = vpop.f32.mrf.mxu0  ;;  %1569 = vmax.xlane.f32.xlu0 %v1568_v47  ;;  %1554 = vmax.xlane.f32.xlu1 %v1553_v49  ;;  %v13120_v53 = vpop.f32.mrf.mxu1 }
 0x250   :  { %v14810_v30 = vpop.permute.xlu0 %2319  ;;  %v14818_v47 = vpop.permute.xlu1 %2395 }
 0x251   :  { %v14764_v55 = vpop.f32.mrf.mxu1  ;;  %v14766_v58 = vpop.f32.mrf.mxu0 }
 0x252   :  { %v1574_v0 = vsel %vm305_vm2, %v14766_v58, -inf  ;;  %v1556_v10 = vsel %vm305_vm2, %v14764_v55, -inf }
 0x253   :  { %v13155_v60 = vpop.f32.mrf.mxu0  ;;  %1551 = vmax.xlane.f32.xlu0 %v1550_v59  ;;  %v13125_v61 = vpop.f32.mrf.mxu1 }
 0x254   :  { %v14812_v37 = vpop.permute.xlu0 %2471  ;;  %v14822_v51 = vpop.permute.xlu1 %2929 }
 0x255   :  { %v14770_v62 = vpop.f32.mrf.mxu1  ;;  %v14772_v63 = vpop.f32.mrf.mxu0  ;;  %17550 = vst [vmem:[#allocation26_spill] sm:$0xff] %v14822_v51 }
 0x256   :  { %v1559_v1 = vsel %vm305_vm2, %v14770_v62, -inf  ;;  %v1580_v5 = vsel %vm305_vm2, %v14772_v63, -inf }
 0x257   :  { %v13165_v2 = vpop.f32.mrf.mxu0  ;;  %1575 = vmax.xlane.f32.xlu0 %v1574_v0  ;;  %1560 = vmax.xlane.f32.xlu1 %v1559_v1  ;;  %v13130_v3 = vpop.f32.mrf.mxu1 }
 0x258   :  { %v14814_v39 = vpop.permute.xlu0 %2547  ;;  %v14826_v59 = vpop.permute.xlu1 %2927 }
 0x259   :  { %v14778_v4 = vpop.f32.mrf.mxu1  ;;  %17551 = vst [vmem:[#allocation27_spill] sm:$0xff] %v14826_v59 }
 0x25a   :  { %v1565_v6 = vsel %vm305_vm2, %v14778_v4, -inf }
 0x25b   :  { %1581 = vmax.xlane.f32.xlu0 %v1580_v5  ;;  %1566 = vmax.xlane.f32.xlu1 %v1565_v6  ;;  %v13140_v7 = vpop.f32.mrf.mxu1 }
 0x25c   :  { %v14816_v41 = vpop.permute.xlu0 %2623  ;;  %v14830_v61 = vpop.permute.xlu1 %3085 }
 0x25d   :  { %v14786_v9 = vpop.f32.mrf.mxu1  ;;  %17552 = vst [vmem:[#allocation28_spill] sm:$0xff] %v14830_v61 }
 0x25e   :  { %v1571_v11 = vsel %vm305_vm2, %v14786_v9, -inf }
 0x25f   :  { %1557 = vmax.xlane.f32.xlu0 %v1556_v10  ;;  %1572 = vmax.xlane.f32.xlu1 %v1571_v11  ;;  %v13150_v13 = vpop.f32.mrf.mxu1 }
 0x260   :  { %v14820_v49 = vpop.permute.xlu0 %2699  ;;  %v14834_v1 = vpop.permute.xlu1 %3083 }
 0x261   :  { %v14792_v14 = vpop.f32.mrf.mxu1  ;;  %17553 = vst [vmem:[#allocation29_spill] sm:$0xff] %v14834_v1 }
 0x262   :  { %v1577_v17 = vsel %vm305_vm2, %v14792_v14, -inf }
 0x263   :  { %1578 = vmax.xlane.f32.xlu1 %v1577_v17  ;;  %v13160_v19 = vpop.f32.mrf.mxu1 }
 0x264   :  { %v14824_v53 = vpop.permute.xlu0 %2851  ;;  %v14838_v3 = vpop.permute.xlu1 %3241 }
 0x265   :  { %17554 = vst [vmem:[#allocation30_spill] sm:$0xff] %v14838_v3 }
 0x268   :  { %v14828_v60 = vpop.permute.xlu0 %3007  ;;  %v14842_v6 = vpop.permute.xlu1 %3239 }
 0x269   :  { %17555 = vst [vmem:[#allocation31_spill] sm:$0xff] %v14842_v6 }
 0x26c   :  { %v14832_v0 = vpop.permute.xlu0 %3005  ;;  %v14846_v10 = vpop.permute.xlu1 %2775 }
 0x26d   :  { %17556 = vst [vmem:[#allocation32_spill] sm:$0xff] %v14846_v10 }
 0x270   :  { %v14836_v2 = vpop.permute.xlu0 %3163 }
 0x274   :  { %3397 = vrot.lane.b32.xlu1 %v14552_v40, %s14367_s1  ;;  %v14840_v5 = vpop.permute.xlu0 %3161 }
 0x275   :  { %3317 = vrot.lane.b32.xlu0 %v14546_v38, %s14368_s14 }
 0x278   :  { %v14844_v7 = vpop.permute.xlu0 %3319 }
 0x2c0   :  { %v1537_v11 = vpop.xlane.xlu0 %1536 }
 0x2c1   :  { %v1583_v13 = vsub.f32 %v14730_v12, %v1537_v11 }
 0x2c3   :  { %v1599_v17 = vmul.f32 1.442695, %v1583_v13 }
 0x2c4   :  { %v1540_v19 = vpop.xlane.xlu1 %1539 }
 0x2c5   :  { %13911 = vpow2.f32 %v1599_v17  ;;  %v1584_v23 = vsub.f32 %v14734_v15, %v1540_v19 }
 0x2c7   :  { %v1601_v20 = vmul.f32 1.442695, %v1584_v23 }
 0x2c8   :  { %v1543_v22 = vpop.xlane.xlu0 %1542 }
 0x2c9   :  { %13913 = vpow2.f32 %v1601_v20  ;;  %v1585_v3 = vsub.f32 %v14738_v18, %v1543_v22 }
 0x2cb   :  { %v1603_v1 = vmul.f32 1.442695, %v1585_v3 }
 0x2cc   :  { %v1546_v61 = vpop.xlane.xlu0 %1545 }
 0x2cd   :  { %13915 = vpow2.f32 %v1603_v1  ;;  %v1586_v6 = vsub.f32 %v14742_v24, %v1546_v61 }
 0x2cf   :  { %v1605_v59 = vmul.f32 1.442695, %v1586_v6 }
 0x2d0   :  { %v1549_v51 = vpop.xlane.xlu1 %1548 }
 0x2d1   :  { %13917 = vpow2.f32 %v1605_v59  ;;  %v1587_v12 = vsub.f32 %v14746_v27, %v1549_v51 }
 0x2d2   :  { %v14853_v11 = vpop.eup %13911 }
 0x2d3   :  { %v1607_v13 = vmul.f32 1.442695, %v1587_v12  ;;  %v1631_v23 = vsel %vm305_vm2, %v14853_v11, 0.0 }
 0x2d4   :  { %1632 = vadd.xlane.f32.xlu1 %v1631_v23  ;;  %v1564_v20 = vpop.xlane.xlu0 %1563 }
 0x2d5   :  { %13919 = vpow2.f32 %v1607_v13  ;;  %v1592_v22 = vsub.f32 %v14752_v34, %v1564_v20 }
 0x2d6   :  { %v14858_v15 = vpop.eup %13913 }
 0x2d7   :  { %v1617_v18 = vmul.f32 1.442695, %v1592_v22  ;;  %v1634_v24 = vsel %vm305_vm2, %v14858_v15, 0.0 }
 0x2d8   :  { %v1555_v59 = vpop.xlane.xlu1 %1554  ;;  %1635 = vadd.xlane.f32.xlu0 %v1634_v24  ;;  %v1570_v27 = vpop.xlane.xlu0 %1569 }
 0x2d9   :  { %13921 = vpow2.f32 %v1617_v18  ;;  %v1589_v51 = vsub.f32 %v14756_v43, %v1555_v59  ;;  %v1594_v61 = vsub.f32 %v14758_v45, %v1570_v27 }
 0x2da   :  { %v14864_v1 = vpop.eup %13915 }
 0x2db   :  { %v1611_v3 = vmul.f32 1.442695, %v1589_v51  ;;  %v1621_v6 = vmul.f32 1.442695, %v1594_v61  ;;  %v1637_v34 = vsel %vm305_vm2, %v14864_v1, 0.0 }
 0x2dc   :  { %1638 = vadd.xlane.f32.xlu1 %v1637_v34  ;;  %v1552_v17 = vpop.xlane.xlu0 %1551 }
 0x2dd   :  { %13923 = vpow2.f32 %v1611_v3  ;;  %v1588_v19 = vsub.f32 %v14750_v33, %v1552_v17 }
 0x2de   :  { %v14869_v12 = vpop.eup %13917  ;;  %13925 = vpow2.f32 %v1621_v6 }
 0x2df   :  { %v1609_v13 = vmul.f32 1.442695, %v1588_v19  ;;  %v1640_v43 = vsel %vm305_vm2, %v14869_v12, 0.0 }
 0x2e0   :  { %1641 = vadd.xlane.f32.xlu0 %v1640_v43  ;;  %v1576_v45 = vpop.xlane.xlu0 %1575 }
 0x2e1   :  { %13927 = vpow2.f32 %v1609_v13  ;;  %v1596_v23 = vsub.f32 %v14766_v58, %v1576_v45 }
 0x2e2   :  { %v14874_v20 = vpop.eup %13919 }
 0x2e3   :  { %v1625_v22 = vmul.f32 1.442695, %v1596_v23  ;;  %v1643_v18 = vsel %vm305_vm2, %v14874_v20, 0.0 }
 0x2e4   :  { %1644 = vadd.xlane.f32.xlu1 %v1643_v18  ;;  %v1582_v33 = vpop.xlane.xlu0 %1581 }
 0x2e5   :  { %v1598_v24 = vsub.f32 %v14772_v63, %v1582_v33  ;;  %13929 = vpow2.f32 %v1625_v22  ;;  %v1561_v33 = vpop.xlane.xlu1 %1560 }
 0x2e6   :  { %v14879_v59 = vpop.eup %13921 }
 0x2e7   :  { %v1629_v27 = vmul.f32 1.442695, %v1598_v24  ;;  %v1658_v51 = vsel %vm305_vm2, %v14879_v59, 0.0 }
 0x2e8   :  { %1659 = vadd.xlane.f32.xlu0 %v1658_v51  ;;  %v1558_v61 = vpop.xlane.xlu0 %1557  ;;  %v1591_v51 = vsub.f32 %v14770_v62, %v1561_v33 }
 0x2e9   :  { %v1590_v58 = vsub.f32 %v14764_v55, %v1558_v61  ;;  %13931 = vpow2.f32 %v1629_v27  ;;  %v1567_v24 = vpop.xlane.xlu1 %1566 }
 0x2ea   :  { %v14884_v3 = vpop.eup %13923 }
 0x2eb   :  { %v14886_v6 = vpop.eup %13925  ;;  %v1613_v34 = vmul.f32 1.442695, %v1590_v58  ;;  %v1649_v63 = vsel %vm305_vm2, %v14884_v3, 0.0  ;;  %v1593_v58 = vsub.f32 %v14778_v4, %v1567_v24 }
 0x2ec   :  { %1650 = vadd.xlane.f32.xlu1 %v1649_v63  ;;  %v1664_v17 = vsel %vm305_vm2, %v14886_v6, 0.0 }
 0x2ed   :  { %1665 = vadd.xlane.f32.xlu0 %v1664_v17  ;;  %13933 = vpow2.f32 %v1613_v34  ;;  %v1573_v27 = vpop.xlane.xlu1 %1572  ;;  %v1615_v34 = vmul.f32 1.442695, %v1591_v51  ;;  %v1619_v17 = vmul.f32 1.442695, %v1593_v58  ;;  %v14958_v51 = vpop.permute.xlu0 %3317 }
 0x2ee   :  { %v14892_v19 = vpop.eup %13927 }
 0x2ef   :  { %v1646_v55 = vsel %vm305_vm2, %v14892_v19, 0.0  ;;  %13935 = vpow2.f32 %v1615_v34 }
 0x2f0   :  { %13937 = vpow2.f32 %v1619_v17 }
 0x2f1   :  { %1647 = vadd.xlane.f32.xlu0 %v1646_v55  ;;  %v1579_v61 = vpop.xlane.xlu1 %1578  ;;  %v1595_v55 = vsub.f32 %v14786_v9, %v1573_v27 }
 0x2f2   :  { %v14896_v13 = vpop.eup %13929  ;;  %v1597_v63 = vsub.f32 %v14792_v14, %v1579_v61 }
 0x2f3   :  { %v1670_v43 = vsel %vm305_vm2, %v14896_v13, 0.0 }
 0x2f5   :  { %1671 = vadd.xlane.f32.xlu0 %v1670_v43  ;;  %v1627_v43 = vmul.f32 1.442695, %v1597_v63  ;;  %v14952_v27 = vpop.permute.xlu1 %3397 }
 0x2f6   :  { %v14900_v45 = vpop.eup %13931 }
 0x2f7   :  { %v1676_v23 = vsel %vm305_vm2, %v14900_v45, 0.0  ;;  %13939 = vpow2.f32 %v1627_v43 }
 0x2f8   :  { %1677 = vadd.xlane.f32.xlu1 %v1676_v23  ;;  %v1623_v23 = vmul.f32 1.442695, %v1595_v55 }
 0x2fa   :  { %v14904_v22 = vpop.eup %13933  ;;  %13941 = vpow2.f32 %v1623_v23 }
 0x2fb   :  { %v1652_v18 = vsel %vm305_vm2, %v14904_v22, 0.0 }
 0x2fc   :  { %1653 = vadd.xlane.f32.xlu0 %v1652_v18  ;;  %v14916_v18 = vpop.eup %13935 }
 0x2fd   :  { %v14918_v10 = vpop.eup %13937  ;;  %v1655_v62 = vsel %vm305_vm2, %v14916_v18, 0.0 }
 0x2fe   :  { %v1661_v14 = vsel %vm305_vm2, %v14918_v10, 0.0 }
 0x304   :  { %v14922_v4 = vpop.eup %13939 }
 0x305   :  { %v1673_v9 = vsel %vm305_vm2, %v14922_v4, 0.0 }
 0x307   :  { %v14928_v33 = vpop.eup %13941 }
 0x308   :  { %v1667_v24 = vsel %vm305_vm2, %v14928_v33, 0.0 }
 0x309   :  { %3395 = vrot.lane.b32.xlu1 %v14552_v40, %s14368_s14 }
 0x312   :  { %3475 = vrot.lane.b32.xlu0 %v14554_v42, %s14367_s1 }
 0x32d   :  { %1656 = vadd.xlane.f32.xlu1 %v1655_v62 }
 0x331   :  { %1662 = vadd.xlane.f32.xlu1 %v1661_v14  ;;  %1674 = vadd.xlane.f32.xlu0 %v1673_v9  ;;  %v17557_v14 = vmov 0.0  }
 0x335   :  { %1668 = vadd.xlane.f32.xlu1 %v1667_v24 }
 0x346   :  { %3553 = vrot.lane.b32.xlu1 %v14560_v44, %s14367_s1 }
 0x347   :  { %3473 = vrot.lane.b32.xlu0 %v14554_v42, %s14368_s14 }
 0x34a   :  { %3551 = vrot.lane.b32.xlu1 %v14560_v44, %s14368_s14 }
 0x34b   :  { %3631 = vrot.lane.b32.xlu0 %v14562_v46, %s14367_s1 }
 0x34e   :  { %3709 = vrot.lane.b32.xlu1 %v14568_v48, %s14367_s1 }
 0x34f   :  { %3629 = vrot.lane.b32.xlu0 %v14562_v46, %s14368_s14 }
 0x352   :  { %3707 = vrot.lane.b32.xlu1 %v14568_v48, %s14368_s14 }
 0x353   :  { %3787 = vrot.lane.b32.xlu0 %v14570_v50, %s14367_s1 }
 0x356   :  { %3865 = vrot.lane.b32.xlu1 %v14576_v52, %s14367_s1 }
 0x357   :  { %3785 = vrot.lane.b32.xlu0 %v14570_v50, %s14368_s14 }
 0x35a   :  { %3863 = vrot.lane.b32.xlu1 %v14576_v52, %s14368_s14 }
 0x35b   :  { %3943 = vrot.lane.b32.xlu0 %v14578_v54, %s14367_s1 }
 0x35d   :  { %v1633_v61 = vpop.xlane.xlu1 %1632 }
 0x35e   :  { %13943 = vrcp.f32 %v1633_v61  ;;  %4021 = vrot.lane.b32.xlu1 %v14584_v56, %s14367_s1 }
 0x35f   :  { %3941 = vrot.lane.b32.xlu0 %v14578_v54, %s14368_s14 }
 0x361   :  { %v1636_v58 = vpop.xlane.xlu0 %1635 }
 0x362   :  { %13945 = vrcp.f32 %v1636_v58  ;;  %4019 = vrot.lane.b32.xlu1 %v14584_v56, %s14368_s14 }
 0x363   :  { %4099 = vrot.lane.b32.xlu0 %v14586_v57, %s14367_s1 }
 0x365   :  { %v1639_v34 = vpop.xlane.xlu1 %1638 }
 0x366   :  { %13947 = vrcp.f32 %v1639_v34  ;;  %4427 = vrot.lane.b32.xlu1 %v14534_v31, %s14369_s15 }
 0x367   :  { %4097 = vrot.lane.b32.xlu0 %v14586_v57, %s14368_s14 }
 0x369   :  { %v1642_v63 = vpop.xlane.xlu0 %1641 }
 0x36a   :  { %13949 = vrcp.f32 %v1642_v63  ;;  %4503 = vrot.lane.b32.xlu1 %v14536_v32, %s14369_s15 }
 0x36b   :  { %v13944_v17 = vpop.eup %13943  ;;  %4351 = vrot.lane.b32.xlu0 %v14530_v28, %s14369_s15 }
 0x36c   :  { %v1695_v55 = vmul.f32 %v13944_v17, %v14853_v11 }
 0x36d   :  { %v1645_v43 = vpop.xlane.xlu1 %1644 }
 0x36e   :  { %13951 = vrcp.f32 %v1645_v43  ;;  %13169 = vmatmul.mubr.msk.f32.vlgmr.msra.gmra.mxu1 %vm305_vm2, %v1695_v55  ;;  %4579 = vrot.lane.b32.xlu1 %v14542_v35, %s14369_s15 }
 0x36f   :  { %v13946_v23 = vpop.eup %13945  ;;  %13177 = vmatpush3.msra.mxu1 %v14784_v8  ;;  %5111 = vrot.lane.b32.xlu0 %v14568_v48, %s14369_s15 }
 0x370   :  { %v1696_v62 = vmul.f32 %v13946_v23, %v14858_v15  ;;  %13178 = vmatprep.mubr.msk.f32.mxu1 %vm14364_vm1, %v17557_v14  ;;  %13186 = vmatprep.subr.mxu1 %v17557_v14 }
 0x371   :  { %v1660_v9 = vpop.xlane.xlu0 %1659 }
 0x372   :  { %13174 = vmatmul.mubr.msk.f32.vlgmr.msra.gmra.mxu0 %vm305_vm2, %v1696_v62  ;;  %4655 = vrot.lane.b32.xlu1 %v14544_v36, %s14369_s15 }
 0x373   :  { %v13948_v11 = vpop.eup %13947  ;;  %13182 = vmatpush3.msra.mxu0 %v14794_v16  ;;  %5569 = vrot.lane.b32.xlu0 %v14530_v28, %s14370_s16 }
 0x374   :  { %v1697_v8 = vmul.f32 %v13948_v11, %v14864_v1  ;;  %13183 = vmatprep.mubr.msk.f32.mxu0 %vm14364_vm1, %v17557_v14  ;;  %13191 = vmatprep.subr.mxu0 %v17557_v14 }
 0x375   :  { %v1651_v15 = vpop.xlane.xlu1 %1650 }
 0x376   :  { %13953 = vrcp.f32 %v1651_v15  ;;  %v1666_v24 = vpop.xlane.xlu0 %1665  ;;  %13179 = vmatmul.mubr.msk.f32.vlgmr.msra.gmra.mxu1 %vm305_vm2, %v1697_v8  ;;  %4731 = vrot.lane.b32.xlu1 %v14546_v38, %s14369_s15 }
 0x377   :  { %v13950_v61 = vpop.eup %13949  ;;  %13187 = vmatpush3.msra.mxu1 %v14798_v21  ;;  %5567 = vrot.lane.b32.xlu0 %v14530_v28, %s14371_s3 }
 0x378   :  { %v1698_v16 = vmul.f32 %v13950_v61, %v14869_v12  ;;  %13188 = vmatprep.mubr.msk.f32.mxu1 %vm14364_vm1, %v17557_v14  ;;  %13196 = vmatprep.subr.mxu1 %v17557_v14 }
 0x37a   :  { %v1648_v1 = vpop.xlane.xlu0 %1647  ;;  %13184 = vmatmul.mubr.msk.f32.vlgmr.msra.gmra.mxu0 %vm305_vm2, %v1698_v16  ;;  %4807 = vrot.lane.b32.xlu1 %v14552_v40, %s14369_s15  ;;  %v17558_v16 = vld [vmem:[#allocation32_spill] sm:$0xff] }
 0x37b   :  { %v13952_v58 = vpop.eup %13951  ;;  %13955 = vrcp.f32 %v1648_v1  ;;  %13192 = vmatpush3.msra.mxu0 %v14800_v25  ;;  %5725 = vrot.lane.b32.xlu0 %v14536_v32, %s14370_s16 }
 0x37c   :  { %v1699_v21 = vmul.f32 %v13952_v58, %v14874_v20  ;;  %13193 = vmatprep.mubr.msk.f32.mxu0 %vm14364_vm1, %v17557_v14  ;;  %13201 = vmatprep.subr.mxu0 %v17557_v14  ;;  %v17559_v58 = vld [vmem:[#allocation26_spill] sm:$0xff] }
 0x37e   :  { %13189 = vmatmul.mubr.msk.f32.vlgmr.msra.gmra.mxu1 %vm305_vm2, %v1699_v21  ;;  %4883 = vrot.lane.b32.xlu1 %v14554_v42, %s14369_s15  ;;  %v1672_v25 = vpop.xlane.xlu0 %1671 }
 0x37f   :  { %13197 = vmatpush3.msra.mxu1 %v14802_v26  ;;  %5723 = vrot.lane.b32.xlu0 %v14536_v32, %s14371_s3 }
 0x380   :  { %13198 = vmatprep.mubr.msk.f32.mxu1 %vm14364_vm1, %v17557_v14  ;;  %13206 = vmatprep.subr.mxu1 %v17557_v14 }
 0x382   :  { %4959 = vrot.lane.b32.xlu1 %v14560_v44, %s14369_s15 }
 0x383   :  { %v13954_v12 = vpop.eup %13953  ;;  %5881 = vrot.lane.b32.xlu0 %v14544_v36, %s14370_s16 }
 0x384   :  { %v1701_v26 = vmul.f32 %v13954_v12, %v14884_v3  ;;  %v17561_v12 = vld [vmem:[#allocation28_spill] sm:$0xff] }
 0x385   :  { %v1654_v20 = vpop.xlane.xlu0 %1653 }
 0x386   :  { %13199 = vmatmul.mubr.msk.f32.vlgmr.msra.gmra.mxu1 %vm305_vm2, %v1701_v26  ;;  %13957 = vrcp.f32 %v1654_v20  ;;  %5035 = vrot.lane.b32.xlu1 %v14562_v46, %s14369_s15 }
 0x387   :  { %13207 = vmatpush3.msra.mxu1 %v14810_v30  ;;  %5879 = vrot.lane.b32.xlu0 %v14544_v36, %s14371_s3  ;;  %13959 = vrcp.f32 %v1660_v9  ;;  %v1678_v30 = vpop.xlane.xlu1 %1677 }
 0x388   :  { %v13956_v34 = vpop.eup %13955  ;;  %13208 = vmatprep.mubr.msk.f32.mxu1 %vm14364_vm1, %v17557_v14  ;;  %13216 = vmatprep.subr.mxu1 %v17557_v14  ;;  %13961 = vrcp.f32 %v1666_v24 }
 0x389   :  { %v1700_v63 = vmul.f32 %v13956_v34, %v14892_v19  ;;  %13963 = vrcp.f32 %v1672_v25  ;;  %v17560_v25 = vld [vmem:[#allocation27_spill] sm:$0xff]  ;;  %v17562_v34 = vld [vmem:[#allocation29_spill] sm:$0xff] }
 0x38a   :  { %5187 = vrot.lane.b32.xlu1 %v14570_v50, %s14369_s15  ;;  %13965 = vrcp.f32 %v1678_v30 }
 0x38b   :  { %13194 = vmatmul.mubr.msk.f32.vlgmr.msra.gmra.mxu0 %vm305_vm2, %v1700_v63  ;;  %v17563_v63 = vld [vmem:[#allocation30_spill] sm:$0xff] }
 0x38c   :  { %13202 = vmatpush3.msra.mxu0 %v14808_v29  ;;  %13203 = vmatprep.mubr.msk.f32.mxu0 %vm14364_vm1, %v17557_v14 }
 0x38d   :  { %13211 = vmatprep.subr.mxu0 %v17557_v14 }
 0x38e   :  { %5263 = vrot.lane.b32.xlu1 %v14576_v52, %s14369_s15 }
 0x392   :  { %5339 = vrot.lane.b32.xlu1 %v14578_v54, %s14369_s15 }
 0x393   :  { %v13958_v3 = vpop.eup %13957 }
 0x394   :  { %v1702_v19 = vmul.f32 %v13958_v3, %v14904_v22  ;;  %v13960_v17 = vpop.eup %13959 }
 0x395   :  { %v1704_v29 = vmul.f32 %v13960_v17, %v14879_v59  ;;  %v13962_v55 = vpop.eup %13961 }
 0x396   :  { %5415 = vrot.lane.b32.xlu1 %v14584_v56, %s14369_s15  ;;  %13204 = vmatmul.mubr.msk.f32.vlgmr.msra.gmra.mxu0 %vm305_vm2, %v1702_v19  ;;  %v13964_v22 = vpop.eup %13963  ;;  %v17564_v19 = vld [vmem:[#allocation31_spill] sm:$0xff] }
 0x397   :  { %13212 = vmatpush3.msra.mxu0 %v14818_v47  ;;  %13213 = vmatprep.mubr.msk.f32.mxu0 %vm14364_vm1, %v17557_v14  ;;  %v1706_v47 = vmul.f32 %v13962_v55, %v14886_v6  ;;  %v13966_v59 = vpop.eup %13965 }
 0x398   :  { %13221 = vmatprep.subr.mxu0 %v17557_v14 }
 0x39a   :  { %5491 = vrot.lane.b32.xlu1 %v14586_v57, %s14369_s15  ;;  %13214 = vmatmul.mubr.msk.f32.vlgmr.msra.gmra.mxu0 %vm305_vm2, %v1704_v29 }
 0x39b   :  { %13222 = vmatpush3.msra.mxu0 %v14814_v39  ;;  %13223 = vmatprep.mubr.msk.f32.mxu0 %vm14364_vm1, %v17557_v14  ;;  %v1708_v39 = vmul.f32 %v13964_v22, %v14896_v13 }
 0x39c   :  { %13231 = vmatprep.subr.mxu0 %v17557_v14 }
 0x39e   :  { %5647 = vrot.lane.b32.xlu1 %v14534_v31, %s14370_s16  ;;  %13224 = vmatmul.mubr.msk.f32.vlgmr.msra.gmra.mxu0 %vm305_vm2, %v1706_v47 }
 0x39f   :  { %13232 = vmatpush3.msra.mxu0 %v14820_v49  ;;  %13233 = vmatprep.mubr.msk.f32.mxu0 %vm14364_vm1, %v17557_v14  ;;  %v1710_v49 = vmul.f32 %v13966_v59, %v14900_v45 }
 0x3a0   :  { %13241 = vmatprep.subr.mxu0 %v17557_v14 }
 0x3a2   :  { %5645 = vrot.lane.b32.xlu1 %v14534_v31, %s14371_s3  ;;  %13234 = vmatmul.mubr.msk.f32.vlgmr.msra.gmra.mxu0 %vm305_vm2, %v1708_v39 }
 0x3a3   :  { %13242 = vmatpush3.msra.mxu0 %v14824_v53  ;;  %13243 = vmatprep.mubr.msk.f32.mxu0 %vm14364_vm1, %v17557_v14  ;;  %v15111_v53 = vpop.permute.xlu1 %3395 }
 0x3a4   :  { %13251 = vmatprep.subr.mxu0 %v17557_v14 }
 0x3a6   :  { %5803 = vrot.lane.b32.xlu1 %v14542_v35, %s14370_s16  ;;  %13244 = vmatmul.mubr.msk.f32.vlgmr.msra.gmra.mxu0 %vm305_vm2, %v1710_v49 }
 0x3a7   :  { %13252 = vmatpush3.xpose.msk.msra.mxu0 %vm305_vm2, %v14828_v60  ;;  %13253 = vmatprep.mubr.msk.f32.mxu0 %vm14364_vm1, %v17557_v14  ;;  %v3476_v60 = vpop.permute.xlu0 %3475 }
 0x3a8   :  { %13261 = vmatprep.subr.mxu0 %v17557_v14 }
 0x3aa   :  { %5801 = vrot.lane.b32.xlu1 %v14542_v35, %s14371_s3  ;;  %13254 = vmatmul.mubr.msk.f32.vlgmr.msra.gmra.mxu0 %vm305_vm2, %v14832_v0 }
 0x3ab   :  { %13262 = vmatpush3.xpose.msk.msra.mxu0 %vm305_vm2, %v14836_v2  ;;  %13263 = vmatprep.mubr.msk.f32.mxu0 %vm14364_vm1, %v17557_v14 }
 0x3ac   :  { %13271 = vmatprep.subr.mxu0 %v17557_v14 }
 0x3ae   :  { %5959 = vrot.lane.b32.xlu1 %v14546_v38, %s14370_s16  ;;  %13264 = vmatmul.mubr.msk.f32.vlgmr.msra.gmra.mxu0 %vm305_vm2, %v14840_v5 }
 0x3af   :  { %13272 = vmatpush3.xpose.msk.msra.mxu0 %vm305_vm2, %v14844_v7  ;;  %13273 = vmatprep.mubr.msk.f32.mxu0 %vm14364_vm1, %v17557_v14 }
 0x3b0   :  { %13281 = vmatprep.subr.mxu0 %v17557_v14 }
 0x3b2   :  { %5957 = vrot.lane.b32.xlu1 %v14546_v38, %s14371_s3  ;;  %13274 = vmatmul.mubr.msk.f32.vlgmr.msra.gmra.mxu0 %vm305_vm2, %v14958_v51 }
 0x3b3   :  { %13282 = vmatpush3.xpose.msk.msra.mxu0 %vm305_vm2, %v3476_v60  ;;  %13283 = vmatprep.mubr.msk.f32.mxu0 %vm14364_vm1, %v17557_v14 }
 0x3b4   :  { %13291 = vmatprep.subr.mxu0 %v17557_v14 }
 0x3b6   :  { %v1657_v0 = vpop.xlane.xlu1 %1656 }
 0x3b7   :  { %13967 = vrcp.f32 %v1657_v0 }
 0x3ba   :  { %v1663_v2 = vpop.xlane.xlu1 %1662  ;;  %v1675_v5 = vpop.xlane.xlu0 %1674 }
 0x3bb   :  { %13969 = vrcp.f32 %v1663_v2 }
 0x3be   :  { %v1669_v7 = vpop.xlane.xlu1 %1668  ;;  %v3474_v6 = vpop.permute.xlu0 %3473 }
 0x3bf   :  { %13971 = vrcp.f32 %v1669_v7  ;;  %13284 = vmatmul.mubr.msk.f32.vlgmr.msra.gmra.mxu0 %vm305_vm2, %v3474_v6 }
 0x3c0   :  { %13293 = vmatprep.mubr.msk.f32.mxu0 %vm14364_vm1, %v17557_v14  ;;  %13973 = vrcp.f32 %v1675_v5 }
 0x3c2   :  { %v15124_v13 = vpop.permute.xlu1 %3553  ;;  %v3632_v45 = vpop.permute.xlu0 %3631 }
 0x3c3   :  { %13292 = vmatpush3.xpose.msk.msra.mxu0 %vm305_vm2, %v3632_v45 }
 0x3c4   :  { %v13968_v51 = vpop.eup %13967  ;;  %13301 = vmatprep.subr.mxu0 %v17557_v14 }
 0x3c5   :  { %v1703_v43 = vmul.f32 %v13968_v51, %v14916_v18 }
 0x3c6   :  { %v15129_v23 = vpop.permute.xlu1 %3551  ;;  %v3630_v62 = vpop.permute.xlu0 %3629 }
 0x3c7   :  { %13209 = vmatmul.mubr.msk.f32.vlgmr.msra.gmra.mxu1 %vm305_vm2, %v1703_v43  ;;  %13294 = vmatmul.mubr.msk.f32.vlgmr.msra.gmra.mxu0 %vm305_vm2, %v3630_v62 }
 0x3c8   :  { %v13970_v9 = vpop.eup %13969  ;;  %13217 = vmatpush3.msra.mxu1 %v14812_v37  ;;  %13218 = vmatprep.mubr.msk.f32.mxu1 %vm14364_vm1, %v17557_v14 }
 0x3c9   :  { %13226 = vmatprep.subr.mxu1 %v17557_v14  ;;  %v1705_v11 = vmul.f32 %v13970_v9, %v14918_v10  ;;  %13303 = vmatprep.mubr.msk.f32.mxu0 %vm14364_vm1, %v17557_v14 }
 0x3ca   :  { %v3710_v18 = vpop.permute.xlu1 %3709  ;;  %v3788_v8 = vpop.permute.xlu0 %3787 }
 0x3cb   :  { %13219 = vmatmul.mubr.msk.f32.vlgmr.msra.gmra.mxu1 %vm305_vm2, %v1705_v11  ;;  %13302 = vmatpush3.xpose.msk.msra.mxu0 %vm305_vm2, %v3788_v8 }
 0x3cc   :  { %v13972_v15 = vpop.eup %13971  ;;  %13227 = vmatpush3.msra.mxu1 %v14816_v41  ;;  %13228 = vmatprep.mubr.msk.f32.mxu1 %vm14364_vm1, %v17557_v14 }
 0x3cd   :  { %13236 = vmatprep.subr.mxu1 %v17557_v14  ;;  %v1707_v37 = vmul.f32 %v13972_v15, %v14928_v33  ;;  %13311 = vmatprep.subr.mxu0 %v17557_v14  ;;  %v13974_v10 = vpop.eup %13973 }
 0x3ce   :  { %v3708_v24 = vpop.permute.xlu1 %3707  ;;  %v3786_v61 = vpop.permute.xlu0 %3785  ;;  %v1709_v41 = vmul.f32 %v13974_v10, %v14922_v4 }
 0x3cf   :  { %13229 = vmatmul.mubr.msk.f32.vlgmr.msra.gmra.mxu1 %vm305_vm2, %v1707_v37  ;;  %13304 = vmatmul.mubr.msk.f32.vlgmr.msra.gmra.mxu0 %vm305_vm2, %v3786_v61 }
 0x3d0   :  { %13237 = vmatpush3.msra.mxu1 %v17558_v16  ;;  %13238 = vmatprep.mubr.msk.f32.mxu1 %vm14364_vm1, %v17557_v14 }
 0x3d1   :  { %13246 = vmatprep.subr.mxu1 %v17557_v14  ;;  %13313 = vmatprep.mubr.msk.f32.mxu0 %vm14364_vm1, %v17557_v14 }
 0x3d2   :  { %v3866_v33 = vpop.permute.xlu1 %3865  ;;  %v3944_v1 = vpop.permute.xlu0 %3943 }
 0x3d3   :  { %13239 = vmatmul.mubr.msk.f32.vlgmr.msra.gmra.mxu1 %vm305_vm2, %v1709_v41  ;;  %13312 = vmatpush3.xpose.msk.msra.mxu0 %vm305_vm2, %v3944_v1 }
 0x3d4   :  { %13247 = vmatpush3.xpose.msk.msra.mxu1 %vm305_vm2, %v17559_v58  ;;  %13248 = vmatprep.mubr.msk.f32.mxu1 %vm14364_vm1, %v17557_v14 }
 0x3d5   :  { %13256 = vmatprep.subr.mxu1 %v17557_v14  ;;  %13321 = vmatprep.subr.mxu0 %v17557_v14 }
 0x3d6   :  { %v3864_v4 = vpop.permute.xlu1 %3863  ;;  %v3942_v21 = vpop.permute.xlu0 %3941 }
 0x3d7   :  { %13249 = vmatmul.mubr.msk.f32.vlgmr.msra.gmra.mxu1 %vm305_vm2, %v17560_v25  ;;  %13314 = vmatmul.mubr.msk.f32.vlgmr.msra.gmra.mxu0 %vm305_vm2, %v3942_v21 }
 0x3d8   :  { %13257 = vmatpush3.xpose.msk.msra.mxu1 %vm305_vm2, %v17561_v12  ;;  %13258 = vmatprep.mubr.msk.f32.mxu1 %vm14364_vm1, %v17557_v14 }
 0x3d9   :  { %13266 = vmatprep.subr.mxu1 %v17557_v14  ;;  %13323 = vmatprep.mubr.msk.f32.mxu0 %vm14364_vm1, %v17557_v14 }
 0x3da   :  { %v4022_v26 = vpop.permute.xlu1 %4021  ;;  %v4100_v20 = vpop.permute.xlu0 %4099 }
 0x3db   :  { %13259 = vmatmul.mubr.msk.f32.vlgmr.msra.gmra.mxu1 %vm305_vm2, %v17562_v34  ;;  %13322 = vmatpush3.xpose.msk.msra.mxu0 %vm305_vm2, %v4100_v20 }
 0x3dc   :  { %13267 = vmatpush3.xpose.msk.msra.mxu1 %vm305_vm2, %v17563_v63  ;;  %13268 = vmatprep.mubr.msk.f32.mxu1 %vm14364_vm1, %v17557_v14 }
 0x3dd   :  { %13276 = vmatprep.subr.mxu1 %v17557_v14  ;;  %13331 = vmatprep.subr.mxu0 %v17557_v14 }
 0x3de   :  { %v4020_v30 = vpop.permute.xlu1 %4019  ;;  %v4098_v3 = vpop.permute.xlu0 %4097 }
 0x3df   :  { %13269 = vmatmul.mubr.msk.f32.vlgmr.msra.gmra.mxu1 %vm305_vm2, %v17564_v19  ;;  %13324 = vmatmul.mubr.msk.f32.vlgmr.msra.gmra.mxu0 %vm305_vm2, %v4098_v3 }
 0x3e0   :  { %13277 = vmatpush3.xpose.msk.msra.mxu1 %vm305_vm2, %v14952_v27  ;;  %13278 = vmatprep.mubr.msk.f32.mxu1 %vm14364_vm1, %v17557_v14 }
 0x3e1   :  { %13286 = vmatprep.subr.mxu1 %v17557_v14  ;;  %13333 = vmatprep.mubr.msk.f32.mxu0 %vm14364_vm1, %v17557_v14 }
 0x3e2   :  { %v4428_v17 = vpop.permute.xlu1 %4427  ;;  %v4352_v27 = vpop.permute.xlu0 %4351 }
 0x3e3   :  { %13279 = vmatmul.mubr.msk.f32.vlgmr.msra.gmra.mxu1 %vm305_vm2, %v15111_v53  ;;  %13332 = vmatpush3.msra.mxu0 %v4428_v17 }
 0x3e4   :  { %13287 = vmatpush3.xpose.msk.msra.mxu1 %vm305_vm2, %v15124_v13  ;;  %13288 = vmatprep.mubr.msk.f32.mxu1 %vm14364_vm1, %v17557_v14 }
 0x3e5   :  { %13296 = vmatprep.subr.mxu1 %v17557_v14  ;;  %13341 = vmatprep.subr.mxu0 %v17557_v14 }
 0x3e7   :  { %13289 = vmatmul.mubr.msk.f32.vlgmr.msra.gmra.mxu1 %vm305_vm2, %v15129_v23 }
 0x3e8   :  { %13297 = vmatpush3.xpose.msk.msra.mxu1 %vm305_vm2, %v3710_v18  ;;  %13298 = vmatprep.mubr.msk.f32.mxu1 %vm14364_vm1, %v17557_v14 }
 0x3e9   :  { %13306 = vmatprep.subr.mxu1 %v17557_v14 }
 0x3eb   :  { %13299 = vmatmul.mubr.msk.f32.vlgmr.msra.gmra.mxu1 %vm305_vm2, %v3708_v24 }
 0x3ec   :  { %13307 = vmatpush3.xpose.msk.msra.mxu1 %vm305_vm2, %v3866_v33  ;;  %13308 = vmatprep.mubr.msk.f32.mxu1 %vm14364_vm1, %v17557_v14 }
 0x3ed   :  { %13316 = vmatprep.subr.mxu1 %v17557_v14 }
 0x3ef   :  { %13309 = vmatmul.mubr.msk.f32.vlgmr.msra.gmra.mxu1 %vm305_vm2, %v3864_v4 }
 0x3f0   :  { %13317 = vmatpush3.xpose.msk.msra.mxu1 %vm305_vm2, %v4022_v26  ;;  %13318 = vmatprep.mubr.msk.f32.mxu1 %vm14364_vm1, %v17557_v14 }
 0x3f1   :  { %13326 = vmatprep.subr.mxu1 %v17557_v14 }
 0x3f3   :  { %13319 = vmatmul.mubr.msk.f32.vlgmr.msra.gmra.mxu1 %vm305_vm2, %v4020_v30 }
 0x3f4   :  { %13327 = vmatpush3.msra.mxu1 %v4352_v27  ;;  %13328 = vmatprep.mubr.msk.f32.mxu1 %vm14364_vm1, %v17557_v14 }
 0x3f5   :  { %13336 = vmatprep.subr.mxu1 %v17557_v14 }
 0x42e   :  { %v15222_v29 = vpop.f32.mrf.mxu1 }
 0x42f   :  { %17565 = vst [vmem:[#allocation32_spill] sm:$0xff] %v15222_v29 }
 0x430   :  { %v13170_v55 = vpop.f32.mrf.mxu1 }
 0x432   :  { %v15224_v47 = vpop.f32.mrf.mxu0 }
 0x433   :  { %17566 = vst [vmem:[#allocation26_spill] sm:$0xff] %v15224_v47 }
 0x434   :  { %v13175_v22 = vpop.f32.mrf.mxu0 }
 0x436   :  { %v15226_v39 = vpop.f32.mrf.mxu1 }
 0x437   :  { %17567 = vst [vmem:[#allocation27_spill] sm:$0xff] %v15226_v39 }
 0x438   :  { %v13180_v59 = vpop.f32.mrf.mxu1 }
 0x43a   :  { %v15228_v49 = vpop.f32.mrf.mxu0 }
 0x43b   :  { %17568 = vst [vmem:[#allocation28_spill] sm:$0xff] %v15228_v49 }
 0x43c   :  { %v13185_v53 = vpop.f32.mrf.mxu0 }
 0x43e   :  { %v15230_v60 = vpop.f32.mrf.mxu1 }
 0x43f   :  { %17569 = vst [vmem:[#allocation29_spill] sm:$0xff] %v15230_v60 }
 0x440   :  { %v13190_v0 = vpop.f32.mrf.mxu1 }
 0x446   :  { %v15232_v2 = vpop.f32.mrf.mxu1 }
 0x447   :  { %17570 = vst [vmem:[#allocation30_spill] sm:$0xff] %v15232_v2 }
 0x448   :  { %v13200_v5 = vpop.f32.mrf.mxu1 }
 0x44b   :  { %v15234_v7 = vpop.f32.mrf.mxu0 }
 0x44c   :  { %17571 = vst [vmem:[#allocation31_spill] sm:$0xff] %v15234_v7 }
 0x44d   :  { %v13195_v6 = vpop.f32.mrf.mxu0 }
 0x456   :  { %v15236_v13 = vpop.f32.mrf.mxu0 }
 0x457   :  { %17572 = vst [vmem:[#allocation33_spill] sm:$0xff] %v15236_v13 }
 0x458   :  { %v13205_v45 = vpop.f32.mrf.mxu0 }
 0x45a   :  { %v15238_v51 = vpop.f32.mrf.mxu0 }
 0x45b   :  { %17573 = vst [vmem:[#allocation34_spill] sm:$0xff] %v15238_v51 }
 0x45c   :  { %v13215_v43 = vpop.f32.mrf.mxu0 }
 0x45e   :  { %v15240_v23 = vpop.f32.mrf.mxu0 }
 0x45f   :  { %17574 = vst [vmem:[#allocation35_spill] sm:$0xff] %v15240_v23 }
 0x460   :  { %v13225_v62 = vpop.f32.mrf.mxu0 }
 0x462   :  { %v15242_v9 = vpop.f32.mrf.mxu0 }
 0x463   :  { %17575 = vst [vmem:[#allocation36_spill] sm:$0xff] %v15242_v9 }
 0x464   :  { %v13235_v11 = vpop.f32.mrf.mxu0 }
 0x466   :  { %v15244_v18 = vpop.f32.mrf.mxu0 }
 0x467   :  { %17576 = vst [vmem:[#allocation37_spill] sm:$0xff] %v15244_v18 }
 0x468   :  { %v13245_v8 = vpop.f32.mrf.mxu0 }
 0x46a   :  { %v15246_v15 = vpop.f32.mrf.mxu0 }
 0x46b   :  { %v4178_v37 = vsel %vm305_vm2, %v15246_v15, -inf }
 0x46c   :  { %4179 = vmax.xlane.f32.xlu0 %v4178_v37  ;;  %v13255_v10 = vpop.f32.mrf.mxu0 }
 0x46e   :  { %v15250_v24 = vpop.f32.mrf.mxu0 }
 0x46f   :  { %v4184_v0 = vsel %vm305_vm2, %v15250_v24, -inf }
 0x470   :  { %v13265_v61 = vpop.f32.mrf.mxu0 }
 0x472   :  { %v15252_v16 = vpop.f32.mrf.mxu0 }
 0x473   :  { %v4190_v62 = vsel %vm305_vm2, %v15252_v16, -inf }
 0x474   :  { %v13275_v41 = vpop.f32.mrf.mxu0 }
 0x47f   :  { %v15254_v33 = vpop.f32.mrf.mxu0 }
 0x480   :  { %v4196_v41 = vsel %vm305_vm2, %v15254_v33, -inf }
 0x481   :  { %v13285_v1 = vpop.f32.mrf.mxu0 }
 0x487   :  { %v15256_v58 = vpop.f32.mrf.mxu1  ;;  %v15258_v4 = vpop.f32.mrf.mxu0 }
 0x488   :  { %17577 = vst [vmem:[#allocation38_spill] sm:$0xff] %v15256_v58 }
 0x489   :  { %v13210_v21 = vpop.f32.mrf.mxu1  ;;  %v13295_v25 = vpop.f32.mrf.mxu0 }
 0x48b   :  { %v15260_v12 = vpop.f32.mrf.mxu1 }
 0x48c   :  { %17578 = vst [vmem:[#allocation39_spill] sm:$0xff] %v15260_v12 }
 0x48d   :  { %v13220_v26 = vpop.f32.mrf.mxu1 }
 0x48e   :  { %v4202_v26 = vsel %vm305_vm2, %v15258_v4, -inf }
 0x48f   :  { %v15262_v20 = vpop.f32.mrf.mxu1  ;;  %v15264_v34 = vpop.f32.mrf.mxu0 }
 0x490   :  { %17579 = vst [vmem:[#allocation40_spill] sm:$0xff] %v15262_v20 }
 0x491   :  { %v13230_v63 = vpop.f32.mrf.mxu1  ;;  %v13305_v30 = vpop.f32.mrf.mxu0 }
 0x493   :  { %v15266_v3 = vpop.f32.mrf.mxu1 }
 0x494   :  { %17580 = vst [vmem:[#allocation41_spill] sm:$0xff] %v15266_v3 }
 0x495   :  { %v13240_v19 = vpop.f32.mrf.mxu1 }
 0x497   :  { %v15268_v17 = vpop.f32.mrf.mxu1  ;;  %v15270_v27 = vpop.f32.mrf.mxu0 }
 0x498   :  { %v4175_v55 = vsel %vm305_vm2, %v15268_v17, -inf }
 0x499   :  { %4176 = vmax.xlane.f32.xlu1 %v4175_v55  ;;  %v13250_v22 = vpop.f32.mrf.mxu1  ;;  %v13315_v59 = vpop.f32.mrf.mxu0  ;;  %v4208_v55 = vsel %vm305_vm2, %v15264_v34, -inf }
 0x49b   :  { %v15274_v53 = vpop.f32.mrf.mxu1 }
 0x49c   :  { %v4181_v5 = vsel %vm305_vm2, %v15274_v53, -inf }
 0x49d   :  { %4185 = vmax.xlane.f32.xlu1 %v4184_v0  ;;  %4182 = vmax.xlane.f32.xlu0 %v4181_v5  ;;  %v13260_v6 = vpop.f32.mrf.mxu1  ;;  %v4214_v5 = vsel %vm305_vm2, %v15270_v27, -inf }
 0x49f   :  { %v15280_v45 = vpop.f32.mrf.mxu1  ;;  %v15282_v43 = vpop.f32.mrf.mxu0 }
 0x4a0   :  { %v4187_v11 = vsel %vm305_vm2, %v15280_v45, -inf }
 0x4a1   :  { %4191 = vmax.xlane.f32.xlu1 %v4190_v62  ;;  %4188 = vmax.xlane.f32.xlu0 %v4187_v11  ;;  %v13270_v8 = vpop.f32.mrf.mxu1  ;;  %v13325_v37 = vpop.f32.mrf.mxu0 }
 0x4a2   :  { %v15312_v62 = vpop.permute.xlu1 %4503  ;;  %v4220_v37 = vsel %vm305_vm2, %v15282_v43, -inf }
 0x4a3   :  { %v15288_v10 = vpop.f32.mrf.mxu1 }
 0x4a4   :  { %v4193_v61 = vsel %vm305_vm2, %v15288_v10, -inf }
 0x4a5   :  { %4194 = vmax.xlane.f32.xlu0 %v4193_v61  ;;  %v13280_v1 = vpop.f32.mrf.mxu1  ;;  %4197 = vmax.xlane.f32.xlu1 %v4196_v41 }
 0x4a6   :  { %v15320_v41 = vpop.permute.xlu1 %4579 }
 0x4a7   :  { %v15294_v21 = vpop.f32.mrf.mxu1 }
 0x4a8   :  { %v4199_v25 = vsel %vm305_vm2, %v15294_v21, -inf }
 0x4a9   :  { %4200 = vmax.xlane.f32.xlu0 %v4199_v25  ;;  %v13290_v63 = vpop.f32.mrf.mxu1  ;;  %4203 = vmax.xlane.f32.xlu1 %v4202_v26 }
 0x4aa   :  { %v15322_v1 = vpop.permute.xlu1 %4655  ;;  %v15332_v63 = vpop.permute.xlu0 %5111 }
 0x4ab   :  { %v15300_v30 = vpop.f32.mrf.mxu1 }
 0x4ac   :  { %v4205_v19 = vsel %vm305_vm2, %v15300_v30, -inf }
 0x4ad   :  { %4206 = vmax.xlane.f32.xlu0 %v4205_v19  ;;  %v13300_v22 = vpop.f32.mrf.mxu1  ;;  %4209 = vmax.xlane.f32.xlu1 %v4208_v55 }
 0x4ae   :  { %v15324_v25 = vpop.permute.xlu1 %4731  ;;  %v15336_v55 = vpop.permute.xlu0 %5569 }
 0x4af   :  { %v15306_v59 = vpop.f32.mrf.mxu1 }
 0x4b0   :  { %v4211_v0 = vsel %vm305_vm2, %v15306_v59, -inf }
 0x4b1   :  { %4212 = vmax.xlane.f32.xlu0 %v4211_v0  ;;  %v13310_v6 = vpop.f32.mrf.mxu1  ;;  %4215 = vmax.xlane.f32.xlu1 %v4214_v5 }
 0x4b2   :  { %v15328_v26 = vpop.permute.xlu1 %4807  ;;  %v15340_v0 = vpop.permute.xlu0 %5567 }
 0x4b3   :  { %v15314_v11 = vpop.f32.mrf.mxu1 }
 0x4b4   :  { %v4217_v8 = vsel %vm305_vm2, %v15314_v11, -inf }
 0x4b5   :  { %4218 = vmax.xlane.f32.xlu0 %v4217_v8  ;;  %v13320_v61 = vpop.f32.mrf.mxu1  ;;  %4221 = vmax.xlane.f32.xlu1 %v4220_v37 }
 0x4b6   :  { %v15334_v19 = vpop.permute.xlu1 %4883  ;;  %v15344_v6 = vpop.permute.xlu0 %5725 }
 0x4b7   :  { %17581 = vst [vmem:[#allocation42_spill] sm:$0xff] %v15344_v6 }
 0x4ba   :  { %v15338_v22 = vpop.permute.xlu1 %4959  ;;  %v15348_v37 = vpop.permute.xlu0 %5723 }
 0x4bb   :  { %17582 = vst [vmem:[#allocation43_spill] sm:$0xff] %v15348_v37 }
 0x4be   :  { %v15342_v5 = vpop.permute.xlu1 %5035  ;;  %v15352_v18 = vpop.permute.xlu0 %5881 }
 0x4bf   :  { %17583 = vst [vmem:[#allocation44_spill] sm:$0xff] %v15352_v18 }
 0x4c2   :  { %v15346_v8 = vpop.permute.xlu1 %5187  ;;  %v15356_v51 = vpop.permute.xlu0 %5879 }
 0x4c3   :  { %17584 = vst [vmem:[#allocation45_spill] sm:$0xff] %v15356_v51 }
 0x4c6   :  { %6115 = vrot.lane.b32.xlu1 %v14554_v42, %s14370_s16  ;;  %v15350_v61 = vpop.permute.xlu1 %5263 }
 0x4ca   :  { %v15354_v3 = vpop.permute.xlu1 %5339 }
 0x4cb   :  { %6037 = vrot.lane.b32.xlu0 %v14552_v40, %s14370_s16 }
 0x4ce   :  { %v15358_v2 = vpop.permute.xlu1 %5415 }
 0x4d2   :  { %v15361_v49 = vpop.permute.xlu1 %5491 }
 0x4d6   :  { %v15363_v39 = vpop.permute.xlu1 %5647 }
 0x4da   :  { %v15365_v47 = vpop.permute.xlu1 %5645 }
 0x4db   :  { %17585 = vst [vmem:[#allocation46_spill] sm:$0xff] %v15365_v47 }
 0x4de   :  { %v15371_v12 = vpop.permute.xlu1 %5803 }
 0x4df   :  { %17586 = vst [vmem:[#allocation47_spill] sm:$0xff] %v15371_v12 }
 0x4e2   :  { %v15373_v58 = vpop.permute.xlu1 %5801 }
 0x4e3   :  { %17587 = vst [vmem:[#allocation48_spill] sm:$0xff] %v15373_v58 }
 0x4e6   :  { %v15375_v9 = vpop.permute.xlu1 %5959 }
 0x4e7   :  { %17588 = vst [vmem:[#allocation49_spill] sm:$0xff] %v15375_v9 }
 0x4f5   :  { %v4180_v13 = vpop.xlane.xlu0 %4179 }
 0x4f6   :  { %v4224_v7 = vsub.f32 %v15246_v15, %v4180_v13 }
 0x4f8   :  { %v4241_v60 = vmul.f32 1.442695, %v4224_v7  ;;  %v15377_v7 = vpop.permute.xlu1 %5957 }
 0x4f9   :  { %17589 = vst [vmem:[#allocation50_spill] sm:$0xff] %v15377_v7 }
 0x4fa   :  { %13975 = vpow2.f32 %v4241_v60 }
 0x507   :  { %v15367_v29 = vpop.eup %13975 }
 0x508   :  { %v4274_v20 = vsel %vm305_vm2, %v15367_v29, 0.0 }
 0x509   :  { %4275 = vadd.xlane.f32.xlu1 %v4274_v20 }
 0x522   :  { %v4177_v13 = vpop.xlane.xlu1 %4176 }
 0x523   :  { %v4223_v60 = vsub.f32 %v15268_v17, %v4177_v13 }
 0x525   :  { %v4239_v15 = vmul.f32 1.442695, %v4223_v60 }
 0x526   :  { %v4186_v23 = vpop.xlane.xlu1 %4185  ;;  %v4183_v51 = vpop.xlane.xlu0 %4182 }
 0x527   :  { %13977 = vpow2.f32 %v4239_v15  ;;  %v4226_v18 = vsub.f32 %v15250_v24, %v4186_v23  ;;  %v4225_v37 = vsub.f32 %v15274_v53, %v4183_v51 }
 0x529   :  { %v4245_v20 = vmul.f32 1.442695, %v4226_v18  ;;  %v4243_v6 = vmul.f32 1.442695, %v4225_v37 }
 0x52a   :  { %v4192_v12 = vpop.xlane.xlu1 %4191  ;;  %v4189_v47 = vpop.xlane.xlu0 %4188 }
 0x52b   :  { %13979 = vpow2.f32 %v4245_v20  ;;  %v4228_v9 = vsub.f32 %v15252_v16, %v4192_v12  ;;  %v4227_v7 = vsub.f32 %v15280_v45, %v4189_v47 }
 0x52c   :  { %13981 = vpow2.f32 %v4243_v6 }
 0x52d   :  { %v4249_v58 = vmul.f32 1.442695, %v4228_v9  ;;  %v4247_v17 = vmul.f32 1.442695, %v4227_v7 }
 0x52e   :  { %v4198_v13 = vpop.xlane.xlu1 %4197  ;;  %v4195_v60 = vpop.xlane.xlu0 %4194 }
 0x52f   :  { %13983 = vpow2.f32 %v4249_v58  ;;  %v4230_v15 = vsub.f32 %v15254_v33, %v4198_v13  ;;  %v4229_v23 = vsub.f32 %v15288_v10, %v4195_v60 }
 0x530   :  { %13985 = vpow2.f32 %v4247_v17 }
 0x531   :  { %v4253_v51 = vmul.f32 1.442695, %v4230_v15  ;;  %v4251_v18 = vmul.f32 1.442695, %v4229_v23 }
 0x532   :  { %v4204_v24 = vpop.xlane.xlu1 %4203  ;;  %v4201_v53 = vpop.xlane.xlu0 %4200 }
 0x533   :  { %13987 = vpow2.f32 %v4253_v51  ;;  %v4232_v16 = vsub.f32 %v15258_v4, %v4204_v24  ;;  %v4231_v47 = vsub.f32 %v15294_v21, %v4201_v53 }
 0x534   :  { %v15388_v12 = vpop.eup %13977  ;;  %13989 = vpow2.f32 %v4251_v18 }
 0x535   :  { %v4257_v9 = vmul.f32 1.442695, %v4232_v16  ;;  %v4255_v45 = vmul.f32 1.442695, %v4231_v47  ;;  %v4271_v33 = vsel %vm305_vm2, %v15388_v12, 0.0 }
 0x536   :  { %4272 = vadd.xlane.f32.xlu0 %v4271_v33  ;;  %v4210_v58 = vpop.xlane.xlu1 %4209  ;;  %v4207_v10 = vpop.xlane.xlu0 %4206 }
 0x537   :  { %13991 = vpow2.f32 %v4257_v9  ;;  %v4234_v6 = vsub.f32 %v15264_v34, %v4210_v58  ;;  %v4233_v37 = vsub.f32 %v15300_v30, %v4207_v10 }
 0x538   :  { %v15394_v7 = vpop.eup %13979  ;;  %13993 = vpow2.f32 %v4255_v45 }
 0x539   :  { %v15396_v4 = vpop.eup %13981  ;;  %v4261_v21 = vmul.f32 1.442695, %v4234_v6  ;;  %v4259_v20 = vmul.f32 1.442695, %v4233_v37  ;;  %v4280_v17 = vsel %vm305_vm2, %v15394_v7, 0.0 }
 0x53a   :  { %4281 = vadd.xlane.f32.xlu1 %v4280_v17  ;;  %v4277_v13 = vsel %vm305_vm2, %v15396_v4, 0.0  ;;  %v4213_v60 = vpop.xlane.xlu0 %4212  ;;  %v4216_v17 = vpop.xlane.xlu1 %4215 }
 0x53b   :  { %13995 = vpow2.f32 %v4261_v21  ;;  %4278 = vadd.xlane.f32.xlu0 %v4277_v13  ;;  %v4235_v34 = vsub.f32 %v15306_v59, %v4213_v60  ;;  %v4236_v13 = vsub.f32 %v15270_v27, %v4216_v17 }
 0x53c   :  { %v15403_v30 = vpop.eup %13983  ;;  %13997 = vpow2.f32 %v4259_v20 }
 0x53d   :  { %v15405_v15 = vpop.eup %13985  ;;  %v4263_v23 = vmul.f32 1.442695, %v4235_v34  ;;  %v4286_v51 = vsel %vm305_vm2, %v15403_v30, 0.0 }
 0x53e   :  { %4287 = vadd.xlane.f32.xlu1 %v4286_v51  ;;  %v4283_v18 = vsel %vm305_vm2, %v15405_v15, 0.0  ;;  %v4219_v60 = vpop.xlane.xlu0 %4218  ;;  %v4222_v34 = vpop.xlane.xlu1 %4221 }
 0x53f   :  { %4284 = vadd.xlane.f32.xlu0 %v4283_v18  ;;  %13999 = vpow2.f32 %v4263_v23  ;;  %v4265_v23 = vmul.f32 1.442695, %v4236_v13  ;;  %v4237_v51 = vsub.f32 %v15314_v11, %v4219_v60  ;;  %v4238_v18 = vsub.f32 %v15282_v43, %v4222_v34 }
 0x540   :  { %v15411_v24 = vpop.eup %13987 }
 0x541   :  { %v15413_v53 = vpop.eup %13989  ;;  %v4292_v59 = vsel %vm305_vm2, %v15411_v24, 0.0  ;;  %14001 = vpow2.f32 %v4265_v23 }
 0x542   :  { %4293 = vadd.xlane.f32.xlu1 %v4292_v59  ;;  %v4289_v16 = vsel %vm305_vm2, %v15413_v53, 0.0  ;;  %v4267_v59 = vmul.f32 1.442695, %v4237_v51 }
 0x543   :  { %4290 = vadd.xlane.f32.xlu0 %v4289_v16  ;;  %v4269_v16 = vmul.f32 1.442695, %v4238_v18 }
 0x544   :  { %v15419_v47 = vpop.eup %13991  ;;  %14003 = vpow2.f32 %v4267_v59 }
 0x545   :  { %v15421_v9 = vpop.eup %13993  ;;  %v4298_v45 = vsel %vm305_vm2, %v15419_v47, 0.0  ;;  %14005 = vpow2.f32 %v4269_v16 }
 0x546   :  { %4299 = vadd.xlane.f32.xlu1 %v4298_v45  ;;  %v4295_v33 = vsel %vm305_vm2, %v15421_v9, 0.0 }
 0x547   :  { %4296 = vadd.xlane.f32.xlu0 %v4295_v33 }
 0x548   :  { %v15427_v58 = vpop.eup %13995 }
 0x549   :  { %v15429_v10 = vpop.eup %13997  ;;  %v4304_v6 = vsel %vm305_vm2, %v15427_v58, 0.0 }
 0x54a   :  { %4305 = vadd.xlane.f32.xlu1 %v4304_v6  ;;  %v4301_v37 = vsel %vm305_vm2, %v15429_v10, 0.0 }
 0x54b   :  { %4302 = vadd.xlane.f32.xlu0 %v4301_v37  ;;  %v15458_v37 = vpop.permute.xlu1 %6115 }
 0x54c   :  { %v15435_v21 = vpop.eup %13999 }
 0x54d   :  { %v4307_v20 = vsel %vm305_vm2, %v15435_v21, 0.0 }
 0x54e   :  { %v15446_v45 = vpop.eup %14001 }
 0x54f   :  { %4308 = vadd.xlane.f32.xlu0 %v4307_v20  ;;  %v4310_v33 = vsel %vm305_vm2, %v15446_v45, 0.0 }
 0x551   :  { %v15450_v6 = vpop.eup %14003 }
 0x552   :  { %v15452_v27 = vpop.eup %14005  ;;  %v4313_v11 = vsel %vm305_vm2, %v15450_v6, 0.0 }
 0x553   :  { %v4316_v43 = vsel %vm305_vm2, %v15452_v27, 0.0 }
 0x55b   :  { %6113 = vrot.lane.b32.xlu1 %v14554_v42, %s14371_s3 }
 0x565   :  { %6035 = vrot.lane.b32.xlu0 %v14552_v40, %s14371_s3 }
 0x57f   :  { %4311 = vadd.xlane.f32.xlu1 %v4310_v33 }
 0x583   :  { %4314 = vadd.xlane.f32.xlu1 %v4313_v11 }
 0x584   :  { %4317 = vadd.xlane.f32.xlu0 %v4316_v43 }
 0x592   :  { %v4276_v20 = vpop.xlane.xlu1 %4275 }
 0x593   :  { %14007 = vrcp.f32 %v4276_v20 }
 0x594   :  { %6271 = vrot.lane.b32.xlu1 %v14562_v46, %s14370_s16 }
 0x598   :  { %6269 = vrot.lane.b32.xlu1 %v14562_v46, %s14371_s3 }
 0x59a   :  { %6193 = vrot.lane.b32.xlu0 %v14560_v44, %s14370_s16 }
 0x59c   :  { %6427 = vrot.lane.b32.xlu1 %v14570_v50, %s14370_s16 }
 0x59e   :  { %6191 = vrot.lane.b32.xlu0 %v14560_v44, %s14371_s3 }
 0x5a0   :  { %v14008_v17 = vpop.eup %14007  ;;  %6425 = vrot.lane.b32.xlu1 %v14570_v50, %s14371_s3 }
 0x5a1   :  { %v4336_v13 = vmul.f32 %v14008_v17, %v15367_v29  ;;  %v15504_v29 = vpop.permute.xlu0 %6037 }
 0x5a2   :  { %6349 = vrot.lane.b32.xlu0 %v14568_v48, %s14370_s16 }
 0x5a3   :  { %13334 = vmatmul.mubr.msk.f32.vlgmr.msra.gmra.mxu0 %vm305_vm2, %v4336_v13 }
 0x5a4   :  { %13342 = vmatpush3.msra.mxu0 %v15320_v41  ;;  %6583 = vrot.lane.b32.xlu1 %v14578_v54, %s14370_s16 }
 0x5a5   :  { %13343 = vmatprep.mubr.msk.f32.mxu0 %vm14364_vm1, %v17557_v14  ;;  %13351 = vmatprep.subr.mxu0 %v17557_v14 }
 0x5a6   :  { %6347 = vrot.lane.b32.xlu0 %v14568_v48, %s14371_s3 }
 0x5a8   :  { %6581 = vrot.lane.b32.xlu1 %v14578_v54, %s14371_s3 }
 0x5aa   :  { %6505 = vrot.lane.b32.xlu0 %v14576_v52, %s14370_s16 }
 0x5ac   :  { %6739 = vrot.lane.b32.xlu1 %v14586_v57, %s14370_s16 }
 0x5ae   :  { %6503 = vrot.lane.b32.xlu0 %v14576_v52, %s14371_s3 }
 0x5b0   :  { %6737 = vrot.lane.b32.xlu1 %v14586_v57, %s14371_s3 }
 0x5b2   :  { %6661 = vrot.lane.b32.xlu0 %v14584_v56, %s14370_s16 }
 0x5b4   :  { %6991 = vrot.lane.b32.xlu1 %v14530_v28, %s14372_s17 }
 0x5b6   :  { %6659 = vrot.lane.b32.xlu0 %v14584_v56, %s14371_s3 }
 0x5b8   :  { %7675 = vrot.lane.b32.xlu1 %v14562_v46, %s14372_s17 }
 0x5ba   :  { %7067 = vrot.lane.b32.xlu0 %v14534_v31, %s14372_s17 }
 0x5bc   :  { %8055 = vrot.lane.b32.xlu1 %v14584_v56, %s14372_s17 }
 0x5be   :  { %7143 = vrot.lane.b32.xlu0 %v14536_v32, %s14372_s17 }
 0x5bf   :  { %v4273_v41 = vpop.xlane.xlu0 %4272 }
 0x5c0   :  { %14009 = vrcp.f32 %v4273_v41  ;;  %8209 = vrot.lane.b32.xlu1 %v14530_v28, %s14373_s18 }
 0x5c2   :  { %7219 = vrot.lane.b32.xlu0 %v14542_v35, %s14372_s17 }
 0x5c3   :  { %v4282_v60 = vpop.xlane.xlu1 %4281 }
 0x5c4   :  { %14011 = vrcp.f32 %v4282_v60  ;;  %v4279_v34 = vpop.xlane.xlu0 %4278  ;;  %8207 = vrot.lane.b32.xlu1 %v14530_v28, %s14374_s2 }
 0x5c5   :  { %14013 = vrcp.f32 %v4279_v34 }
 0x5c6   :  { %7295 = vrot.lane.b32.xlu0 %v14544_v36, %s14372_s17 }
 0x5c7   :  { %v4288_v23 = vpop.xlane.xlu1 %4287 }
 0x5c8   :  { %14015 = vrcp.f32 %v4288_v23  ;;  %v4285_v51 = vpop.xlane.xlu0 %4284  ;;  %8365 = vrot.lane.b32.xlu1 %v14536_v32, %s14373_s18 }
 0x5c9   :  { %14017 = vrcp.f32 %v4285_v51 }
 0x5ca   :  { %7371 = vrot.lane.b32.xlu0 %v14546_v38, %s14372_s17 }
 0x5cb   :  { %v4294_v18 = vpop.xlane.xlu1 %4293 }
 0x5cc   :  { %14019 = vrcp.f32 %v4294_v18  ;;  %v4291_v59 = vpop.xlane.xlu0 %4290  ;;  %8363 = vrot.lane.b32.xlu1 %v14536_v32, %s14374_s2 }
 0x5cd   :  { %v14010_v16 = vpop.eup %14009  ;;  %14021 = vrcp.f32 %v4291_v59 }
 0x5ce   :  { %7447 = vrot.lane.b32.xlu0 %v14552_v40, %s14372_s17  ;;  %v4335_v33 = vmul.f32 %v14010_v16, %v15388_v12 }
 0x5cf   :  { %v4300_v11 = vpop.xlane.xlu1 %4299 }
 0x5d0   :  { %14023 = vrcp.f32 %v4300_v11  ;;  %v4297_v43 = vpop.xlane.xlu0 %4296  ;;  %8521 = vrot.lane.b32.xlu1 %v14544_v36, %s14373_s18  ;;  %13329 = vmatmul.mubr.msk.f32.vlgmr.msra.gmra.mxu1 %vm305_vm2, %v4335_v33 }
 0x5d1   :  { %v14012_v20 = vpop.eup %14011  ;;  %14025 = vrcp.f32 %v4297_v43  ;;  %13337 = vmatpush3.msra.mxu1 %v15312_v62  ;;  %13338 = vmatprep.mubr.msk.f32.mxu1 %vm14364_vm1, %v17557_v14 }
 0x5d2   :  { %v14014_v17 = vpop.eup %14013  ;;  %7523 = vrot.lane.b32.xlu0 %v14554_v42, %s14372_s17  ;;  %13346 = vmatprep.subr.mxu1 %v17557_v14  ;;  %v4338_v12 = vmul.f32 %v14012_v20, %v15394_v7 }
 0x5d3   :  { %v4306_v13 = vpop.xlane.xlu1 %4305  ;;  %v4337_v41 = vmul.f32 %v14014_v17, %v15396_v4 }
 0x5d4   :  { %14027 = vrcp.f32 %v4306_v13  ;;  %v4303_v60 = vpop.xlane.xlu0 %4302  ;;  %13344 = vmatmul.mubr.msk.f32.vlgmr.msra.gmra.mxu0 %vm305_vm2, %v4338_v12 }
 0x5d5   :  { %v14016_v34 = vpop.eup %14015  ;;  %14029 = vrcp.f32 %v4303_v60  ;;  %13339 = vmatmul.mubr.msk.f32.vlgmr.msra.gmra.mxu1 %vm305_vm2, %v4337_v41  ;;  %13352 = vmatpush3.msra.mxu0 %v15324_v25  ;;  %v17594_v60 = vld [vmem:[#allocation48_spill] sm:$0xff] }
 0x5d6   :  { %v14018_v62 = vpop.eup %14017  ;;  %13347 = vmatpush3.msra.mxu1 %v15322_v1  ;;  %7599 = vrot.lane.b32.xlu0 %v14560_v44, %s14372_s17  ;;  %v4340_v7 = vmul.f32 %v14016_v34, %v15403_v30  ;;  %v17595_v34 = vld [vmem:[#allocation44_spill] sm:$0xff] }
 0x5d7   :  { %13353 = vmatprep.mubr.msk.f32.mxu0 %vm14364_vm1, %v17557_v14  ;;  %13361 = vmatprep.subr.mxu0 %v17557_v14  ;;  %v4339_v4 = vmul.f32 %v14018_v62, %v15405_v15  ;;  %v17596_v62 = vld [vmem:[#allocation49_spill] sm:$0xff] }
 0x5d8   :  { %13348 = vmatprep.mubr.msk.f32.mxu1 %vm14364_vm1, %v17557_v14  ;;  %13356 = vmatprep.subr.mxu1 %v17557_v14  ;;  %v4309_v25 = vpop.xlane.xlu0 %4308 }
 0x5d9   :  { %v14020_v23 = vpop.eup %14019  ;;  %14031 = vrcp.f32 %v4309_v25  ;;  %13349 = vmatmul.mubr.msk.f32.vlgmr.msra.gmra.mxu1 %vm305_vm2, %v4339_v4  ;;  %13354 = vmatmul.mubr.msk.f32.vlgmr.msra.gmra.mxu0 %vm305_vm2, %v4340_v7  ;;  %v17597_v7 = vld [vmem:[#allocation45_spill] sm:$0xff]  ;;  %v17598_v4 = vld [vmem:[#allocation50_spill] sm:$0xff] }
 0x5da   :  { %v14022_v1 = vpop.eup %14021  ;;  %13357 = vmatpush3.msra.mxu1 %v15328_v26  ;;  %13362 = vmatpush3.msra.mxu0 %v15334_v19  ;;  %v4342_v30 = vmul.f32 %v14020_v23, %v15411_v24 }
 0x5db   :  { %7751 = vrot.lane.b32.xlu0 %v14568_v48, %s14372_s17  ;;  %13358 = vmatprep.mubr.msk.f32.mxu1 %vm14364_vm1, %v17557_v14  ;;  %v4341_v15 = vmul.f32 %v14022_v1, %v15413_v53 }
 0x5dc   :  { %13363 = vmatprep.mubr.msk.f32.mxu0 %vm14364_vm1, %v17557_v14  ;;  %13366 = vmatprep.subr.mxu1 %v17557_v14 }
 0x5dd   :  { %v14024_v51 = vpop.eup %14023  ;;  %13371 = vmatprep.subr.mxu0 %v17557_v14  ;;  %13359 = vmatmul.mubr.msk.f32.vlgmr.msra.gmra.mxu1 %vm305_vm2, %v4341_v15 }
 0x5de   :  { %v14026_v26 = vpop.eup %14025  ;;  %13364 = vmatmul.mubr.msk.f32.vlgmr.msra.gmra.mxu0 %vm305_vm2, %v4342_v30  ;;  %13367 = vmatpush3.msra.mxu1 %v15338_v22  ;;  %v4344_v19 = vmul.f32 %v14024_v51, %v15419_v47 }
 0x5df   :  { %13372 = vmatpush3.msra.mxu0 %v15342_v5  ;;  %7827 = vrot.lane.b32.xlu0 %v14570_v50, %s14372_s17  ;;  %v4343_v24 = vmul.f32 %v14026_v26, %v15421_v9 }
 0x5e0   :  { %13368 = vmatprep.mubr.msk.f32.mxu1 %vm14364_vm1, %v17557_v14  ;;  %13373 = vmatprep.mubr.msk.f32.mxu0 %vm14364_vm1, %v17557_v14 }
 0x5e1   :  { %v14028_v53 = vpop.eup %14027  ;;  %13376 = vmatprep.subr.mxu1 %v17557_v14  ;;  %13381 = vmatprep.subr.mxu0 %v17557_v14 }
 0x5e2   :  { %v14030_v22 = vpop.eup %14029  ;;  %13369 = vmatmul.mubr.msk.f32.vlgmr.msra.gmra.mxu1 %vm305_vm2, %v4343_v24  ;;  %13374 = vmatmul.mubr.msk.f32.vlgmr.msra.gmra.mxu0 %vm305_vm2, %v4344_v19  ;;  %v4346_v47 = vmul.f32 %v14028_v53, %v15427_v58 }
 0x5e3   :  { %13377 = vmatpush3.msra.mxu1 %v15332_v63  ;;  %13382 = vmatpush3.msra.mxu0 %v15346_v8  ;;  %v4345_v5 = vmul.f32 %v14030_v22, %v15429_v10  ;;  %v6036_v8 = vpop.permute.xlu0 %6035 }
 0x5e4   :  { %7903 = vrot.lane.b32.xlu0 %v14576_v52, %s14372_s17  ;;  %13378 = vmatprep.mubr.msk.f32.mxu1 %vm14364_vm1, %v17557_v14 }
 0x5e5   :  { %13383 = vmatprep.mubr.msk.f32.mxu0 %vm14364_vm1, %v17557_v14  ;;  %13386 = vmatprep.subr.mxu1 %v17557_v14 }
 0x5e6   :  { %v14032_v9 = vpop.eup %14031  ;;  %13391 = vmatprep.subr.mxu0 %v17557_v14  ;;  %13379 = vmatmul.mubr.msk.f32.vlgmr.msra.gmra.mxu1 %vm305_vm2, %v4345_v5 }
 0x5e7   :  { %13384 = vmatmul.mubr.msk.f32.vlgmr.msra.gmra.mxu0 %vm305_vm2, %v4346_v47  ;;  %13387 = vmatpush3.msra.mxu1 %v15350_v61  ;;  %v4347_v63 = vmul.f32 %v14032_v9, %v15435_v21 }
 0x5e8   :  { %13392 = vmatpush3.msra.mxu0 %v15354_v3  ;;  %7979 = vrot.lane.b32.xlu0 %v14578_v54, %s14372_s17 }
 0x5e9   :  { %13388 = vmatprep.mubr.msk.f32.mxu1 %vm14364_vm1, %v17557_v14  ;;  %13396 = vmatprep.subr.mxu1 %v17557_v14 }
 0x5ea   :  { %13389 = vmatmul.mubr.msk.f32.vlgmr.msra.gmra.mxu1 %vm305_vm2, %v4347_v63  ;;  %13393 = vmatprep.mubr.msk.f32.mxu0 %vm14364_vm1, %v17557_v14 }
 0x5eb   :  { %13397 = vmatpush3.msra.mxu1 %v15358_v2  ;;  %13401 = vmatprep.subr.mxu0 %v17557_v14  ;;  %v15622_v2 = vpop.permute.xlu1 %6113 }
 0x5ec   :  { %8131 = vrot.lane.b32.xlu0 %v14586_v57, %s14372_s17  ;;  %13398 = vmatprep.mubr.msk.f32.mxu1 %vm14364_vm1, %v17557_v14 }
 0x5ed   :  { %13406 = vmatprep.subr.mxu1 %v17557_v14 }
 0x5f0   :  { %8287 = vrot.lane.b32.xlu0 %v14534_v31, %s14373_s18 }
 0x5f4   :  { %8285 = vrot.lane.b32.xlu0 %v14534_v31, %s14374_s2 }
 0x5f8   :  { %8443 = vrot.lane.b32.xlu0 %v14542_v35, %s14373_s18 }
 0x5fc   :  { %8441 = vrot.lane.b32.xlu0 %v14542_v35, %s14374_s2 }
 0x608   :  { %v4312_v3 = vpop.xlane.xlu1 %4311 }
 0x609   :  { %14033 = vrcp.f32 %v4312_v3 }
 0x60c   :  { %v4315_v61 = vpop.xlane.xlu1 %4314 }
 0x60d   :  { %14035 = vrcp.f32 %v4315_v61  ;;  %v4318_v58 = vpop.xlane.xlu0 %4317 }
 0x60e   :  { %14037 = vrcp.f32 %v4318_v58 }
 0x610   :  { %v6272_v10 = vpop.permute.xlu1 %6271 }
 0x611   :  { %v6194_v21 = vpop.permute.xlu0 %6193 }
 0x614   :  { %v15624_v18 = vpop.permute.xlu1 %6269 }
 0x615   :  { %v6192_v59 = vpop.permute.xlu0 %6191 }
 0x616   :  { %v14034_v16 = vpop.eup %14033 }
 0x617   :  { %v4348_v33 = vmul.f32 %v14034_v16, %v15446_v45 }
 0x618   :  { %v6428_v11 = vpop.permute.xlu1 %6427 }
 0x619   :  { %13394 = vmatmul.mubr.msk.f32.vlgmr.msra.gmra.mxu0 %vm305_vm2, %v4348_v33  ;;  %v6350_v20 = vpop.permute.xlu0 %6349 }
 0x61a   :  { %v14036_v43 = vpop.eup %14035  ;;  %13402 = vmatpush3.msra.mxu0 %v15361_v49  ;;  %13403 = vmatprep.mubr.msk.f32.mxu0 %vm14364_vm1, %v17557_v14 }
 0x61b   :  { %v14038_v17 = vpop.eup %14037  ;;  %13411 = vmatprep.subr.mxu0 %v17557_v14  ;;  %v4349_v12 = vmul.f32 %v14036_v43, %v15450_v6  ;;  %v17590_v6 = vld [vmem:[#allocation46_spill] sm:$0xff] }
 0x61c   :  { %v4350_v13 = vmul.f32 %v14038_v17, %v15452_v27  ;;  %v6426_v45 = vpop.permute.xlu1 %6425 }
 0x61d   :  { %13399 = vmatmul.mubr.msk.f32.vlgmr.msra.gmra.mxu1 %vm305_vm2, %v4349_v12  ;;  %v6348_v49 = vpop.permute.xlu0 %6347 }
 0x61e   :  { %13404 = vmatmul.mubr.msk.f32.vlgmr.msra.gmra.mxu0 %vm305_vm2, %v4350_v13  ;;  %13407 = vmatpush3.xpose.msk.msra.mxu1 %vm305_vm2, %v15336_v55  ;;  %v17591_v55 = vld [vmem:[#allocation42_spill] sm:$0xff] }
 0x61f   :  { %13412 = vmatpush3.xpose.msk.msra.mxu0 %vm305_vm2, %v15363_v39  ;;  %13408 = vmatprep.mubr.msk.f32.mxu1 %vm14364_vm1, %v17557_v14  ;;  %v17592_v39 = vld [vmem:[#allocation47_spill] sm:$0xff] }
 0x620   :  { %13413 = vmatprep.mubr.msk.f32.mxu0 %vm14364_vm1, %v17557_v14  ;;  %13416 = vmatprep.subr.mxu1 %v17557_v14  ;;  %v6584_v27 = vpop.permute.xlu1 %6583 }
 0x621   :  { %13421 = vmatprep.subr.mxu0 %v17557_v14  ;;  %13409 = vmatmul.mubr.msk.f32.vlgmr.msra.gmra.mxu1 %vm305_vm2, %v15340_v0  ;;  %v17593_v0 = vld [vmem:[#allocation43_spill] sm:$0xff]  ;;  %v6506_v41 = vpop.permute.xlu0 %6505 }
 0x622   :  { %13414 = vmatmul.mubr.msk.f32.vlgmr.msra.gmra.mxu0 %vm305_vm2, %v17590_v6  ;;  %13417 = vmatpush3.xpose.msk.msra.mxu1 %vm305_vm2, %v17591_v55 }
 0x623   :  { %13422 = vmatpush3.xpose.msk.msra.mxu0 %vm305_vm2, %v17592_v39  ;;  %13418 = vmatprep.mubr.msk.f32.mxu1 %vm14364_vm1, %v17557_v14 }
 0x624   :  { %13423 = vmatprep.mubr.msk.f32.mxu0 %vm14364_vm1, %v17557_v14  ;;  %13426 = vmatprep.subr.mxu1 %v17557_v14  ;;  %v6582_v25 = vpop.permute.xlu1 %6581 }
 0x625   :  { %13431 = vmatprep.subr.mxu0 %v17557_v14  ;;  %13419 = vmatmul.mubr.msk.f32.vlgmr.msra.gmra.mxu1 %vm305_vm2, %v17593_v0  ;;  %v6504_v23 = vpop.permute.xlu0 %6503 }
 0x626   :  { %13424 = vmatmul.mubr.msk.f32.vlgmr.msra.gmra.mxu0 %vm305_vm2, %v17594_v60  ;;  %13427 = vmatpush3.xpose.msk.msra.mxu1 %vm305_vm2, %v17595_v34 }
 0x627   :  { %13432 = vmatpush3.xpose.msk.msra.mxu0 %vm305_vm2, %v17596_v62  ;;  %13428 = vmatprep.mubr.msk.f32.mxu1 %vm14364_vm1, %v17557_v14 }
 0x628   :  { %13433 = vmatprep.mubr.msk.f32.mxu0 %vm14364_vm1, %v17557_v14  ;;  %13436 = vmatprep.subr.mxu1 %v17557_v14 }
 0x629   :  { %13441 = vmatprep.subr.mxu0 %v17557_v14  ;;  %13429 = vmatmul.mubr.msk.f32.vlgmr.msra.gmra.mxu1 %vm305_vm2, %v17597_v7 }
 0x62a   :  { %13434 = vmatmul.mubr.msk.f32.vlgmr.msra.gmra.mxu0 %vm305_vm2, %v17598_v4  ;;  %13437 = vmatpush3.xpose.msk.msra.mxu1 %vm305_vm2, %v15504_v29  ;;  %v6662_v29 = vpop.permute.xlu0 %6661 }
 0x62b   :  { %13442 = vmatpush3.xpose.msk.msra.mxu0 %vm305_vm2, %v15458_v37  ;;  %13438 = vmatprep.mubr.msk.f32.mxu1 %vm14364_vm1, %v17557_v14  ;;  %v6740_v37 = vpop.permute.xlu1 %6739 }
 0x62c   :  { %13443 = vmatprep.mubr.msk.f32.mxu0 %vm14364_vm1, %v17557_v14  ;;  %13446 = vmatprep.subr.mxu1 %v17557_v14 }
 0x62d   :  { %13451 = vmatprep.subr.mxu0 %v17557_v14  ;;  %13439 = vmatmul.mubr.msk.f32.vlgmr.msra.gmra.mxu1 %vm305_vm2, %v6036_v8 }
 0x62e   :  { %13444 = vmatmul.mubr.msk.f32.vlgmr.msra.gmra.mxu0 %vm305_vm2, %v15622_v2  ;;  %13447 = vmatpush3.xpose.msk.msra.mxu1 %vm305_vm2, %v6194_v21  ;;  %v6660_v30 = vpop.permute.xlu0 %6659 }
 0x62f   :  { %13452 = vmatpush3.xpose.msk.msra.mxu0 %vm305_vm2, %v6272_v10  ;;  %13448 = vmatprep.mubr.msk.f32.mxu1 %vm14364_vm1, %v17557_v14  ;;  %v6738_v1 = vpop.permute.xlu1 %6737 }
 0x630   :  { %13453 = vmatprep.mubr.msk.f32.mxu0 %vm14364_vm1, %v17557_v14  ;;  %13456 = vmatprep.subr.mxu1 %v17557_v14 }
 0x631   :  { %13461 = vmatprep.subr.mxu0 %v17557_v14  ;;  %13449 = vmatmul.mubr.msk.f32.vlgmr.msra.gmra.mxu1 %vm305_vm2, %v6192_v59 }
 0x632   :  { %13454 = vmatmul.mubr.msk.f32.vlgmr.msra.gmra.mxu0 %vm305_vm2, %v15624_v18  ;;  %13457 = vmatpush3.xpose.msk.msra.mxu1 %vm305_vm2, %v6350_v20  ;;  %v7068_v51 = vpop.permute.xlu0 %7067 }
 0x633   :  { %13462 = vmatpush3.xpose.msk.msra.mxu0 %vm305_vm2, %v6428_v11  ;;  %13458 = vmatprep.mubr.msk.f32.mxu1 %vm14364_vm1, %v17557_v14  ;;  %v6992_v15 = vpop.permute.xlu1 %6991 }
 0x634   :  { %13463 = vmatprep.mubr.msk.f32.mxu0 %vm14364_vm1, %v17557_v14  ;;  %13466 = vmatprep.subr.mxu1 %v17557_v14 }
 0x635   :  { %13471 = vmatprep.subr.mxu0 %v17557_v14  ;;  %13459 = vmatmul.mubr.msk.f32.vlgmr.msra.gmra.mxu1 %vm305_vm2, %v6348_v49 }
 0x636   :  { %13464 = vmatmul.mubr.msk.f32.vlgmr.msra.gmra.mxu0 %vm305_vm2, %v6426_v45  ;;  %13467 = vmatpush3.xpose.msk.msra.mxu1 %vm305_vm2, %v6506_v41 }
 0x637   :  { %13472 = vmatpush3.xpose.msk.msra.mxu0 %vm305_vm2, %v6584_v27  ;;  %13468 = vmatprep.mubr.msk.f32.mxu1 %vm14364_vm1, %v17557_v14 }
 0x638   :  { %13473 = vmatprep.mubr.msk.f32.mxu0 %vm14364_vm1, %v17557_v14  ;;  %13476 = vmatprep.subr.mxu1 %v17557_v14 }
 0x639   :  { %13481 = vmatprep.subr.mxu0 %v17557_v14  ;;  %13469 = vmatmul.mubr.msk.f32.vlgmr.msra.gmra.mxu1 %vm305_vm2, %v6504_v23 }
 0x63a   :  { %13474 = vmatmul.mubr.msk.f32.vlgmr.msra.gmra.mxu0 %vm305_vm2, %v6582_v25  ;;  %13477 = vmatpush3.xpose.msk.msra.mxu1 %vm305_vm2, %v6662_v29 }
 0x63b   :  { %13482 = vmatpush3.xpose.msk.msra.mxu0 %vm305_vm2, %v6740_v37  ;;  %13478 = vmatprep.mubr.msk.f32.mxu1 %vm14364_vm1, %v17557_v14 }
 0x63c   :  { %13483 = vmatprep.mubr.msk.f32.mxu0 %vm14364_vm1, %v17557_v14  ;;  %13486 = vmatprep.subr.mxu1 %v17557_v14 }
 0x63d   :  { %13491 = vmatprep.subr.mxu0 %v17557_v14  ;;  %13479 = vmatmul.mubr.msk.f32.vlgmr.msra.gmra.mxu1 %vm305_vm2, %v6660_v30 }
 0x63e   :  { %13484 = vmatmul.mubr.msk.f32.vlgmr.msra.gmra.mxu0 %vm305_vm2, %v6738_v1  ;;  %13487 = vmatpush3.msra.mxu1 %v6992_v15 }
 0x63f   :  { %13492 = vmatpush3.msra.mxu0 %v7068_v51  ;;  %13488 = vmatprep.mubr.msk.f32.mxu1 %vm14364_vm1, %v17557_v14 }
 0x640   :  { %13493 = vmatprep.mubr.msk.f32.mxu0 %vm14364_vm1, %v17557_v14  ;;  %13496 = vmatprep.subr.mxu1 %v17557_v14 }
 0x641   :  { %13501 = vmatprep.subr.mxu0 %v17557_v14 }
 0x663   :  { %v15738_v26 = vpop.f32.mrf.mxu0 }
 0x664   :  { %17599 = vst [vmem:[#allocation46_spill] sm:$0xff] %v15738_v26 }
 0x665   :  { %v13335_v19 = vpop.f32.mrf.mxu0 }
 0x690   :  { %v15740_v24 = vpop.f32.mrf.mxu1 }
 0x691   :  { %17600 = vst [vmem:[#allocation42_spill] sm:$0xff] %v15740_v24 }
 0x692   :  { %v13330_v53 = vpop.f32.mrf.mxu1 }
 0x694   :  { %v15742_v22 = vpop.f32.mrf.mxu0 }
 0x695   :  { %17601 = vst [vmem:[#allocation47_spill] sm:$0xff] %v15742_v22  ;;  %v15744_v5 = vpop.f32.mrf.mxu1 }
 0x696   :  { %17602 = vst [vmem:[#allocation43_spill] sm:$0xff] %v15744_v5  ;;  %v13345_v47 = vpop.f32.mrf.mxu0 }
 0x697   :  { %v13340_v9 = vpop.f32.mrf.mxu1 }
 0x699   :  { %v15746_v63 = vpop.f32.mrf.mxu1  ;;  %v15748_v2 = vpop.f32.mrf.mxu0 }
 0x69a   :  { %17603 = vst [vmem:[#allocation48_spill] sm:$0xff] %v15746_v63  ;;  %17604 = vst [vmem:[#allocation44_spill] sm:$0xff] %v15748_v2 }
 0x69b   :  { %v13350_v3 = vpop.f32.mrf.mxu1  ;;  %v13355_v8 = vpop.f32.mrf.mxu0 }
 0x69d   :  { %v15750_v61 = vpop.f32.mrf.mxu1 }
 0x69e   :  { %17605 = vst [vmem:[#allocation49_spill] sm:$0xff] %v15750_v61  ;;  %v15752_v58 = vpop.f32.mrf.mxu0 }
 0x69f   :  { %17606 = vst [vmem:[#allocation45_spill] sm:$0xff] %v15752_v58  ;;  %v13360_v10 = vpop.f32.mrf.mxu1 }
 0x6a0   :  { %v13365_v21 = vpop.f32.mrf.mxu0 }
 0x6a2   :  { %v15754_v18 = vpop.f32.mrf.mxu1  ;;  %v15756_v59 = vpop.f32.mrf.mxu0 }
 0x6a3   :  { %17607 = vst [vmem:[#allocation50_spill] sm:$0xff] %v15754_v18  ;;  %17608 = vst [vmem:[#allocation51_spill] sm:$0xff] %v15756_v59 }
 0x6a4   :  { %v13370_v16 = vpop.f32.mrf.mxu1  ;;  %v13375_v33 = vpop.f32.mrf.mxu0 }
 0x6a6   :  { %v15758_v11 = vpop.f32.mrf.mxu1 }
 0x6a7   :  { %17609 = vst [vmem:[#allocation52_spill] sm:$0xff] %v15758_v11  ;;  %v15760_v43 = vpop.f32.mrf.mxu0 }
 0x6a8   :  { %17610 = vst [vmem:[#allocation53_spill] sm:$0xff] %v15760_v43  ;;  %v13380_v20 = vpop.f32.mrf.mxu1 }
 0x6a9   :  { %v13385_v17 = vpop.f32.mrf.mxu0 }
 0x6aa   :  { %v15762_v12 = vpop.f32.mrf.mxu1 }
 0x6ab   :  { %17611 = vst [vmem:[#allocation54_spill] sm:$0xff] %v15762_v12 }
 0x6ac   :  { %v13390_v13 = vpop.f32.mrf.mxu1 }
 0x6d9   :  { %v15764_v45 = vpop.f32.mrf.mxu0 }
 0x6da   :  { %17612 = vst [vmem:[#allocation55_spill] sm:$0xff] %v15764_v45 }
 0x6db   :  { %v13395_v49 = vpop.f32.mrf.mxu0 }
 0x6dd   :  { %v15766_v6 = vpop.f32.mrf.mxu1 }
 0x6de   :  { %17613 = vst [vmem:[#allocation56_spill] sm:$0xff] %v15766_v6  ;;  %v15768_v55 = vpop.f32.mrf.mxu0 }
 0x6df   :  { %17614 = vst [vmem:[#allocation57_spill] sm:$0xff] %v15768_v55  ;;  %v13400_v39 = vpop.f32.mrf.mxu1 }
 0x6e0   :  { %v13405_v27 = vpop.f32.mrf.mxu0 }
 0x6e1   :  { %v15770_v0 = vpop.f32.mrf.mxu1 }
 0x6e2   :  { %v15772_v41 = vpop.f32.mrf.mxu0  ;;  %v6815_v60 = vsel %vm305_vm2, %v15770_v0, -inf }
 0x6e3   :  { %6816 = vmax.xlane.f32.xlu0 %v6815_v60  ;;  %v13410_v34 = vpop.f32.mrf.mxu1  ;;  %v6818_v62 = vsel %vm305_vm2, %v15772_v41, -inf }
 0x6e4   :  { %6819 = vmax.xlane.f32.xlu1 %v6818_v62  ;;  %v13415_v7 = vpop.f32.mrf.mxu0 }
 0x6e5   :  { %v15778_v4 = vpop.f32.mrf.mxu1 }
 0x6e6   :  { %v15780_v25 = vpop.f32.mrf.mxu0  ;;  %v6821_v23 = vsel %vm305_vm2, %v15778_v4, -inf }
 0x6e7   :  { %6822 = vmax.xlane.f32.xlu0 %v6821_v23  ;;  %v13420_v37 = vpop.f32.mrf.mxu1  ;;  %v6824_v51 = vsel %vm305_vm2, %v15780_v25, -inf }
 0x6e8   :  { %v13425_v29 = vpop.f32.mrf.mxu0 }
 0x6e9   :  { %v15784_v1 = vpop.f32.mrf.mxu1 }
 0x6ea   :  { %v15786_v30 = vpop.f32.mrf.mxu0  ;;  %v6827_v15 = vsel %vm305_vm2, %v15784_v1, -inf }
 0x6eb   :  { %v13430_v19 = vpop.f32.mrf.mxu1  ;;  %6828 = vmax.xlane.f32.xlu1 %v6827_v15  ;;  %6825 = vmax.xlane.f32.xlu0 %v6824_v51  ;;  %v6830_v8 = vsel %vm305_vm2, %v15786_v30, -inf }
 0x6ec   :  { %v13435_v53 = vpop.f32.mrf.mxu0 }
 0x6ed   :  { %v15792_v47 = vpop.f32.mrf.mxu1 }
 0x6ee   :  { %v15794_v9 = vpop.f32.mrf.mxu0  ;;  %v6833_v3 = vsel %vm305_vm2, %v15792_v47, -inf }
 0x6ef   :  { %v13440_v10 = vpop.f32.mrf.mxu1  ;;  %6834 = vmax.xlane.f32.xlu1 %v6833_v3  ;;  %6831 = vmax.xlane.f32.xlu0 %v6830_v8  ;;  %v6836_v20 = vsel %vm305_vm2, %v15794_v9, -inf }
 0x6f0   :  { %v13445_v21 = vpop.f32.mrf.mxu0 }
 0x6f1   :  { %v15800_v16 = vpop.f32.mrf.mxu1 }
 0x6f2   :  { %v15802_v33 = vpop.f32.mrf.mxu0  ;;  %v6839_v17 = vsel %vm305_vm2, %v15800_v16, -inf }
 0x6f3   :  { %6837 = vmax.xlane.f32.xlu0 %v6836_v20  ;;  %6840 = vmax.xlane.f32.xlu1 %v6839_v17  ;;  %v13450_v13 = vpop.f32.mrf.mxu1  ;;  %v6842_v60 = vsel %vm305_vm2, %v15802_v33, -inf }
 0x6f4   :  { %v13455_v49 = vpop.f32.mrf.mxu0  ;;  %v15834_v13 = vpop.permute.xlu0 %7143 }
 0x6f5   :  { %v15808_v39 = vpop.f32.mrf.mxu1 }
 0x6f6   :  { %v15810_v27 = vpop.f32.mrf.mxu0  ;;  %v6845_v34 = vsel %vm305_vm2, %v15808_v39, -inf }
 0x6f7   :  { %6843 = vmax.xlane.f32.xlu0 %v6842_v60  ;;  %6846 = vmax.xlane.f32.xlu1 %v6845_v34  ;;  %v13460_v62 = vpop.f32.mrf.mxu1  ;;  %v6848_v29 = vsel %vm305_vm2, %v15810_v27, -inf }
 0x6f8   :  { %v13465_v7 = vpop.f32.mrf.mxu0  ;;  %v15838_v49 = vpop.permute.xlu0 %7219 }
 0x6f9   :  { %v15816_v23 = vpop.f32.mrf.mxu1 }
 0x6fa   :  { %v15818_v37 = vpop.f32.mrf.mxu0  ;;  %v6851_v15 = vsel %vm305_vm2, %v15816_v23, -inf }
 0x6fb   :  { %6849 = vmax.xlane.f32.xlu0 %v6848_v29  ;;  %6852 = vmax.xlane.f32.xlu1 %v6851_v15  ;;  %v13470_v51 = vpop.f32.mrf.mxu1  ;;  %v6854_v8 = vsel %vm305_vm2, %v15818_v37, -inf }
 0x6fc   :  { %v13475_v19 = vpop.f32.mrf.mxu0  ;;  %v15846_v60 = vpop.permute.xlu0 %7295 }
 0x6fd   :  { %v15824_v53 = vpop.f32.mrf.mxu1 }
 0x6fe   :  { %v15826_v3 = vpop.f32.mrf.mxu0  ;;  %v6857_v10 = vsel %vm305_vm2, %v15824_v53, -inf }
 0x6ff   :  { %6855 = vmax.xlane.f32.xlu0 %v6854_v8  ;;  %6858 = vmax.xlane.f32.xlu1 %v6857_v10  ;;  %v13480_v21 = vpop.f32.mrf.mxu1  ;;  %v6860_v17 = vsel %vm305_vm2, %v15826_v3, -inf  ;;  %v15866_v8 = vpop.permute.xlu1 %7675 }
 0x700   :  { %v13485_v20 = vpop.f32.mrf.mxu0  ;;  %v15850_v34 = vpop.permute.xlu0 %7371 }
 0x703   :  { %6861 = vmax.xlane.f32.xlu0 %v6860_v17  ;;  %v15870_v21 = vpop.permute.xlu1 %8055 }
 0x704   :  { %v15854_v62 = vpop.permute.xlu0 %7447 }
 0x707   :  { %v15874_v17 = vpop.permute.xlu1 %8209 }
 0x708   :  { %v15856_v7 = vpop.permute.xlu0 %7523 }
 0x70b   :  { %v15878_v12 = vpop.permute.xlu1 %8207 }
 0x70c   :  { %v15858_v29 = vpop.permute.xlu0 %7599 }
 0x70f   :  { %v15882_v18 = vpop.permute.xlu1 %8365 }
 0x710   :  { %8519 = vrot.lane.b32.xlu1 %v14544_v36, %s14374_s2  ;;  %v15860_v15 = vpop.permute.xlu0 %7751 }
 0x713   :  { %v15886_v63 = vpop.permute.xlu1 %8363 }
 0x714   :  { %8677 = vrot.lane.b32.xlu1 %v14552_v40, %s14373_s18  ;;  %v15862_v51 = vpop.permute.xlu0 %7827 }
 0x717   :  { %v15890_v24 = vpop.permute.xlu1 %8521 }
 0x718   :  { %8675 = vrot.lane.b32.xlu1 %v14552_v40, %s14374_s2  ;;  %v15864_v19 = vpop.permute.xlu0 %7903 }
 0x719   :  { %8599 = vrot.lane.b32.xlu0 %v14546_v38, %s14373_s18 }
 0x71c   :  { %v15868_v10 = vpop.permute.xlu0 %7979 }
 0x71d   :  { %8597 = vrot.lane.b32.xlu0 %v14546_v38, %s14374_s2 }
 0x720   :  { %v15872_v20 = vpop.permute.xlu0 %8131 }
 0x721   :  { %8755 = vrot.lane.b32.xlu0 %v14554_v42, %s14373_s18 }
 0x724   :  { %v15876_v6 = vpop.permute.xlu0 %8287 }
 0x728   :  { %v15880_v11 = vpop.permute.xlu0 %8285 }
 0x72c   :  { %v15884_v61 = vpop.permute.xlu0 %8443 }
 0x730   :  { %v15888_v5 = vpop.permute.xlu0 %8441 }
 0x76c   :  { %v6817_v55 = vpop.xlane.xlu0 %6816 }
 0x76d   :  { %v6820_v45 = vpop.xlane.xlu1 %6819  ;;  %v6863_v43 = vsub.f32 %v15770_v0, %v6817_v55 }
 0x76e   :  { %v6864_v59 = vsub.f32 %v15772_v41, %v6820_v45 }
 0x76f   :  { %v6879_v58 = vmul.f32 1.442695, %v6863_v43 }
 0x770   :  { %v6881_v2 = vmul.f32 1.442695, %v6864_v59  ;;  %v6823_v22 = vpop.xlane.xlu0 %6822 }
 0x771   :  { %14039 = vpow2.f32 %v6879_v58  ;;  %v6865_v26 = vsub.f32 %v15778_v4, %v6823_v22 }
 0x772   :  { %14041 = vpow2.f32 %v6881_v2 }
 0x773   :  { %v6883_v40 = vmul.f32 1.442695, %v6865_v26 }
 0x774   :  { %v6829_v38 = vpop.xlane.xlu1 %6828  ;;  %v6826_v36 = vpop.xlane.xlu0 %6825 }
 0x775   :  { %14043 = vpow2.f32 %v6883_v40  ;;  %v6867_v28 = vsub.f32 %v15784_v1, %v6829_v38  ;;  %v6866_v35 = vsub.f32 %v15780_v25, %v6826_v36 }
 0x777   :  { %v6887_v32 = vmul.f32 1.442695, %v6867_v28  ;;  %v6885_v31 = vmul.f32 1.442695, %v6866_v35 }
 0x778   :  { %v6835_v55 = vpop.xlane.xlu1 %6834  ;;  %v6832_v0 = vpop.xlane.xlu0 %6831 }
 0x779   :  { %14045 = vpow2.f32 %v6887_v32  ;;  %v6869_v59 = vsub.f32 %v15792_v47, %v6835_v55  ;;  %v6868_v58 = vsub.f32 %v15786_v30, %v6832_v0 }
 0x77a   :  { %14047 = vpow2.f32 %v6885_v31 }
 0x77b   :  { %v6891_v22 = vmul.f32 1.442695, %v6869_v59  ;;  %v6889_v2 = vmul.f32 1.442695, %v6868_v58 }
 0x77c   :  { %v6841_v26 = vpop.xlane.xlu1 %6840  ;;  %v6838_v43 = vpop.xlane.xlu0 %6837 }
 0x77d   :  { %14049 = vpow2.f32 %v6891_v22  ;;  %v6871_v40 = vsub.f32 %v15800_v16, %v6841_v26  ;;  %v6870_v38 = vsub.f32 %v15794_v9, %v6838_v43 }
 0x77e   :  { %v15901_v36 = vpop.eup %14039  ;;  %14051 = vpow2.f32 %v6889_v2 }
 0x77f   :  { %v15903_v28 = vpop.eup %14041  ;;  %v6895_v32 = vmul.f32 1.442695, %v6871_v40  ;;  %v6893_v35 = vmul.f32 1.442695, %v6870_v38  ;;  %v6911_v45 = vsel %vm305_vm2, %v15901_v36, 0.0 }
 0x780   :  { %v6914_v31 = vsel %vm305_vm2, %v15903_v28, 0.0  ;;  %v6847_v41 = vpop.xlane.xlu1 %6846  ;;  %6912 = vadd.xlane.f32.xlu1 %v6911_v45  ;;  %v6844_v4 = vpop.xlane.xlu0 %6843 }
 0x781   :  { %14053 = vpow2.f32 %v6895_v32  ;;  %6915 = vadd.xlane.f32.xlu0 %v6914_v31  ;;  %v6873_v25 = vsub.f32 %v15808_v39, %v6847_v41  ;;  %v6872_v1 = vsub.f32 %v15802_v33, %v6844_v4 }
 0x782   :  { %v15911_v30 = vpop.eup %14043  ;;  %14055 = vpow2.f32 %v6893_v35 }
 0x783   :  { %v6899_v47 = vmul.f32 1.442695, %v6873_v25  ;;  %v6897_v9 = vmul.f32 1.442695, %v6872_v1  ;;  %v6917_v16 = vsel %vm305_vm2, %v15911_v30, 0.0 }
 0x784   :  { %v6853_v55 = vpop.xlane.xlu1 %6852  ;;  %6918 = vadd.xlane.f32.xlu1 %v6917_v16  ;;  %v6850_v0 = vpop.xlane.xlu0 %6849 }
 0x785   :  { %14057 = vpow2.f32 %v6899_v47  ;;  %v6875_v59 = vsub.f32 %v15816_v23, %v6853_v55  ;;  %v6874_v58 = vsub.f32 %v15810_v27, %v6850_v0 }
 0x786   :  { %v15917_v22 = vpop.eup %14045  ;;  %14059 = vpow2.f32 %v6897_v9 }
 0x787   :  { %v15919_v33 = vpop.eup %14047  ;;  %v6903_v39 = vmul.f32 1.442695, %v6875_v59  ;;  %v6901_v2 = vmul.f32 1.442695, %v6874_v58  ;;  %v6923_v26 = vsel %vm305_vm2, %v15917_v22, 0.0 }
 0x788   :  { %v6859_v43 = vpop.xlane.xlu1 %6858  ;;  %6924 = vadd.xlane.f32.xlu1 %v6923_v26  ;;  %v6920_v40 = vsel %vm305_vm2, %v15919_v33, 0.0  ;;  %v6856_v38 = vpop.xlane.xlu0 %6855 }
 0x789   :  { %14061 = vpow2.f32 %v6903_v39  ;;  %v6877_v23 = vsub.f32 %v15824_v53, %v6859_v43  ;;  %6921 = vadd.xlane.f32.xlu0 %v6920_v40  ;;  %v6876_v27 = vsub.f32 %v15818_v37, %v6856_v38 }
 0x78a   :  { %v15927_v32 = vpop.eup %14049  ;;  %14063 = vpow2.f32 %v6901_v2 }
 0x78b   :  { %v15929_v35 = vpop.eup %14051  ;;  %v6905_v45 = vmul.f32 1.442695, %v6876_v27  ;;  %v6929_v31 = vsel %vm305_vm2, %v15927_v32, 0.0  ;;  %v6907_v41 = vmul.f32 1.442695, %v6877_v23 }
 0x78c   :  { %6930 = vadd.xlane.f32.xlu1 %v6929_v31  ;;  %v6926_v4 = vsel %vm305_vm2, %v15929_v35, 0.0  ;;  %v6862_v38 = vpop.xlane.xlu0 %6861  ;;  %v16006_v31 = vpop.permute.xlu1 %8519 }
 0x78d   :  { %6927 = vadd.xlane.f32.xlu0 %v6926_v4  ;;  %14065 = vpow2.f32 %v6905_v45  ;;  %v6878_v23 = vsub.f32 %v15826_v3, %v6862_v38 }
 0x78e   :  { %v15935_v25 = vpop.eup %14053  ;;  %14067 = vpow2.f32 %v6907_v41 }
 0x78f   :  { %v15937_v53 = vpop.eup %14055  ;;  %v6935_v37 = vsel %vm305_vm2, %v15935_v25, 0.0  ;;  %v6909_v27 = vmul.f32 1.442695, %v6878_v23 }
 0x790   :  { %6936 = vadd.xlane.f32.xlu1 %v6935_v37  ;;  %v6932_v1 = vsel %vm305_vm2, %v15937_v53, 0.0  ;;  %v16008_v41 = vpop.permute.xlu0 %8599  ;;  %v16010_v4 = vpop.permute.xlu1 %8677 }
 0x791   :  { %6933 = vadd.xlane.f32.xlu0 %v6932_v1  ;;  %14069 = vpow2.f32 %v6909_v27 }
 0x792   :  { %v15943_v47 = vpop.eup %14057 }
 0x793   :  { %v15945_v9 = vpop.eup %14059  ;;  %v6941_v16 = vsel %vm305_vm2, %v15943_v47, 0.0 }
 0x794   :  { %6942 = vadd.xlane.f32.xlu1 %v6941_v16  ;;  %v6938_v55 = vsel %vm305_vm2, %v15945_v9, 0.0  ;;  %v16012_v37 = vpop.permute.xlu0 %8597  ;;  %v16014_v1 = vpop.permute.xlu1 %8675 }
 0x795   :  { %6939 = vadd.xlane.f32.xlu0 %v6938_v55 }
 0x796   :  { %v15951_v0 = vpop.eup %14061 }
 0x797   :  { %v15953_v59 = vpop.eup %14063  ;;  %v6947_v58 = vsel %vm305_vm2, %v15951_v0, 0.0 }
 0x798   :  { %6948 = vadd.xlane.f32.xlu1 %v6947_v58  ;;  %v6944_v39 = vsel %vm305_vm2, %v15953_v59, 0.0  ;;  %v16016_v16 = vpop.permute.xlu0 %8755 }
 0x799   :  { %6945 = vadd.xlane.f32.xlu0 %v6944_v39 }
 0x79a   :  { %v15959_v2 = vpop.eup %14065 }
 0x79b   :  { %v6950_v26 = vsel %vm305_vm2, %v15959_v2, 0.0  ;;  %v15963_v43 = vpop.eup %14067 }
 0x79c   :  { %v6953_v40 = vsel %vm305_vm2, %v15963_v43, 0.0 }
 0x79d   :  { %6951 = vadd.xlane.f32.xlu0 %v6950_v26 }
 0x79e   :  { %v15980_v45 = vpop.eup %14069 }
 0x79f   :  { %v6956_v3 = vsel %vm305_vm2, %v15980_v45, 0.0 }
 0x7a1   :  { %6954 = vadd.xlane.f32.xlu0 %v6953_v40 }
 0x7a9   :  { %8833 = vrot.lane.b32.xlu1 %v14560_v44, %s14373_s18 }
 0x7b7   :  { %8753 = vrot.lane.b32.xlu0 %v14554_v42, %s14374_s2 }
 0x7bb   :  { %8911 = vrot.lane.b32.xlu0 %v14562_v46, %s14373_s18 }
 0x7bf   :  { %8909 = vrot.lane.b32.xlu0 %v14562_v46, %s14374_s2 }
 0x7c3   :  { %9067 = vrot.lane.b32.xlu0 %v14570_v50, %s14373_s18 }
 0x7c7   :  { %9065 = vrot.lane.b32.xlu0 %v14570_v50, %s14374_s2 }
 0x7cb   :  { %9223 = vrot.lane.b32.xlu0 %v14578_v54, %s14373_s18 }
 0x7cd   :  { %6957 = vadd.xlane.f32.xlu1 %v6956_v3 }
 0x7cf   :  { %9221 = vrot.lane.b32.xlu0 %v14578_v54, %s14374_s2 }
 0x7d3   :  { %9379 = vrot.lane.b32.xlu0 %v14586_v57, %s14373_s18 }
 0x7d7   :  { %9377 = vrot.lane.b32.xlu0 %v14586_v57, %s14374_s2 }
 0x7de   :  { %8831 = vrot.lane.b32.xlu1 %v14560_v44, %s14374_s2 }
 0x7e2   :  { %8989 = vrot.lane.b32.xlu1 %v14568_v48, %s14373_s18 }
 0x7e6   :  { %8987 = vrot.lane.b32.xlu1 %v14568_v48, %s14374_s2 }
 0x7ea   :  { %9145 = vrot.lane.b32.xlu1 %v14576_v52, %s14373_s18 }
 0x7ee   :  { %9143 = vrot.lane.b32.xlu1 %v14576_v52, %s14374_s2 }
 0x7f2   :  { %9301 = vrot.lane.b32.xlu1 %v14584_v56, %s14373_s18 }
 0x7f6   :  { %9299 = vrot.lane.b32.xlu1 %v14584_v56, %s14374_s2 }
 0x809   :  { %v6913_v55 = vpop.xlane.xlu1 %6912 }
 0x80a   :  { %14071 = vrcp.f32 %v6913_v55  ;;  %v6916_v58 = vpop.xlane.xlu0 %6915 }
 0x80b   :  { %14073 = vrcp.f32 %v6916_v58 }
 0x80d   :  { %v6919_v39 = vpop.xlane.xlu1 %6918 }
 0x80e   :  { %14075 = vrcp.f32 %v6919_v39 }
 0x811   :  { %v6925_v26 = vpop.xlane.xlu1 %6924 }
 0x812   :  { %14077 = vrcp.f32 %v6925_v26  ;;  %v6922_v40 = vpop.xlane.xlu0 %6921 }
 0x813   :  { %14079 = vrcp.f32 %v6922_v40 }
 0x815   :  { %v6931_v38 = vpop.xlane.xlu1 %6930 }
 0x816   :  { %14081 = vrcp.f32 %v6931_v38  ;;  %v6928_v23 = vpop.xlane.xlu0 %6927 }
 0x817   :  { %v14072_v27 = vpop.eup %14071  ;;  %14083 = vrcp.f32 %v6928_v23 }
 0x818   :  { %v14074_v3 = vpop.eup %14073  ;;  %v6975_v48 = vmul.f32 %v14072_v27, %v15901_v36 }
 0x819   :  { %v6937_v57 = vpop.xlane.xlu1 %6936  ;;  %v6976_v56 = vmul.f32 %v14074_v3, %v15903_v28 }
 0x81a   :  { %14085 = vrcp.f32 %v6937_v57  ;;  %v6934_v55 = vpop.xlane.xlu0 %6933  ;;  %13489 = vmatmul.mubr.msk.f32.vlgmr.msra.gmra.mxu1 %vm305_vm2, %v6975_v48 }
 0x81b   :  { %v14076_v58 = vpop.eup %14075  ;;  %14087 = vrcp.f32 %v6934_v55  ;;  %13494 = vmatmul.mubr.msk.f32.vlgmr.msra.gmra.mxu0 %vm305_vm2, %v6976_v56  ;;  %13497 = vmatpush3.msra.mxu1 %v15834_v13 }
 0x81c   :  { %13502 = vmatpush3.msra.mxu0 %v15838_v49  ;;  %13498 = vmatprep.mubr.msk.f32.mxu1 %vm14364_vm1, %v17557_v14  ;;  %v6977_v36 = vmul.f32 %v14076_v58, %v15911_v30 }
 0x81d   :  { %13506 = vmatprep.subr.mxu1 %v17557_v14  ;;  %v6943_v28 = vpop.xlane.xlu1 %6942  ;;  %13503 = vmatprep.mubr.msk.f32.mxu0 %vm14364_vm1, %v17557_v14 }
 0x81e   :  { %14089 = vrcp.f32 %v6943_v28  ;;  %v6940_v48 = vpop.xlane.xlu0 %6939  ;;  %13499 = vmatmul.mubr.msk.f32.vlgmr.msra.gmra.mxu1 %vm305_vm2, %v6977_v36  ;;  %13511 = vmatprep.subr.mxu0 %v17557_v14 }
 0x81f   :  { %v14078_v56 = vpop.eup %14077  ;;  %14091 = vrcp.f32 %v6940_v48  ;;  %13507 = vmatpush3.msra.mxu1 %v15846_v60  ;;  %13508 = vmatprep.mubr.msk.f32.mxu1 %vm14364_vm1, %v17557_v14 }
 0x820   :  { %v14080_v57 = vpop.eup %14079  ;;  %13516 = vmatprep.subr.mxu1 %v17557_v14  ;;  %v6979_v13 = vmul.f32 %v14078_v56, %v15917_v22 }
 0x821   :  { %v6949_v49 = vpop.xlane.xlu1 %6948  ;;  %v6978_v30 = vmul.f32 %v14080_v57, %v15919_v33 }
 0x822   :  { %14093 = vrcp.f32 %v6949_v49  ;;  %v6946_v39 = vpop.xlane.xlu0 %6945  ;;  %13509 = vmatmul.mubr.msk.f32.vlgmr.msra.gmra.mxu1 %vm305_vm2, %v6979_v13 }
 0x823   :  { %v14082_v26 = vpop.eup %14081  ;;  %14095 = vrcp.f32 %v6946_v39  ;;  %13504 = vmatmul.mubr.msk.f32.vlgmr.msra.gmra.mxu0 %vm305_vm2, %v6978_v30  ;;  %13517 = vmatpush3.msra.mxu1 %v15854_v62 }
 0x824   :  { %v14084_v60 = vpop.eup %14083  ;;  %13512 = vmatpush3.msra.mxu0 %v15850_v34  ;;  %13518 = vmatprep.mubr.msk.f32.mxu1 %vm14364_vm1, %v17557_v14  ;;  %v6981_v22 = vmul.f32 %v14082_v26, %v15927_v32 }
 0x825   :  { %13526 = vmatprep.subr.mxu1 %v17557_v14  ;;  %13513 = vmatprep.mubr.msk.f32.mxu0 %vm14364_vm1, %v17557_v14  ;;  %v6980_v33 = vmul.f32 %v14084_v60, %v15929_v35 }
 0x826   :  { %13521 = vmatprep.subr.mxu0 %v17557_v14  ;;  %v6952_v40 = vpop.xlane.xlu0 %6951  ;;  %13519 = vmatmul.mubr.msk.f32.vlgmr.msra.gmra.mxu1 %vm305_vm2, %v6981_v22 }
 0x827   :  { %v14086_v62 = vpop.eup %14085  ;;  %14097 = vrcp.f32 %v6952_v40  ;;  %13514 = vmatmul.mubr.msk.f32.vlgmr.msra.gmra.mxu0 %vm305_vm2, %v6980_v33  ;;  %13527 = vmatpush3.msra.mxu1 %v15858_v29 }
 0x828   :  { %v14088_v34 = vpop.eup %14087  ;;  %13522 = vmatpush3.msra.mxu0 %v15856_v7  ;;  %13523 = vmatprep.mubr.msk.f32.mxu0 %vm14364_vm1, %v17557_v14  ;;  %v6983_v32 = vmul.f32 %v14086_v62, %v15935_v25 }
 0x829   :  { %13528 = vmatprep.mubr.msk.f32.mxu1 %vm14364_vm1, %v17557_v14  ;;  %13531 = vmatprep.subr.mxu0 %v17557_v14  ;;  %v6982_v35 = vmul.f32 %v14088_v34, %v15937_v53 }
 0x82a   :  { %13536 = vmatprep.subr.mxu1 %v17557_v14  ;;  %v6955_v38 = vpop.xlane.xlu0 %6954  ;;  %13529 = vmatmul.mubr.msk.f32.vlgmr.msra.gmra.mxu1 %vm305_vm2, %v6983_v32 }
 0x82b   :  { %v14090_v29 = vpop.eup %14089  ;;  %14099 = vrcp.f32 %v6955_v38  ;;  %13524 = vmatmul.mubr.msk.f32.vlgmr.msra.gmra.mxu0 %vm305_vm2, %v6982_v35  ;;  %13537 = vmatpush3.msra.mxu1 %v15860_v15 }
 0x82c   :  { %v14092_v7 = vpop.eup %14091  ;;  %13532 = vmatpush3.msra.mxu0 %v15866_v8  ;;  %13533 = vmatprep.mubr.msk.f32.mxu0 %vm14364_vm1, %v17557_v14  ;;  %v6985_v25 = vmul.f32 %v14090_v29, %v15943_v47 }
 0x82d   :  { %13538 = vmatprep.mubr.msk.f32.mxu1 %vm14364_vm1, %v17557_v14  ;;  %13541 = vmatprep.subr.mxu0 %v17557_v14  ;;  %v6984_v53 = vmul.f32 %v14092_v7, %v15945_v9 }
 0x82e   :  { %13546 = vmatprep.subr.mxu1 %v17557_v14  ;;  %13539 = vmatmul.mubr.msk.f32.vlgmr.msra.gmra.mxu1 %vm305_vm2, %v6985_v25 }
 0x82f   :  { %v14094_v15 = vpop.eup %14093  ;;  %13534 = vmatmul.mubr.msk.f32.vlgmr.msra.gmra.mxu0 %vm305_vm2, %v6984_v53  ;;  %13547 = vmatpush3.msra.mxu1 %v15864_v19 }
 0x830   :  { %v14096_v8 = vpop.eup %14095  ;;  %13542 = vmatpush3.msra.mxu0 %v15862_v51  ;;  %13543 = vmatprep.mubr.msk.f32.mxu0 %vm14364_vm1, %v17557_v14  ;;  %v6987_v47 = vmul.f32 %v14094_v15, %v15951_v0 }
 0x831   :  { %13548 = vmatprep.mubr.msk.f32.mxu1 %vm14364_vm1, %v17557_v14  ;;  %13551 = vmatprep.subr.mxu0 %v17557_v14  ;;  %v6986_v9 = vmul.f32 %v14096_v8, %v15953_v59 }
 0x832   :  { %13556 = vmatprep.subr.mxu1 %v17557_v14  ;;  %13549 = vmatmul.mubr.msk.f32.vlgmr.msra.gmra.mxu1 %vm305_vm2, %v6987_v47 }
 0x833   :  { %13544 = vmatmul.mubr.msk.f32.vlgmr.msra.gmra.mxu0 %vm305_vm2, %v6986_v9  ;;  %13557 = vmatpush3.msra.mxu1 %v15870_v21 }
 0x834   :  { %v14098_v51 = vpop.eup %14097  ;;  %13552 = vmatpush3.msra.mxu0 %v15868_v10  ;;  %13553 = vmatprep.mubr.msk.f32.mxu0 %vm14364_vm1, %v17557_v14 }
 0x835   :  { %13561 = vmatprep.subr.mxu0 %v17557_v14  ;;  %v6988_v19 = vmul.f32 %v14098_v51, %v15959_v2  ;;  %13558 = vmatprep.mubr.msk.f32.mxu1 %vm14364_vm1, %v17557_v14 }
 0x836   :  { %13566 = vmatprep.subr.mxu1 %v17557_v14 }
 0x837   :  { %13554 = vmatmul.mubr.msk.f32.vlgmr.msra.gmra.mxu0 %vm305_vm2, %v6988_v19 }
 0x838   :  { %v14100_v0 = vpop.eup %14099  ;;  %13562 = vmatpush3.msra.mxu0 %v15872_v20  ;;  %13563 = vmatprep.mubr.msk.f32.mxu0 %vm14364_vm1, %v17557_v14 }
 0x839   :  { %v6989_v10 = vmul.f32 %v14100_v0, %v15963_v43  ;;  %13571 = vmatprep.subr.mxu0 %v17557_v14 }
 0x83b   :  { %13559 = vmatmul.mubr.msk.f32.vlgmr.msra.gmra.mxu1 %vm305_vm2, %v6989_v10 }
 0x83c   :  { %13567 = vmatpush3.xpose.msk.msra.mxu1 %vm305_vm2, %v15874_v17  ;;  %13568 = vmatprep.mubr.msk.f32.mxu1 %vm14364_vm1, %v17557_v14 }
 0x83d   :  { %13576 = vmatprep.subr.mxu1 %v17557_v14 }
 0x83f   :  { %13569 = vmatmul.mubr.msk.f32.vlgmr.msra.gmra.mxu1 %vm305_vm2, %v15878_v12 }
 0x840   :  { %13577 = vmatpush3.xpose.msk.msra.mxu1 %vm305_vm2, %v15882_v18  ;;  %13578 = vmatprep.mubr.msk.f32.mxu1 %vm14364_vm1, %v17557_v14 }
 0x841   :  { %13586 = vmatprep.subr.mxu1 %v17557_v14 }
 0x843   :  { %13579 = vmatmul.mubr.msk.f32.vlgmr.msra.gmra.mxu1 %vm305_vm2, %v15886_v63  ;;  %v8834_v63 = vpop.permute.xlu1 %8833 }
 0x844   :  { %13587 = vmatpush3.xpose.msk.msra.mxu1 %vm305_vm2, %v15890_v24  ;;  %13588 = vmatprep.mubr.msk.f32.mxu1 %vm14364_vm1, %v17557_v14  ;;  %v8754_v24 = vpop.permute.xlu0 %8753 }
 0x845   :  { %13596 = vmatprep.subr.mxu1 %v17557_v14 }
 0x847   :  { %13589 = vmatmul.mubr.msk.f32.vlgmr.msra.gmra.mxu1 %vm305_vm2, %v16006_v31 }
 0x848   :  { %13597 = vmatpush3.xpose.msk.msra.mxu1 %vm305_vm2, %v16010_v4  ;;  %13598 = vmatprep.mubr.msk.f32.mxu1 %vm14364_vm1, %v17557_v14  ;;  %v8912_v21 = vpop.permute.xlu0 %8911 }
 0x849   :  { %13606 = vmatprep.subr.mxu1 %v17557_v14 }
 0x84b   :  { %13599 = vmatmul.mubr.msk.f32.vlgmr.msra.gmra.mxu1 %vm305_vm2, %v16014_v1 }
 0x84c   :  { %13607 = vmatpush3.xpose.msk.msra.mxu1 %vm305_vm2, %v8834_v63  ;;  %13608 = vmatprep.mubr.msk.f32.mxu1 %vm14364_vm1, %v17557_v14  ;;  %v8910_v17 = vpop.permute.xlu0 %8909 }
 0x84d   :  { %13616 = vmatprep.subr.mxu1 %v17557_v14 }
 0x850   :  { %v9068_v4 = vpop.permute.xlu0 %9067 }
 0x856   :  { %v6958_v18 = vpop.xlane.xlu1 %6957 }
 0x857   :  { %14101 = vrcp.f32 %v6958_v18 }
 0x85a   :  { %v8832_v12 = vpop.permute.xlu1 %8831 }
 0x85b   :  { %13609 = vmatmul.mubr.msk.f32.vlgmr.msra.gmra.mxu1 %vm305_vm2, %v8832_v12 }
 0x85c   :  { %13618 = vmatprep.mubr.msk.f32.mxu1 %vm14364_vm1, %v17557_v14 }
 0x85e   :  { %v8990_v20 = vpop.permute.xlu1 %8989 }
 0x85f   :  { %13617 = vmatpush3.xpose.msk.msra.mxu1 %vm305_vm2, %v8990_v20 }
 0x860   :  { %13626 = vmatprep.subr.mxu1 %v17557_v14 }
 0x862   :  { %v8988_v59 = vpop.permute.xlu1 %8987 }
 0x863   :  { %13619 = vmatmul.mubr.msk.f32.vlgmr.msra.gmra.mxu1 %vm305_vm2, %v8988_v59 }
 0x864   :  { %v14102_v2 = vpop.eup %14101  ;;  %13628 = vmatprep.mubr.msk.f32.mxu1 %vm14364_vm1, %v17557_v14 }
 0x865   :  { %v6990_v43 = vmul.f32 %v14102_v2, %v15980_v45 }
 0x866   :  { %v9146_v31 = vpop.permute.xlu1 %9145 }
 0x867   :  { %13564 = vmatmul.mubr.msk.f32.vlgmr.msra.gmra.mxu0 %vm305_vm2, %v6990_v43  ;;  %13627 = vmatpush3.xpose.msk.msra.mxu1 %vm305_vm2, %v9146_v31 }
 0x868   :  { %13572 = vmatpush3.xpose.msk.msra.mxu0 %vm305_vm2, %v15876_v6  ;;  %13573 = vmatprep.mubr.msk.f32.mxu0 %vm14364_vm1, %v17557_v14  ;;  %v9066_v6 = vpop.permute.xlu0 %9065 }
 0x869   :  { %13581 = vmatprep.subr.mxu0 %v17557_v14  ;;  %13636 = vmatprep.subr.mxu1 %v17557_v14 }
 0x86a   :  { %v9144_v1 = vpop.permute.xlu1 %9143 }
 0x86b   :  { %13574 = vmatmul.mubr.msk.f32.vlgmr.msra.gmra.mxu0 %vm305_vm2, %v15880_v11  ;;  %13629 = vmatmul.mubr.msk.f32.vlgmr.msra.gmra.mxu1 %vm305_vm2, %v9144_v1 }
 0x86c   :  { %13582 = vmatpush3.xpose.msk.msra.mxu0 %vm305_vm2, %v15884_v61  ;;  %13583 = vmatprep.mubr.msk.f32.mxu0 %vm14364_vm1, %v17557_v14  ;;  %v9224_v11 = vpop.permute.xlu0 %9223 }
 0x86d   :  { %13591 = vmatprep.subr.mxu0 %v17557_v14  ;;  %13638 = vmatprep.mubr.msk.f32.mxu1 %vm14364_vm1, %v17557_v14 }
 0x86e   :  { %v9302_v45 = vpop.permute.xlu1 %9301 }
 0x86f   :  { %13584 = vmatmul.mubr.msk.f32.vlgmr.msra.gmra.mxu0 %vm305_vm2, %v15888_v5  ;;  %13637 = vmatpush3.xpose.msk.msra.mxu1 %vm305_vm2, %v9302_v45 }
 0x870   :  { %13592 = vmatpush3.xpose.msk.msra.mxu0 %vm305_vm2, %v16008_v41  ;;  %13593 = vmatprep.mubr.msk.f32.mxu0 %vm14364_vm1, %v17557_v14  ;;  %v9222_v5 = vpop.permute.xlu0 %9221 }
 0x871   :  { %13601 = vmatprep.subr.mxu0 %v17557_v14  ;;  %13646 = vmatprep.subr.mxu1 %v17557_v14 }
 0x872   :  { %v9300_v61 = vpop.permute.xlu1 %9299 }
 0x873   :  { %13594 = vmatmul.mubr.msk.f32.vlgmr.msra.gmra.mxu0 %vm305_vm2, %v16012_v37  ;;  %13639 = vmatmul.mubr.msk.f32.vlgmr.msra.gmra.mxu1 %vm305_vm2, %v9300_v61 }
 0x874   :  { %13602 = vmatpush3.xpose.msk.msra.mxu0 %vm305_vm2, %v16016_v16  ;;  %13603 = vmatprep.mubr.msk.f32.mxu0 %vm14364_vm1, %v17557_v14  ;;  %v9380_v41 = vpop.permute.xlu0 %9379 }
 0x875   :  { %13611 = vmatprep.subr.mxu0 %v17557_v14  ;;  %13648 = vmatprep.mubr.msk.f32.mxu1 %vm14364_vm1, %v17557_v14 }
 0x877   :  { %13604 = vmatmul.mubr.msk.f32.vlgmr.msra.gmra.mxu0 %vm305_vm2, %v8754_v24 }
 0x878   :  { %13612 = vmatpush3.xpose.msk.msra.mxu0 %vm305_vm2, %v8912_v21  ;;  %13613 = vmatprep.mubr.msk.f32.mxu0 %vm14364_vm1, %v17557_v14  ;;  %v9378_v37 = vpop.permute.xlu0 %9377 }
 0x879   :  { %13621 = vmatprep.subr.mxu0 %v17557_v14 }
 0x87b   :  { %13614 = vmatmul.mubr.msk.f32.vlgmr.msra.gmra.mxu0 %vm305_vm2, %v8910_v17 }
 0x87c   :  { %13622 = vmatpush3.xpose.msk.msra.mxu0 %vm305_vm2, %v9068_v4  ;;  %13623 = vmatprep.mubr.msk.f32.mxu0 %vm14364_vm1, %v17557_v14 }
 0x87d   :  { %13631 = vmatprep.subr.mxu0 %v17557_v14 }
 0x87f   :  { %13624 = vmatmul.mubr.msk.f32.vlgmr.msra.gmra.mxu0 %vm305_vm2, %v9066_v6 }
 0x880   :  { %13632 = vmatpush3.xpose.msk.msra.mxu0 %vm305_vm2, %v9224_v11  ;;  %13633 = vmatprep.mubr.msk.f32.mxu0 %vm14364_vm1, %v17557_v14 }
 0x881   :  { %13641 = vmatprep.subr.mxu0 %v17557_v14 }
 0x883   :  { %13634 = vmatmul.mubr.msk.f32.vlgmr.msra.gmra.mxu0 %vm305_vm2, %v9222_v5 }
 0x884   :  { %13642 = vmatpush3.xpose.msk.msra.mxu0 %vm305_vm2, %v9380_v41  ;;  %13643 = vmatprep.mubr.msk.f32.mxu0 %vm14364_vm1, %v17557_v14 }
 0x885   :  { %13651 = vmatprep.subr.mxu0 %v17557_v14 }
 0x887   :  { %13644 = vmatmul.mubr.msk.f32.vlgmr.msra.gmra.mxu0 %vm305_vm2, %v9378_v37 }
 0x888   :  { %13653 = vmatprep.mubr.msk.f32.mxu0 %vm14364_vm1, %v17557_v14 }
 0x8da   :  { %v16205_v16 = vpop.f32.mrf.mxu1 }
 0x8db   :  { %v16207_v23 = vpop.f32.mrf.mxu0 }
 0x8dc   :  { %v13490_v27 = vpop.f32.mrf.mxu1 }
 0x8dd   :  { %v13495_v3 = vpop.f32.mrf.mxu0 }
 0x8de   :  { %v16209_v55 = vpop.f32.mrf.mxu1 }
 0x8e0   :  { %v13500_v58 = vpop.f32.mrf.mxu1 }
 0x8e2   :  { %v16211_v36 = vpop.f32.mrf.mxu1 }
 0x8e3   :  { %v16213_v28 = vpop.f32.mrf.mxu0 }
 0x8e4   :  { %v13510_v48 = vpop.f32.mrf.mxu1 }
 0x8e5   :  { %v13505_v56 = vpop.f32.mrf.mxu0 }
 0x8e6   :  { %v16215_v57 = vpop.f32.mrf.mxu1 }
 0x8e7   :  { %v16217_v13 = vpop.f32.mrf.mxu0 }
 0x8e8   :  { %v13520_v49 = vpop.f32.mrf.mxu1 }
 0x8e9   :  { %v13515_v30 = vpop.f32.mrf.mxu0 }
 0x8ea   :  { %v16219_v39 = vpop.f32.mrf.mxu1 }
 0x8eb   :  { %v16221_v26 = vpop.f32.mrf.mxu0 }
 0x8ec   :  { %v13530_v60 = vpop.f32.mrf.mxu1 }
 0x8ed   :  { %v13525_v22 = vpop.f32.mrf.mxu0 }
 0x8ee   :  { %v16223_v33 = vpop.f32.mrf.mxu1 }
 0x8ef   :  { %v16225_v40 = vpop.f32.mrf.mxu0 }
 0x8f0   :  { %v13540_v62 = vpop.f32.mrf.mxu1 }
 0x8f1   :  { %v13535_v34 = vpop.f32.mrf.mxu0 }
 0x8f2   :  { %v16227_v32 = vpop.f32.mrf.mxu1 }
 0x8f3   :  { %v16229_v35 = vpop.f32.mrf.mxu0 }
 0x8f4   :  { %v13550_v38 = vpop.f32.mrf.mxu1 }
 0x8f5   :  { %v13545_v29 = vpop.f32.mrf.mxu0 }
 0x8f7   :  { %v16231_v7 = vpop.f32.mrf.mxu0 }
 0x8f9   :  { %v13555_v25 = vpop.f32.mrf.mxu0 }
 0x8fb   :  { %v16233_v53 = vpop.f32.mrf.mxu1 }
 0x8fd   :  { %v13560_v15 = vpop.f32.mrf.mxu1 }
 0x8ff   :  { %v16235_v8 = vpop.f32.mrf.mxu1 }
 0x900   :  { %v9455_v47 = vsel %vm305_vm2, %v16235_v8, -inf }
 0x901   :  { %9456 = vmax.xlane.f32.xlu1 %v9455_v47  ;;  %v13570_v9 = vpop.f32.mrf.mxu1 }
 0x903   :  { %v16239_v51 = vpop.f32.mrf.mxu1 }
 0x904   :  { %v9461_v61 = vsel %vm305_vm2, %v16239_v51, -inf }
 0x905   :  { %v13580_v19 = vpop.f32.mrf.mxu1 }
 0x907   :  { %v16241_v0 = vpop.f32.mrf.mxu1 }
 0x908   :  { %v9467_v27 = vsel %vm305_vm2, %v16241_v0, -inf }
 0x909   :  { %v13590_v10 = vpop.f32.mrf.mxu1 }
 0x90b   :  { %v16243_v63 = vpop.f32.mrf.mxu1 }
 0x90c   :  { %v9473_v56 = vsel %vm305_vm2, %v16243_v63, -inf }
 0x90d   :  { %v13600_v24 = vpop.f32.mrf.mxu1 }
 0x91b   :  { %v16245_v18 = vpop.f32.mrf.mxu1 }
 0x91c   :  { %v9479_v22 = vsel %vm305_vm2, %v16245_v18, -inf }
 0x91d   :  { %v13610_v12 = vpop.f32.mrf.mxu1 }
 0x923   :  { %v16247_v21 = vpop.f32.mrf.mxu1 }
 0x924   :  { %v9485_v29 = vsel %vm305_vm2, %v16247_v21, -inf }
 0x925   :  { %v13620_v20 = vpop.f32.mrf.mxu1 }
 0x927   :  { %v16249_v17 = vpop.f32.mrf.mxu0 }
 0x929   :  { %v13565_v59 = vpop.f32.mrf.mxu0 }
 0x92a   :  { %v17615_v59 = vld [vmem:[#allocation17_spill] sm:$0xff] }
 0x92b   :  { %v16251_v2 = vpop.f32.mrf.mxu0  ;;  %v16253_v43 = vpop.f32.mrf.mxu1 }
 0x92c   :  { %v9458_v31 = vsel %vm305_vm2, %v16251_v2, -inf  ;;  %v9491_v9 = vsel %vm305_vm2, %v16253_v43, -inf }
 0x92d   :  { %9459 = vmax.xlane.f32.xlu0 %v9458_v31  ;;  %v13575_v4 = vpop.f32.mrf.mxu0  ;;  %v13630_v1 = vpop.f32.mrf.mxu1  ;;  %v17616_v31 = vld [vmem:[#allocation18_spill] sm:$0xff] }
 0x92e   :  { %v17617_v4 = vld [vmem:[#allocation19_spill] sm:$0xff]  ;;  %v17618_v1 = vld [vmem:[#allocation16_spill] sm:$0xff] }
 0x92f   :  { %v16257_v6 = vpop.f32.mrf.mxu0 }
 0x930   :  { %v9464_v45 = vsel %vm305_vm2, %v16257_v6, -inf }
 0x931   :  { %v13585_v11 = vpop.f32.mrf.mxu0  ;;  %9465 = vmax.xlane.f32.xlu1 %v9464_v45  ;;  %9462 = vmax.xlane.f32.xlu0 %v9461_v61  ;;  %v17619_v45 = vld [vmem:[#allocation20_spill] sm:$0xff]  ;;  %v17620_v61 = vld [vmem:[#allocation21_spill] sm:$0xff] }
 0x932   :  { %v17621_v11 = vld [vmem:[#allocation22_spill] sm:$0xff] }
 0x933   :  { %v16263_v5 = vpop.f32.mrf.mxu0  ;;  %v16265_v41 = vpop.f32.mrf.mxu1 }
 0x934   :  { %v9470_v37 = vsel %vm305_vm2, %v16263_v5, -inf  ;;  %v9497_v12 = vsel %vm305_vm2, %v16265_v41, -inf }
 0x935   :  { %v13595_v3 = vpop.f32.mrf.mxu0  ;;  %9471 = vmax.xlane.f32.xlu1 %v9470_v37  ;;  %9468 = vmax.xlane.f32.xlu0 %v9467_v27  ;;  %v13640_v58 = vpop.f32.mrf.mxu1 }
 0x937   :  { %v16271_v48 = vpop.f32.mrf.mxu0 }
 0x938   :  { %v9476_v49 = vsel %vm305_vm2, %v16271_v48, -inf }
 0x939   :  { %9474 = vmax.xlane.f32.xlu0 %v9473_v56  ;;  %9477 = vmax.xlane.f32.xlu1 %v9476_v49  ;;  %v13605_v30 = vpop.f32.mrf.mxu0 }
 0x93b   :  { %v16277_v60 = vpop.f32.mrf.mxu0 }
 0x93c   :  { %v9482_v62 = vsel %vm305_vm2, %v16277_v60, -inf }
 0x93d   :  { %9480 = vmax.xlane.f32.xlu0 %v9479_v22  ;;  %9483 = vmax.xlane.f32.xlu1 %v9482_v62  ;;  %v13615_v34 = vpop.f32.mrf.mxu0 }
 0x93f   :  { %v16283_v38 = vpop.f32.mrf.mxu0 }
 0x940   :  { %v9488_v25 = vsel %vm305_vm2, %v16283_v38, -inf }
 0x941   :  { %9486 = vmax.xlane.f32.xlu0 %v9485_v29  ;;  %9489 = vmax.xlane.f32.xlu1 %v9488_v25  ;;  %v13625_v15 = vpop.f32.mrf.mxu0 }
 0x943   :  { %v16289_v47 = vpop.f32.mrf.mxu0 }
 0x944   :  { %v9494_v19 = vsel %vm305_vm2, %v16289_v47, -inf }
 0x945   :  { %9492 = vmax.xlane.f32.xlu0 %v9491_v9  ;;  %9495 = vmax.xlane.f32.xlu1 %v9494_v19  ;;  %v13635_v10 = vpop.f32.mrf.mxu0 }
 0x947   :  { %v16295_v24 = vpop.f32.mrf.mxu0 }
 0x948   :  { %v9500_v58 = vsel %vm305_vm2, %v16295_v24, -inf }
 0x949   :  { %9498 = vmax.xlane.f32.xlu0 %v9497_v12  ;;  %v13645_v20 = vpop.f32.mrf.mxu0 }
 0x956   :  { %9707 = vrot.lane.b32.xlu1 %v17615_v59, %s14375_s19 }
 0x95a   :  { %9783 = vrot.lane.b32.xlu1 %v17616_v31, %s14375_s19 }
 0x95e   :  { %9859 = vrot.lane.b32.xlu1 %v17617_v4, %s14375_s19 }
 0x95f   :  { %9631 = vrot.lane.b32.xlu0 %v17618_v1, %s14375_s19 }
 0x962   :  { %9935 = vrot.lane.b32.xlu1 %v17619_v45, %s14375_s19 }
 0x966   :  { %10011 = vrot.lane.b32.xlu1 %v17620_v61, %s14375_s19 }
 0x96a   :  { %10087 = vrot.lane.b32.xlu1 %v17621_v11, %s14375_s19 }
 0x96e   :  { %10163 = vrot.lane.b32.xlu1 %v14554_v42, %s14375_s19 }
 0x972   :  { %10239 = vrot.lane.b32.xlu1 %v14560_v44, %s14375_s19 }
 0x98a   :  { %v9457_v37 = vpop.xlane.xlu1 %9456 }
 0x98b   :  { %v9503_v27 = vsub.f32 %v16235_v8, %v9457_v37 }
 0x98d   :  { %v9519_v3 = vmul.f32 1.442695, %v9503_v27 }
 0x98f   :  { %14103 = vpow2.f32 %v9519_v3 }
 0x996   :  { %9501 = vmax.xlane.f32.xlu1 %v9500_v58 }
 0x99c   :  { %v16320_v56 = vpop.eup %14103 }
 0x99d   :  { %v9551_v49 = vsel %vm305_vm2, %v16320_v56, 0.0 }
 0x99e   :  { %9552 = vadd.xlane.f32.xlu0 %v9551_v49 }
 0x9a7   :  { %10315 = vrot.lane.b32.xlu1 %v14562_v46, %s14375_s19 }
 0x9b6   :  { %v9460_v42 = vpop.xlane.xlu0 %9459 }
 0x9b7   :  { %v9504_v44 = vsub.f32 %v16251_v2, %v9460_v42 }
 0x9b9   :  { %v9521_v30 = vmul.f32 1.442695, %v9504_v44 }
 0x9ba   :  { %v9466_v8 = vpop.xlane.xlu1 %9465  ;;  %v9463_v22 = vpop.xlane.xlu0 %9462 }
 0x9bb   :  { %14105 = vpow2.f32 %v9521_v30  ;;  %v9506_v62 = vsub.f32 %v16257_v6, %v9466_v8  ;;  %v9505_v34 = vsub.f32 %v16239_v51, %v9463_v22 }
 0x9bd   :  { %v9525_v29 = vmul.f32 1.442695, %v9506_v62  ;;  %v9523_v25 = vmul.f32 1.442695, %v9505_v34 }
 0x9be   :  { %v9472_v15 = vpop.xlane.xlu1 %9471  ;;  %v9469_v9 = vpop.xlane.xlu0 %9468 }
 0x9bf   :  { %14107 = vpow2.f32 %v9525_v29  ;;  %v9508_v19 = vsub.f32 %v16263_v5, %v9472_v15  ;;  %v9507_v46 = vsub.f32 %v16241_v0, %v9469_v9 }
 0x9c0   :  { %14109 = vpow2.f32 %v9523_v25 }
 0x9c1   :  { %v9529_v10 = vmul.f32 1.442695, %v9508_v19  ;;  %v9527_v2 = vmul.f32 1.442695, %v9507_v46 }
 0x9c2   :  { %v9478_v12 = vpop.xlane.xlu1 %9477  ;;  %v9475_v20 = vpop.xlane.xlu0 %9474 }
 0x9c3   :  { %14111 = vpow2.f32 %v9529_v10  ;;  %v9510_v59 = vsub.f32 %v16271_v48, %v9478_v12  ;;  %v9509_v6 = vsub.f32 %v16243_v63, %v9475_v20 }
 0x9c4   :  { %14113 = vpow2.f32 %v9527_v2 }
 0x9c5   :  { %v9533_v51 = vmul.f32 1.442695, %v9510_v59  ;;  %v9531_v31 = vmul.f32 1.442695, %v9509_v6 }
 0x9c6   :  { %v9484_v4 = vpop.xlane.xlu1 %9483  ;;  %v9481_v1 = vpop.xlane.xlu0 %9480 }
 0x9c7   :  { %14115 = vpow2.f32 %v9533_v51  ;;  %v9512_v5 = vsub.f32 %v16277_v60, %v9484_v4  ;;  %v9511_v0 = vsub.f32 %v16245_v18, %v9481_v1 }
 0x9c8   :  { %v16335_v45 = vpop.eup %14105  ;;  %14117 = vpow2.f32 %v9531_v31 }
 0x9c9   :  { %v9537_v61 = vmul.f32 1.442695, %v9512_v5  ;;  %v9535_v11 = vmul.f32 1.442695, %v9511_v0  ;;  %v9554_v48 = vsel %vm305_vm2, %v16335_v45, 0.0 }
 0x9ca   :  { %v9490_v37 = vpop.xlane.xlu1 %9489  ;;  %v9487_v63 = vpop.xlane.xlu0 %9486 }
 0x9cb   :  { %14119 = vpow2.f32 %v9537_v61  ;;  %v9514_v27 = vsub.f32 %v16283_v38, %v9490_v37  ;;  %v9513_v3 = vsub.f32 %v16247_v21, %v9487_v63  ;;  %9555 = vadd.xlane.f32.xlu1 %v9554_v48 }
 0x9cc   :  { %v16341_v58 = vpop.eup %14107  ;;  %14121 = vpow2.f32 %v9535_v11 }
 0x9cd   :  { %v16343_v18 = vpop.eup %14109  ;;  %v9541_v60 = vmul.f32 1.442695, %v9514_v27  ;;  %v9539_v49 = vmul.f32 1.442695, %v9513_v3  ;;  %v9560_v42 = vsel %vm305_vm2, %v16341_v58, 0.0 }
 0x9ce   :  { %v9496_v44 = vpop.xlane.xlu1 %9495  ;;  %v9557_v30 = vsel %vm305_vm2, %v16343_v18, 0.0  ;;  %v9493_v8 = vpop.xlane.xlu0 %9492 }
 0x9cf   :  { %14123 = vpow2.f32 %v9541_v60  ;;  %v9516_v38 = vsub.f32 %v16289_v47, %v9496_v44  ;;  %9558 = vadd.xlane.f32.xlu0 %v9557_v30  ;;  %v9515_v21 = vsub.f32 %v16253_v43, %v9493_v8  ;;  %9561 = vadd.xlane.f32.xlu1 %v9560_v42  ;;  %v17623_v44 = vld [vmem:[#allocation25_spill] sm:$0xff] }
 0x9d0   :  { %v16351_v22 = vpop.eup %14111  ;;  %14125 = vpow2.f32 %v9539_v49  ;;  %v17622_v49 = vld [vmem:[#allocation24_spill] sm:$0xff] }
 0x9d1   :  { %v16353_v62 = vpop.eup %14113  ;;  %v9545_v34 = vmul.f32 1.442695, %v9516_v38  ;;  %v9543_v29 = vmul.f32 1.442695, %v9515_v21  ;;  %v9566_v25 = vsel %vm305_vm2, %v16351_v22, 0.0  ;;  %v17626_v38 = vld [vmem:[#allocation44_spill] sm:$0xff] }
 0x9d2   :  { %v9708_v15 = vpop.permute.xlu1 %9707  ;;  %v9563_v9 = vsel %vm305_vm2, %v16353_v62, 0.0  ;;  %v9499_v19 = vpop.xlane.xlu0 %9498 }
 0x9d3   :  { %14127 = vpow2.f32 %v9545_v34  ;;  %9564 = vadd.xlane.f32.xlu0 %v9563_v9  ;;  %v9517_v43 = vsub.f32 %v16265_v41, %v9499_v19  ;;  %13652 = vmatpush3.msra.mxu0 %v9708_v15  ;;  %v17629_v9 = vld [vmem:[#allocation53_spill] sm:$0xff] }
 0x9d4   :  { %v16360_v47 = vpop.eup %14115  ;;  %14129 = vpow2.f32 %v9543_v29  ;;  %9567 = vadd.xlane.f32.xlu1 %v9566_v25  ;;  %13661 = vmatprep.subr.mxu0 %v17557_v14  ;;  %v17627_v29 = vld [vmem:[#allocation45_spill] sm:$0xff] }
 0x9d5   :  { %v16363_v46 = vpop.eup %14117  ;;  %v9547_v10 = vmul.f32 1.442695, %v9517_v43  ;;  %v9572_v2 = vsel %vm305_vm2, %v16360_v47, 0.0 }
 0x9d6   :  { %v9569_v12 = vsel %vm305_vm2, %v16363_v46, 0.0  ;;  %v9632_v20 = vpop.permute.xlu0 %9631  ;;  %v9784_v27 = vpop.permute.xlu1 %9783 }
 0x9d7   :  { %14131 = vpow2.f32 %v9547_v10  ;;  %9570 = vadd.xlane.f32.xlu0 %v9569_v12  ;;  %13647 = vmatpush3.msra.mxu1 %v9632_v20 }
 0x9d8   :  { %v16369_v41 = vpop.eup %14119  ;;  %9573 = vadd.xlane.f32.xlu1 %v9572_v2  ;;  %13656 = vmatprep.subr.mxu1 %v17557_v14 }
 0x9d9   :  { %v16372_v59 = vpop.eup %14121  ;;  %v9578_v6 = vsel %vm305_vm2, %v16369_v41, 0.0 }
 0x9da   :  { %v9575_v51 = vsel %vm305_vm2, %v16372_v59, 0.0  ;;  %v16400_v3 = vpop.permute.xlu1 %9859 }
 0x9db   :  { %9576 = vadd.xlane.f32.xlu0 %v9575_v51 }
 0x9dc   :  { %v16378_v31 = vpop.eup %14123  ;;  %9579 = vadd.xlane.f32.xlu1 %v9578_v6  ;;  %v17635_v6 = vld [vmem:[#allocation48_spill] sm:$0xff] }
 0x9dd   :  { %v16380_v4 = vpop.eup %14125  ;;  %v9584_v1 = vsel %vm305_vm2, %v16378_v31, 0.0 }
 0x9de   :  { %v9581_v5 = vsel %vm305_vm2, %v16380_v4, 0.0  ;;  %v16406_v60 = vpop.permute.xlu1 %9935 }
 0x9df   :  { %9582 = vadd.xlane.f32.xlu0 %v9581_v5 }
 0x9e0   :  { %v16386_v0 = vpop.eup %14127  ;;  %9585 = vadd.xlane.f32.xlu1 %v9584_v1 }
 0x9e1   :  { %v16388_v61 = vpop.eup %14129  ;;  %v9590_v11 = vsel %vm305_vm2, %v16386_v0, 0.0 }
 0x9e2   :  { %v9587_v48 = vsel %vm305_vm2, %v16388_v61, 0.0  ;;  %v16410_v42 = vpop.permute.xlu1 %10011 }
 0x9e3   :  { %9588 = vadd.xlane.f32.xlu0 %v9587_v48  ;;  %v17636_v48 = vld [vmem:[#allocation49_spill] sm:$0xff] }
 0x9e4   :  { %v16394_v37 = vpop.eup %14131  ;;  %9591 = vadd.xlane.f32.xlu1 %v9590_v11 }
 0x9e5   :  { %v9593_v63 = vsel %vm305_vm2, %v16394_v37, 0.0 }
 0x9e6   :  { %v16416_v30 = vpop.permute.xlu1 %10087 }
 0x9e8   :  { %9594 = vadd.xlane.f32.xlu1 %v9593_v63 }
 0x9f9   :  { %10467 = vrot.lane.b32.xlu1 %v14570_v50, %s14375_s19  ;;  %v17624_v50 = vld [vmem:[#allocation46_spill] sm:$0xff] }
 0x9fd   :  { %10543 = vrot.lane.b32.xlu1 %v14576_v52, %s14375_s19  ;;  %v16420_v52 = vpop.permute.xlu1 %10163 }
 0xa01   :  { %10619 = vrot.lane.b32.xlu1 %v14578_v54, %s14375_s19  ;;  %v17625_v54 = vld [vmem:[#allocation47_spill] sm:$0xff]  ;;  %v16426_v8 = vpop.permute.xlu1 %10239 }
 0xa05   :  { %10695 = vrot.lane.b32.xlu1 %v17622_v49, %s14375_s19 }
 0xa09   :  { %10771 = vrot.lane.b32.xlu1 %v17623_v44, %s14375_s19 }
 0xa0d   :  { %10865 = vrot.lane.b32.xlu1 %v17624_v50, %s14360_s30 }
 0xa11   :  { %10929 = vrot.lane.b32.xlu1 %v16207_v23, %s14376_s20 }
 0xa15   :  { %10869 = vrot.lane.b32.xlu1 %v17625_v54, %s14360_s30 }
 0xa19   :  { %10933 = vrot.lane.b32.xlu1 %v16213_v28, %s14376_s20  ;;  %v17628_v28 = vld [vmem:[#allocation51_spill] sm:$0xff] }
 0xa1d   :  { %10873 = vrot.lane.b32.xlu1 %v17626_v38, %s14360_s30 }
 0xa1f   :  { %v9502_v21 = vpop.xlane.xlu1 %9501 }
 0xa20   :  { %v9518_v34 = vsub.f32 %v16295_v24, %v9502_v21 }
 0xa21   :  { %10937 = vrot.lane.b32.xlu1 %v16217_v13, %s14376_s20 }
 0xa22   :  { %v9549_v23 = vmul.f32 1.442695, %v9518_v34 }
 0xa23   :  { %v16466_v43 = vpop.permute.xlu1 %10315 }
 0xa24   :  { %14133 = vpow2.f32 %v9549_v23  ;;  %v17639_v23 = vld [vmem:[#allocation54_spill] sm:$0xff] }
 0xa25   :  { %10877 = vrot.lane.b32.xlu1 %v17627_v29, %s14360_s30 }
 0xa27   :  { %v9553_v25 = vpop.xlane.xlu0 %9552 }
 0xa28   :  { %14135 = vrcp.f32 %v9553_v25 }
 0xa29   :  { %10941 = vrot.lane.b32.xlu1 %v16221_v26, %s14376_s20  ;;  %v17630_v26 = vld [vmem:[#allocation55_spill] sm:$0xff] }
 0xa2d   :  { %10881 = vrot.lane.b32.xlu1 %v17628_v28, %s14360_s30 }
 0xa31   :  { %v16439_v15 = vpop.eup %14133  ;;  %10945 = vrot.lane.b32.xlu1 %v16225_v40, %s14376_s20  ;;  %v17631_v40 = vld [vmem:[#allocation57_spill] sm:$0xff] }
 0xa32   :  { %v9596_v13 = vsel %vm305_vm2, %v16439_v15, 0.0 }
 0xa33   :  { %9597 = vadd.xlane.f32.xlu0 %v9596_v13 }
 0xa35   :  { %v14136_v24 = vpop.eup %14135  ;;  %10885 = vrot.lane.b32.xlu1 %v17629_v9, %s14360_s30 }
 0xa36   :  { %v9615_v19 = vmul.f32 %v14136_v24, %v16320_v56  ;;  %v17632_v56 = vld [vmem:[#allocation23_spill] sm:$0xff] }
 0xa38   :  { %13649 = vmatmul.mubr.msk.f32.vlgmr.msra.gmra.mxu1 %vm305_vm2, %v9615_v19 }
 0xa39   :  { %13657 = vmatpush3.msra.mxu1 %v9784_v27  ;;  %10949 = vrot.lane.b32.xlu1 %v16229_v35, %s14376_s20  ;;  %v17633_v35 = vld [vmem:[#allocation42_spill] sm:$0xff] }
 0xa3a   :  { %13658 = vmatprep.mubr.msk.f32.mxu1 %vm14364_vm1, %v17557_v14  ;;  %13666 = vmatprep.subr.mxu1 %v17557_v14 }
 0xa3d   :  { %10889 = vrot.lane.b32.xlu1 %v17630_v26, %s14360_s30 }
 0xa41   :  { %10953 = vrot.lane.b32.xlu1 %v16231_v7, %s14376_s20  ;;  %v17634_v7 = vld [vmem:[#allocation43_spill] sm:$0xff] }
 0xa45   :  { %10893 = vrot.lane.b32.xlu1 %v17631_v40, %s14360_s30 }
 0xa49   :  { %10957 = vrot.lane.b32.xlu1 %v16249_v17, %s14376_s20  ;;  %10391 = vrot.lane.b32.xlu0 %v17632_v56, %s14375_s19 }
 0xa4d   :  { %10863 = vrot.lane.b32.xlu0 %v17633_v35, %s14360_s30 }
 0xa51   :  { %10927 = vrot.lane.b32.xlu0 %v16205_v16, %s14376_s20 }
 0xa54   :  { %v9556_v10 = vpop.xlane.xlu1 %9555 }
 0xa55   :  { %14137 = vrcp.f32 %v9556_v10  ;;  %10867 = vrot.lane.b32.xlu0 %v17634_v7, %s14360_s30  ;;  %v17641_v10 = vld [vmem:[#allocation35_spill] sm:$0xff] }
 0xa58   :  { %v9559_v2 = vpop.xlane.xlu0 %9558  ;;  %v9562_v12 = vpop.xlane.xlu1 %9561 }
 0xa59   :  { %14139 = vrcp.f32 %v9559_v2  ;;  %10931 = vrot.lane.b32.xlu0 %v16209_v55, %s14376_s20 }
 0xa5a   :  { %14141 = vrcp.f32 %v9562_v12 }
 0xa5c   :  { %v9565_v17 = vpop.xlane.xlu0 %9564 }
 0xa5d   :  { %14143 = vrcp.f32 %v9565_v17  ;;  %v9568_v20 = vpop.xlane.xlu1 %9567  ;;  %10871 = vrot.lane.b32.xlu0 %v17635_v6, %s14360_s30 }
 0xa5e   :  { %14145 = vrcp.f32 %v9568_v20 }
 0xa60   :  { %v9571_v16 = vpop.xlane.xlu0 %9570 }
 0xa61   :  { %14147 = vrcp.f32 %v9571_v16  ;;  %v9574_v51 = vpop.xlane.xlu1 %9573  ;;  %10935 = vrot.lane.b32.xlu0 %v16211_v36, %s14376_s20  ;;  %v17642_v16 = vld [vmem:[#allocation36_spill] sm:$0xff] }
 0xa62   :  { %v14138_v1 = vpop.eup %14137  ;;  %14149 = vrcp.f32 %v9574_v51 }
 0xa63   :  { %v9616_v5 = vmul.f32 %v14138_v1, %v16335_v45 }
 0xa64   :  { %v9577_v11 = vpop.xlane.xlu0 %9576 }
 0xa65   :  { %14151 = vrcp.f32 %v9577_v11  ;;  %v9580_v55 = vpop.xlane.xlu1 %9579  ;;  %13654 = vmatmul.mubr.msk.f32.vlgmr.msra.gmra.mxu0 %vm305_vm2, %v9616_v5  ;;  %10875 = vrot.lane.b32.xlu0 %v17636_v48, %s14360_s30 }
 0xa66   :  { %v14140_v63 = vpop.eup %14139  ;;  %14153 = vrcp.f32 %v9580_v55  ;;  %13662 = vmatpush3.msra.mxu0 %v16400_v3  ;;  %13663 = vmatprep.mubr.msk.f32.mxu0 %vm14364_vm1, %v17557_v14 }
 0xa67   :  { %v14142_v36 = vpop.eup %14141  ;;  %v9617_v27 = vmul.f32 %v14140_v63, %v16343_v18  ;;  %13671 = vmatprep.subr.mxu0 %v17557_v14 }
 0xa68   :  { %v9618_v45 = vmul.f32 %v14142_v36, %v16341_v58  ;;  %v9583_v56 = vpop.xlane.xlu0 %9582 }
 0xa69   :  { %v9586_v49 = vpop.xlane.xlu1 %9585  ;;  %13659 = vmatmul.mubr.msk.f32.vlgmr.msra.gmra.mxu1 %vm305_vm2, %v9617_v27  ;;  %10939 = vrot.lane.b32.xlu0 %v16215_v57, %s14376_s20 }
 0xa6a   :  { %v14144_v44 = vpop.eup %14143  ;;  %14155 = vrcp.f32 %v9586_v49  ;;  %13667 = vmatpush3.msra.mxu1 %v16406_v60  ;;  %13664 = vmatmul.mubr.msk.f32.vlgmr.msra.gmra.mxu0 %vm305_vm2, %v9618_v45 }
 0xa6b   :  { %v14146_v3 = vpop.eup %14145  ;;  %v9619_v50 = vmul.f32 %v14144_v44, %v16353_v62  ;;  %13672 = vmatpush3.msra.mxu0 %v16410_v42  ;;  %13668 = vmatprep.mubr.msk.f32.mxu1 %vm14364_vm1, %v17557_v14 }
 0xa6c   :  { %v9620_v58 = vmul.f32 %v14146_v3, %v16351_v22  ;;  %13676 = vmatprep.subr.mxu1 %v17557_v14  ;;  %13673 = vmatprep.mubr.msk.f32.mxu0 %vm14364_vm1, %v17557_v14  ;;  %v17637_v22 = vld [vmem:[#allocation50_spill] sm:$0xff] }
 0xa6d   :  { %13681 = vmatprep.subr.mxu0 %v17557_v14  ;;  %v9592_v57 = vpop.xlane.xlu1 %9591  ;;  %13669 = vmatmul.mubr.msk.f32.vlgmr.msra.gmra.mxu1 %vm305_vm2, %v9619_v50 }
 0xa6e   :  { %v14148_v18 = vpop.eup %14147  ;;  %14157 = vrcp.f32 %v9592_v57  ;;  %13677 = vmatpush3.msra.mxu1 %v16416_v30  ;;  %13674 = vmatmul.mubr.msk.f32.vlgmr.msra.gmra.mxu0 %vm305_vm2, %v9620_v58 }
 0xa6f   :  { %v14150_v62 = vpop.eup %14149  ;;  %v9621_v60 = vmul.f32 %v14148_v18, %v16363_v46  ;;  %13682 = vmatpush3.msra.mxu0 %v16420_v52  ;;  %10879 = vrot.lane.b32.xlu0 %v17637_v22, %s14360_s30  ;;  %14159 = vrcp.f32 %v9583_v56  ;;  %v17643_v18 = vld [vmem:[#allocation38_spill] sm:$0xff] }
 0xa70   :  { %v9622_v42 = vmul.f32 %v14150_v62, %v16360_v47  ;;  %13678 = vmatprep.mubr.msk.f32.mxu1 %vm14364_vm1, %v17557_v14  ;;  %13686 = vmatprep.subr.mxu1 %v17557_v14 }
 0xa71   :  { %13683 = vmatprep.mubr.msk.f32.mxu0 %vm14364_vm1, %v17557_v14  ;;  %13691 = vmatprep.subr.mxu0 %v17557_v14  ;;  %v9595_v30 = vpop.xlane.xlu1 %9594 }
 0xa72   :  { %v14152_v54 = vpop.eup %14151  ;;  %13679 = vmatmul.mubr.msk.f32.vlgmr.msra.gmra.mxu1 %vm305_vm2, %v9621_v60  ;;  %13684 = vmatmul.mubr.msk.f32.vlgmr.msra.gmra.mxu0 %vm305_vm2, %v9622_v42  ;;  %v17644_v42 = vld [vmem:[#allocation39_spill] sm:$0xff] }
 0xa73   :  { %v14154_v46 = vpop.eup %14153  ;;  %v9623_v52 = vmul.f32 %v14152_v54, %v16372_v59  ;;  %13687 = vmatpush3.msra.mxu1 %v16426_v8  ;;  %13692 = vmatpush3.msra.mxu0 %v16466_v43 }
 0xa74   :  { %v9624_v47 = vmul.f32 %v14154_v46, %v16369_v41  ;;  %10943 = vrot.lane.b32.xlu0 %v16219_v39, %s14376_s20  ;;  %13688 = vmatprep.mubr.msk.f32.mxu1 %vm14364_vm1, %v17557_v14  ;;  %v17638_v41 = vld [vmem:[#allocation52_spill] sm:$0xff] }
 0xa75   :  { %13693 = vmatprep.mubr.msk.f32.mxu0 %vm14364_vm1, %v17557_v14  ;;  %13701 = vmatprep.subr.mxu0 %v17557_v14  ;;  %v10468_v38 = vpop.permute.xlu1 %10467 }
 0xa76   :  { %13689 = vmatmul.mubr.msk.f32.vlgmr.msra.gmra.mxu1 %vm305_vm2, %v9623_v52  ;;  %13694 = vmatmul.mubr.msk.f32.vlgmr.msra.gmra.mxu0 %vm305_vm2, %v9624_v47  ;;  %v17645_v47 = vld [vmem:[#allocation40_spill] sm:$0xff] }
 0xa77   :  { %v14156_v59 = vpop.eup %14155  ;;  %13702 = vmatpush3.msra.mxu0 %v10468_v38  ;;  %13703 = vmatprep.mubr.msk.f32.mxu0 %vm14364_vm1, %v17557_v14 }
 0xa78   :  { %v9626_v39 = vmul.f32 %v14156_v59, %v16378_v31  ;;  %10883 = vrot.lane.b32.xlu0 %v17638_v41, %s14360_s30  ;;  %13711 = vmatprep.subr.mxu0 %v17557_v14 }
 0xa79   :  { %v10544_v8 = vpop.permute.xlu1 %10543  ;;  %13696 = vmatprep.subr.mxu1 %v17557_v14  ;;  %13698 = vmatprep.mubr.msk.f32.mxu1 %vm14364_vm1, %v17557_v14 }
 0xa7a   :  { %13704 = vmatmul.mubr.msk.f32.vlgmr.msra.gmra.mxu0 %vm305_vm2, %v9626_v39 }
 0xa7b   :  { %v14158_v21 = vpop.eup %14157  ;;  %13713 = vmatprep.mubr.msk.f32.mxu0 %vm14364_vm1, %v17557_v14 }
 0xa7c   :  { %v9628_v34 = vmul.f32 %v14158_v21, %v16386_v0  ;;  %10947 = vrot.lane.b32.xlu0 %v16223_v33, %s14376_s20  ;;  %v17640_v33 = vld [vmem:[#allocation56_spill] sm:$0xff]  ;;  %v14160_v6 = vpop.eup %14159  ;;  %v11092_v21 = vld [vmem:[#allocation2 + $0x18] sm:$0xff] }
 0xa7d   :  { %v10620_v31 = vpop.permute.xlu1 %10619  ;;  %v9625_v11 = vmul.f32 %v14160_v6, %v16380_v4 }
 0xa7e   :  { %13712 = vmatpush3.msra.mxu0 %v10620_v31  ;;  %v11090_v31 = vld [vmem:[#allocation2 + $0x8] sm:$0xff] }
 0xa7f   :  { %13714 = vmatmul.mubr.msk.f32.vlgmr.msra.gmra.mxu0 %vm305_vm2, %v9628_v34  ;;  %13721 = vmatprep.subr.mxu0 %v17557_v14  ;;  %v11091_v34 = vld [vmem:[#allocation2 + $0x10] sm:$0xff] }
 0xa80   :  { %10887 = vrot.lane.b32.xlu0 %v17639_v23, %s14360_s30  ;;  %13723 = vmatprep.mubr.msk.f32.mxu0 %vm14364_vm1, %v17557_v14  ;;  %v11089_v23 = vld [vmem:[#allocation2] sm:$0xff] }
 0xa81   :  { %v10696_v29 = vpop.permute.xlu1 %10695 }
 0xa84   :  { %10951 = vrot.lane.b32.xlu0 %v16227_v32, %s14376_s20 }
 0xa85   :  { %v10772_v0 = vpop.permute.xlu1 %10771 }
 0xa86   :  { %13722 = vmatpush3.msra.mxu0 %v10772_v0 }
 0xa88   :  { %10891 = vrot.lane.b32.xlu0 %v17640_v33, %s14360_s30 }
 0xa89   :  { %v16556_v25 = vpop.permute.xlu1 %10865 }
 0xa8c   :  { %10955 = vrot.lane.b32.xlu0 %v16233_v53, %s14376_s20  ;;  %v9589_v53 = vpop.xlane.xlu0 %9588 }
 0xa8d   :  { %v16560_v28 = vpop.permute.xlu1 %10929  ;;  %14161 = vrcp.f32 %v9589_v53 }
 0xa8e   :  { %14163 = vrcp.f32 %v9595_v30 }
 0xa91   :  { %v16562_v13 = vpop.permute.xlu1 %10869 }
 0xa95   :  { %v16564_v24 = vpop.permute.xlu1 %10933 }
 0xa99   :  { %v16566_v9 = vpop.permute.xlu1 %10873 }
 0xa9a   :  { %v14162_v48 = vpop.eup %14161 }
 0xa9b   :  { %v9627_v63 = vmul.f32 %v14162_v48, %v16388_v61  ;;  %v14164_v27 = vpop.eup %14163 }
 0xa9c   :  { %v9629_v4 = vmul.f32 %v14164_v27, %v16394_v37 }
 0xa9d   :  { %v16568_v19 = vpop.permute.xlu1 %10937 }
 0xaa1   :  { %v16570_v32 = vpop.permute.xlu1 %10877 }
 0xaa5   :  { %v16572_v26 = vpop.permute.xlu1 %10941 }
 0xaa9   :  { %v16574_v40 = vpop.permute.xlu1 %10881 }
 0xaad   :  { %v16576_v35 = vpop.permute.xlu1 %10945 }
 0xab1   :  { %v10886_v43 = vpop.permute.xlu1 %10885 }
 0xab2   :  { %v11050_v7 = vsel %vm305_vm2, %v17641_v10, %v10886_v43 }
 0xab5   :  { %v10950_v2 = vpop.permute.xlu1 %10949 }
 0xab6   :  { %v16581_v12 = vsel %vm11055_vm3, %v11050_v7, %v10950_v2 }
 0xab9   :  { %v10890_v17 = vpop.permute.xlu1 %10889 }
 0xaba   :  { %v11052_v51 = vsel %vm305_vm2, %v17642_v16, %v10890_v17 }
 0xabc   :  { %v9598_v20 = vpop.xlane.xlu0 %9597 }
 0xabd   :  { %v10954_v1 = vpop.permute.xlu1 %10953  ;;  %14165 = vrcp.f32 %v9598_v20 }
 0xabe   :  { %v16586_v5 = vsel %vm11055_vm3, %v11052_v51, %v10954_v1 }
 0xac0   :  { %v10392_v55 = vpop.permute.xlu0 %10391 }
 0xac1   :  { %13697 = vmatpush3.msra.mxu1 %v10392_v55 }
 0xac2   :  { %13699 = vmatmul.mubr.msk.f32.vlgmr.msra.gmra.mxu1 %vm305_vm2, %v9625_v11  ;;  %13706 = vmatprep.subr.mxu1 %v17557_v14 }
 0xac3   :  { %13707 = vmatpush3.msra.mxu1 %v10544_v8  ;;  %13708 = vmatprep.mubr.msk.f32.mxu1 %vm14364_vm1, %v17557_v14 }
 0xac4   :  { %v16594_v36 = vpop.permute.xlu0 %10863  ;;  %13716 = vmatprep.subr.mxu1 %v17557_v14 }
 0xac6   :  { %13709 = vmatmul.mubr.msk.f32.vlgmr.msra.gmra.mxu1 %vm305_vm2, %v9627_v63 }
 0xac7   :  { %13717 = vmatpush3.msra.mxu1 %v10696_v29  ;;  %13718 = vmatprep.mubr.msk.f32.mxu1 %vm14364_vm1, %v17557_v14 }
 0xac8   :  { %v16601_v45 = vpop.permute.xlu0 %10927  ;;  %13726 = vmatprep.subr.mxu1 %v11092_v21 }
 0xaca   :  { %v14166_v49 = vpop.eup %14165  ;;  %13719 = vmatmul.mubr.msk.f32.vlgmr.msra.gmra.mxu1 %vm305_vm2, %v9629_v4 }
 0xacb   :  { %v9630_v61 = vmul.f32 %v14166_v49, %v16439_v15  ;;  %13727 = vmatpush3.msra.mxu1 %v11092_v21  ;;  %v17647_v21 = vld [vmem:[#allocation26_spill] sm:$0xff] }
 0xacc   :  { %v16605_v44 = vpop.permute.xlu0 %10867  ;;  %13728 = vmatprep.subr.mxu1 %v11091_v34 }
 0xacd   :  { %13724 = vmatmul.mubr.msk.f32.vlgmr.msra.gmra.mxu0 %vm305_vm2, %v9630_v61  ;;  %13729 = vmatpush3.msra.mxu1 %v11091_v34  ;;  %v11040_v34 = vsel %vm305_vm2, %v17647_v21, %v16556_v25 }
 0xace   :  { %13730 = vmatprep.subr.mxu1 %v11090_v31 }
 0xacf   :  { %13731 = vmatpush3.msra.mxu1 %v11090_v31  ;;  %v11057_v31 = vsel %vm11055_vm3, %v11040_v34, %v16560_v28 }
 0xad0   :  { %v16608_v3 = vpop.permute.xlu0 %10931  ;;  %13732 = vmatprep.subr.mxu1 %v11089_v23 }
 0xad1   :  { %13733 = vmatpush3.msra.mxu1 %v11089_v23 }
 0xad4   :  { %v16610_v50 = vpop.permute.xlu0 %10871 }
 0xad8   :  { %v16612_v58 = vpop.permute.xlu0 %10935 }
 0xadc   :  { %v16614_v14 = vpop.permute.xlu0 %10875 }
 0xae0   :  { %v16616_v37 = vpop.permute.xlu0 %10939 }
 0xae4   :  { %v10880_v57 = vpop.permute.xlu0 %10879 }
 0xae5   :  { %v11047_v62 = vsel %vm305_vm2, %v17643_v18, %v10880_v57  ;;  %v17646_v18 = vld [vmem:[#allocation32_spill] sm:$0xff] }
 0xae8   :  { %v10944_v60 = vpop.permute.xlu0 %10943 }
 0xae9   :  { %v16621_v15 = vsel %vm11055_vm3, %v11047_v62, %v10944_v60  ;;  %v11039_v62 = vsel %vm305_vm2, %v17646_v18, %v16594_v36 }
 0xaea   :  { %v11056_v60 = vsel %vm11055_vm3, %v11039_v62, %v16601_v45 }
 0xaec   :  { %v10884_v22 = vpop.permute.xlu0 %10883 }
 0xaed   :  { %v11049_v30 = vsel %vm305_vm2, %v17644_v42, %v10884_v22 }
 0xaf0   :  { %v10948_v54 = vpop.permute.xlu0 %10947 }
 0xaf1   :  { %v16626_v46 = vsel %vm11055_vm3, %v11049_v30, %v10948_v54 }
 0xaf4   :  { %v10888_v52 = vpop.permute.xlu0 %10887 }
 0xaf5   :  { %v11051_v38 = vsel %vm305_vm2, %v17645_v47, %v10888_v52 }
 0xaf8   :  { %v9703_v59 = vpop.f32.mrf.mxu1  ;;  %v10952_v39 = vpop.permute.xlu0 %10951 }
 0xaf9   :  { %10991 = vrot.lane.b32.xlu0 %v9703_v59, %s14377_s5  ;;  %v16632_v41 = vsel %vm11055_vm3, %v11051_v38, %v10952_v39  ;;  %v16659_v39 = vpop.permute.xlu1 %10893 }
 0xafa   :  { %v13650_v8 = vpop.f32.mrf.mxu1 }
 0xafc   :  { %v16645_v61 = vpop.permute.xlu0 %10891 }
 0xafd   :  { %v16662_v8 = vpop.permute.xlu1 %10957 }
 0xb00   :  { %v16647_v57 = vpop.permute.xlu0 %10955 }
 0xb25   :  { %v9779_v29 = vpop.f32.mrf.mxu0 }
 0xb26   :  { %10993 = vrot.lane.b32.xlu1 %v9779_v29, %s14377_s5 }
 0xb27   :  { %v13655_v0 = vpop.f32.mrf.mxu0 }
 0xb28   :  { %v17648_v0 = vld [vmem:[#allocation27_spill] sm:$0xff] }
 0xb29   :  { %v9855_v33 = vpop.f32.mrf.mxu1 }
 0xb2a   :  { %v9931_v56 = vpop.f32.mrf.mxu0  ;;  %10995 = vrot.lane.b32.xlu0 %v9855_v33, %s14377_s5  ;;  %v11041_v33 = vsel %vm305_vm2, %v17648_v0, %v16605_v44  ;;  %v17650_v44 = vld [vmem:[#allocation29_spill] sm:$0xff] }
 0xb2b   :  { %10997 = vrot.lane.b32.xlu1 %v9931_v56, %s14377_s5  ;;  %v13660_v53 = vpop.f32.mrf.mxu1  ;;  %v17649_v56 = vld [vmem:[#allocation28_spill] sm:$0xff] }
 0xb2c   :  { %v13665_v43 = vpop.f32.mrf.mxu0  ;;  %v11042_v53 = vsel %vm305_vm2, %v17649_v56, %v16562_v13  ;;  %v17651_v13 = vld [vmem:[#allocation31_spill] sm:$0xff] }
 0xb2d   :  { %v10007_v10 = vpop.f32.mrf.mxu1  ;;  %v11058_v43 = vsel %vm11055_vm3, %v11041_v33, %v16608_v3  ;;  %v11059_v28 = vsel %vm11055_vm3, %v11042_v53, %v16564_v24  ;;  %v11044_v3 = vsel %vm305_vm2, %v17651_v13, %v16566_v9  ;;  %v14233_v33 = vld [vmem:[%s17516_s0] sm:$0xff] }
 0xb2e   :  { %v10083_v7 = vpop.f32.mrf.mxu0  ;;  %10999 = vrot.lane.b32.xlu0 %v10007_v10, %s14377_s5 }
 0xb2f   :  { %11001 = vrot.lane.b32.xlu1 %v10083_v7, %s14377_s5  ;;  %v13670_v2 = vpop.f32.mrf.mxu1 }
 0xb30   :  { %v13675_v17 = vpop.f32.mrf.mxu0 }
 0xb31   :  { %v11043_v17 = vsel %vm305_vm2, %v17650_v44, %v16610_v50  ;;  %v17652_v50 = vld [vmem:[#allocation33_spill] sm:$0xff] }
 0xb32   :  { %v10159_v20 = vpop.f32.mrf.mxu1  ;;  %v10235_v6 = vpop.f32.mrf.mxu0  ;;  %v11060_v24 = vsel %vm11055_vm3, %v11043_v17, %v16612_v58  ;;  %v11046_v9 = vsel %vm305_vm2, %v17652_v50, %v16570_v32  ;;  %v17654_v32 = vld [vmem:[#allocation34_spill] sm:$0xff]  ;;  %v14234_v44 = vld [vmem:[%s17516_s0 + $0x10] sm:$0xff] }
 0xb33   :  { %11003 = vrot.lane.b32.xlu0 %v10159_v20, %s14377_s5  ;;  %11005 = vrot.lane.b32.xlu1 %v10235_v6, %s14377_s5  ;;  %v11061_v6 = vsel %vm11055_vm3, %v11044_v3, %v16568_v19  ;;  %v11063_v19 = vsel %vm11055_vm3, %v11046_v9, %v16572_v26  ;;  %v14235_v3 = vld [vmem:[%s17516_s0 + $0x18] sm:$0xff]  ;;  %v14237_v9 = vld [vmem:[%s17516_s0 + $0x28] sm:$0xff] }
 0xb34   :  { %v13680_v16 = vpop.f32.mrf.mxu1  ;;  %v13685_v51 = vpop.f32.mrf.mxu0 }
 0xb36   :  { %v10311_v1 = vpop.f32.mrf.mxu1  ;;  %v10387_v11 = vpop.f32.mrf.mxu0 }
 0xb37   :  { %11007 = vrot.lane.b32.xlu0 %v10311_v1, %s14377_s5  ;;  %11009 = vrot.lane.b32.xlu1 %v10387_v11, %s14377_s5  ;;  %v17653_v11 = vld [vmem:[#allocation30_spill] sm:$0xff] }
 0xb38   :  { %v13690_v55 = vpop.f32.mrf.mxu1  ;;  %v13695_v48 = vpop.f32.mrf.mxu0  ;;  %v11045_v58 = vsel %vm305_vm2, %v17653_v11, %v16614_v14 }
 0xb39   :  { %v11062_v55 = vsel %vm11055_vm3, %v11045_v58, %v16616_v37 }
 0xb3a   :  { %v10539_v63 = vpop.f32.mrf.mxu0 }
 0xb3b   :  { %11013 = vrot.lane.b32.xlu1 %v10539_v63, %s14377_s5 }
 0xb3c   :  { %v13705_v27 = vpop.f32.mrf.mxu0 }
 0xb3f   :  { %v10691_v4 = vpop.f32.mrf.mxu0 }
 0xb40   :  { %11017 = vrot.lane.b32.xlu1 %v10691_v4, %s14377_s5 }
 0xb41   :  { %v13715_v49 = vpop.f32.mrf.mxu0 }
 0xb42   :  { %v11048_v49 = vsel %vm305_vm2, %v17654_v32, %v16574_v40 }
 0xb43   :  { %v11065_v26 = vsel %vm11055_vm3, %v11048_v49, %v16576_v35  ;;  %v14239_v49 = vld [vmem:[%s17516_s0 + $0x38] sm:$0xff] }
 0xb6b   :  { %v10992_v22 = vpop.permute.xlu0 %10991 }
 0xb6c   :  { %v11073_v42 = vsel %vm11072_vm4, %v11056_v60, %v10992_v22 }
 0xb6d   :  { %13734 = vmatprep.mubr.msk.f32.mxu1 %vm108_vm0, %v11073_v42 }
 0xb82   :  { %v10463_v30 = vpop.f32.mrf.mxu1 }
 0xb83   :  { %11011 = vrot.lane.b32.xlu0 %v10463_v30, %s14377_s5 }
 0xb84   :  { %v13700_v54 = vpop.f32.mrf.mxu1 }
 0xb86   :  { %v10615_v52 = vpop.f32.mrf.mxu1 }
 0xb87   :  { %11015 = vrot.lane.b32.xlu0 %v10615_v52, %s14377_s5  ;;  %v17655_v52 = vld [vmem:[#allocation41_spill] sm:$0xff] }
 0xb88   :  { %v13710_v47 = vpop.f32.mrf.mxu1 }
 0xb8a   :  { %v10767_v38 = vpop.f32.mrf.mxu1 }
 0xb8b   :  { %11019 = vrot.lane.b32.xlu0 %v10767_v38, %s14377_s5 }
 0xb8c   :  { %v13720_v36 = vpop.f32.mrf.mxu1 }
 0xb8d   :  { %v10843_v59 = vpop.f32.mrf.mxu0  ;;  %v17656_v36 = vld [vmem:[#allocation37_spill] sm:$0xff] }
 0xb8e   :  { %11021 = vrot.lane.b32.xlu1 %v10843_v59, %s14377_s5 }
 0xb8f   :  { %v13725_v45 = vpop.f32.mrf.mxu0 }
 0xb90   :  { %v17657_v45 = vld [vmem:[#allocation15_spill] sm:$0xff] }
 0xb91   :  { %v11095_v21 = vsub.s32 2, %v17657_v45 }
 0xb98   :  { %v10994_v23 = vpop.permute.xlu1 %10993 }
 0xb99   :  { %v11074_v29 = vsel %vm11072_vm4, %v11057_v31, %v10994_v23 }
 0xb9a   :  { %13735 = vmatmul.mubr.msk.f32.vlgmr.msra.gmra.mxu1 %vm108_vm0, %v11074_v29 }
 0xb9c   :  { %v10996_v25 = vpop.permute.xlu0 %10995 }
 0xb9d   :  { %v11075_v10 = vsel %vm11072_vm4, %v11058_v43, %v10996_v25  ;;  %v10998_v7 = vpop.permute.xlu1 %10997 }
 0xb9e   :  { %v11076_v2 = vsel %vm11072_vm4, %v11059_v28, %v10998_v7  ;;  %13737 = vmatprep.mubr.msk.f32.mxu1 %vm108_vm0, %v11075_v10 }
 0xb9f   :  { %13738 = vmatmul.mubr.msk.f32.gmra.mxu1 %vm108_vm0, %v11076_v2 }
 0xba0   :  { %v11000_v20 = vpop.permute.xlu0 %10999 }
 0xba1   :  { %v11077_v16 = vsel %vm11072_vm4, %v11060_v24, %v11000_v20  ;;  %v11002_v51 = vpop.permute.xlu1 %11001 }
 0xba2   :  { %v11078_v1 = vsel %vm11072_vm4, %v11061_v6, %v11002_v51  ;;  %13740 = vmatprep.mubr.msk.f32.mxu1 %vm108_vm0, %v11077_v16  ;;  %v14236_v51 = vld [vmem:[%s17516_s0 + $0x20] sm:$0xff] }
 0xba3   :  { %13741 = vmatmul.mubr.msk.f32.gmra.mxu1 %vm108_vm0, %v11078_v1 }
 0xba5   :  { %v11004_v48 = vpop.permute.xlu0 %11003  ;;  %v11006_v63 = vpop.permute.xlu1 %11005 }
 0xba6   :  { %v11079_v27 = vsel %vm11072_vm4, %v11062_v55, %v11004_v48  ;;  %v11080_v4 = vsel %vm11072_vm4, %v11063_v19, %v11006_v63 }
 0xba7   :  { %13743 = vmatprep.mubr.msk.f32.mxu1 %vm108_vm0, %v11079_v27 }
 0xba8   :  { %13744 = vmatmul.mubr.msk.f32.gmra.mxu1 %vm108_vm0, %v11080_v4  ;;  %v14238_v4 = vld [vmem:[%s17516_s0 + $0x30] sm:$0xff] }
 0xba9   :  { %v11008_v14 = vpop.permute.xlu0 %11007  ;;  %v11010_v18 = vpop.permute.xlu1 %11009 }
 0xbaa   :  { %v11081_v37 = vsel %vm11072_vm4, %v16621_v15, %v11008_v14  ;;  %v11082_v62 = vsel %vm11072_vm4, %v11065_v26, %v11010_v18 }
 0xbab   :  { %13746 = vmatprep.mubr.msk.f32.mxu1 %vm108_vm0, %v11081_v37 }
 0xbac   :  { %13747 = vmatmul.mubr.msk.f32.gmra.mxu1 %vm108_vm0, %v11082_v62 }
 0xbad   :  { %v11014_v60 = vpop.permute.xlu1 %11013 }
 0xbae   :  { %v11084_v42 = vsel %vm11072_vm4, %v16581_v12, %v11014_v60 }
 0xbb2   :  { %v11018_v35 = vpop.permute.xlu1 %11017 }
 0xbb3   :  { %v11086_v54 = vsel %vm11072_vm4, %v16586_v5, %v11018_v35 }
 0xbf5   :  { %v11012_v22 = vpop.permute.xlu0 %11011 }
 0xbf6   :  { %v11083_v40 = vsel %vm11072_vm4, %v16626_v46, %v11012_v22  ;;  %v11053_v46 = vsel %vm305_vm2, %v17655_v52, %v16645_v61  ;;  %v14240_v22 = vld [vmem:[%s17516_s0 + $0x40] sm:$0xff] }
 0xbf7   :  { %13749 = vmatprep.mubr.msk.f32.mxu1 %vm108_vm0, %v11083_v40  ;;  %v11070_v12 = vsel %vm11055_vm3, %v11053_v46, %v16647_v57  ;;  %v16750_v57 = vld [vmem:[#allocation8] sm:$0xff] }
 0xbf8   :  { %13750 = vmatmul.mubr.msk.f32.gmra.mxu1 %vm108_vm0, %v11084_v42  ;;  %v16753_v34 = vrot.slane %v16750_v57, %v11095_v21  ;;  %v14241_v42 = vld [vmem:[%s17516_s0 + $0x48] sm:$0xff] }
 0xbf9   :  { %v11016_v15 = vpop.permute.xlu0 %11015 }
 0xbfa   :  { %v11085_v30 = vsel %vm11072_vm4, %v16632_v41, %v11016_v15  ;;  %v11054_v41 = vsel %vm305_vm2, %v17656_v36, %v16659_v39 }
 0xbfb   :  { %13752 = vmatprep.mubr.msk.f32.mxu1 %vm108_vm0, %v11085_v30  ;;  %v11071_v5 = vsel %vm11055_vm3, %v11054_v41, %v16662_v8  ;;  %v14232_v8 = vld [vmem:[%s17516_s0 + $0x8] sm:$0xff] }
 0xbfc   :  { %13753 = vmatmul.mubr.msk.f32.gmra.mxu1 %vm108_vm0, %v11086_v54 }
 0xbfd   :  { %v11020_v47 = vpop.permute.xlu0 %11019 }
 0xbfe   :  { %v11087_v38 = vsel %vm11072_vm4, %v11070_v12, %v11020_v47  ;;  %v14242_v47 = vld [vmem:[%s17516_s0 + $0x58] sm:$0xff] }
 0xbff   :  { %13755 = vmatprep.mubr.msk.f32.mxu1 %vm108_vm0, %v11087_v38 }
 0xc00   :  { %v11022_v59 = vpop.permute.xlu1 %11021 }
 0xc01   :  { %v11088_v61 = vsel %vm11072_vm4, %v11071_v5, %v11022_v59  ;;  %v14243_v5 = vld [vmem:[%s17516_s0 + $0x50] sm:$0xff] }
 0xc02   :  { %13756 = vmatmul.mubr.msk.f32.gmra.mxu1 %vm108_vm0, %v11088_v61 }
 0xc5a   :  { %v13736_v31 = vpop.f32.mrf.mxu1 }
 0xc5b   :  { %v11217_v39 = vadd.f32 %v13736_v31, %v16753_v34 }
 0xc5c   :  { %v11211_v23 = vpop.f32.mrf.mxu1 }
 0xc5d   :  { %v16759_v29 = vadd.f32 %v14232_v8, %v11217_v39  ;;  %v11212_v0 = vadd.f32 %v11211_v23, %v16753_v34  ;;  %v14244_v39 = vld [vmem:[%s17516_s0 + $0x68] sm:$0xff] }
 0xc5f   :  { %v16765_v56 = vadd.f32 %v14233_v33, %v11212_v0  ;;  %v13739_v53 = vpop.f32.mrf.mxu1  ;;  %v11309_v43 = vsel %vm108_vm0, %v16759_v29, 0.0  ;;  %v14245_v33 = vld [vmem:[%s17516_s0 + $0x60] sm:$0xff] }
 0xc60   :  { %11310 = vadd.xlane.f32.xlu1 %v11309_v43  ;;  %v11227_v10 = vadd.f32 %v13739_v53, %v16753_v34 }
 0xc61   :  { %v11221_v25 = vpop.f32.mrf.mxu1  ;;  %v11306_v28 = vsel %vm108_vm0, %v16765_v56, 0.0 }
 0xc62   :  { %v11222_v7 = vadd.f32 %v11221_v25, %v16753_v34  ;;  %11307 = vadd.xlane.f32.xlu0 %v11306_v28  ;;  %v16781_v24 = vadd.f32 %v14235_v3, %v11227_v10  ;;  %v14247_v3 = vld [vmem:[%s17516_s0 + $0x70] sm:$0xff] }
 0xc63   :  { %v13742_v2 = vpop.f32.mrf.mxu1 }
 0xc64   :  { %v16776_v17 = vadd.f32 %v14234_v44, %v11222_v7  ;;  %v11237_v20 = vadd.f32 %v13742_v2, %v16753_v34  ;;  %v11315_v55 = vsel %vm108_vm0, %v16781_v24, 0.0  ;;  %v14246_v2 = vld [vmem:[%s17516_s0 + $0x78] sm:$0xff] }
 0xc65   :  { %v11231_v13 = vpop.f32.mrf.mxu1 }
 0xc66   :  { %v11232_v6 = vadd.f32 %v11231_v13, %v16753_v34  ;;  %v11312_v16 = vsel %vm108_vm0, %v16776_v17, 0.0  ;;  %v16795_v11 = vadd.f32 %v14237_v9, %v11237_v20 }
 0xc67   :  { %11313 = vadd.xlane.f32.xlu0 %v11312_v16 }
 0xc68   :  { %v16790_v1 = vadd.f32 %v14236_v51, %v11232_v6  ;;  %v13745_v50 = vpop.f32.mrf.mxu1  ;;  %v11321_v37 = vsel %vm108_vm0, %v16795_v11, 0.0 }
 0xc69   :  { %v11247_v58 = vadd.f32 %v13745_v50, %v16753_v34 }
 0xc6a   :  { %v11241_v19 = vpop.f32.mrf.mxu1  ;;  %v11318_v48 = vsel %vm108_vm0, %v16790_v1, 0.0 }
 0xc6b   :  { %v11242_v63 = vadd.f32 %v11241_v19, %v16753_v34  ;;  %11316 = vadd.xlane.f32.xlu0 %v11315_v55  ;;  %11319 = vadd.xlane.f32.xlu1 %v11318_v48  ;;  %v16811_v26 = vadd.f32 %v14239_v49, %v11247_v58 }
 0xc6c   :  { %v13748_v27 = vpop.f32.mrf.mxu1 }
 0xc6d   :  { %v16806_v32 = vadd.f32 %v14238_v4, %v11242_v63  ;;  %v11257_v14 = vadd.f32 %v13748_v27, %v16753_v34  ;;  %v11327_v15 = vsel %vm108_vm0, %v16811_v26, 0.0 }
 0xc6e   :  { %v11251_v18 = vpop.f32.mrf.mxu1 }
 0xc6f   :  { %v11252_v62 = vadd.f32 %v11251_v18, %v16753_v34  ;;  %11322 = vadd.xlane.f32.xlu0 %v11321_v37  ;;  %v11324_v60 = vsel %vm108_vm0, %v16806_v32, 0.0  ;;  %v16827_v35 = vadd.f32 %v14241_v42, %v11257_v14 }
 0xc70   :  { %11325 = vadd.xlane.f32.xlu1 %v11324_v60 }
 0xc71   :  { %v16822_v40 = vadd.f32 %v14240_v22, %v11252_v62  ;;  %v11333_v54 = vsel %vm108_vm0, %v16827_v35, 0.0 }
 0xc73   :  { %11328 = vadd.xlane.f32.xlu0 %v11327_v15  ;;  %v11330_v30 = vsel %vm108_vm0, %v16822_v40, 0.0 }
 0xc74   :  { %11331 = vadd.xlane.f32.xlu1 %v11330_v30 }
 0xc77   :  { %11334 = vadd.xlane.f32.xlu0 %v11333_v54 }
 0xcb8   :  { %v13751_v52 = vpop.f32.mrf.mxu1 }
 0xcb9   :  { %v11267_v46 = vadd.f32 %v13751_v52, %v16753_v34 }
 0xcba   :  { %v11261_v12 = vpop.f32.mrf.mxu1 }
 0xcbb   :  { %v16839_v38 = vadd.f32 %v14242_v47, %v11267_v46  ;;  %v11262_v36 = vadd.f32 %v11261_v12, %v16753_v34 }
 0xcbc   :  { %v13754_v41 = vpop.f32.mrf.mxu1 }
 0xcbd   :  { %v16845_v59 = vadd.f32 %v14243_v5, %v11262_v36  ;;  %v11277_v61 = vadd.f32 %v13754_v41, %v16753_v34  ;;  %v11339_v21 = vsel %vm108_vm0, %v16839_v38, 0.0 }
 0xcbe   :  { %11340 = vadd.xlane.f32.xlu0 %v11339_v21  ;;  %v11271_v31 = vpop.f32.mrf.mxu1 }
 0xcbf   :  { %v16853_v23 = vadd.f32 %v14244_v39, %v11277_v61  ;;  %v11272_v8 = vadd.f32 %v11271_v31, %v16753_v34  ;;  %v11336_v0 = vsel %vm108_vm0, %v16845_v59, 0.0 }
 0xcc0   :  { %11337 = vadd.xlane.f32.xlu1 %v11336_v0 }
 0xcc1   :  { %v16861_v53 = vadd.f32 %v14245_v33, %v11272_v8  ;;  %v11345_v43 = vsel %vm108_vm0, %v16853_v23, 0.0 }
 0xcc2   :  { %11346 = vadd.xlane.f32.xlu0 %v11345_v43  ;;  %v13757_v25 = vpop.f32.mrf.mxu1 }
 0xcc3   :  { %v11287_v28 = vadd.f32 %v13757_v25, %v16753_v34  ;;  %v11342_v10 = vsel %vm108_vm0, %v16861_v53, 0.0 }
 0xcc4   :  { %11343 = vadd.xlane.f32.xlu1 %v11342_v10  ;;  %v11281_v7 = vpop.f32.mrf.mxu1 }
 0xcc5   :  { %v16871_v44 = vadd.f32 %v14246_v2, %v11287_v28  ;;  %v11282_v13 = vadd.f32 %v11281_v7, %v16753_v34  ;;  %v11558_v2 = vld [vmem:[#allocation5 + $0x18] sm:$0xff] }
 0xcc6   :  { %13758 = vmatprep.subr.mxu0 %v11558_v2 }
 0xcc7   :  { %v16877_v20 = vadd.f32 %v14247_v3, %v11282_v13  ;;  %v11351_v6 = vsel %vm108_vm0, %v16871_v44, 0.0  ;;  %13759 = vmatpush3.msra.mxu0 %v11558_v2  ;;  %v11557_v13 = vld [vmem:[#allocation5 + $0x10] sm:$0xff]  ;;  %v11555_v3 = vld [vmem:[#allocation5] sm:$0xff]  ;;  %v11517_v2 = vsub.s32 3, %v17657_v45 }
 0xcc8   :  { %11352 = vadd.xlane.f32.xlu0 %v11351_v6  ;;  %13760 = vmatprep.subr.mxu0 %v11557_v13 }
 0xcc9   :  { %v11348_v16 = vsel %vm108_vm0, %v16877_v20, 0.0  ;;  %13761 = vmatpush3.msra.mxu0 %v11557_v13 }
 0xcca   :  { %11349 = vadd.xlane.f32.xlu1 %v11348_v16 }
 0xce9   :  { %v11311_v51 = vpop.xlane.xlu1 %11310 }
 0xcea   :  { %v11356_v50 = vmul.f32 0.03125, %v11311_v51 }
 0xceb   :  { %v11308_v9 = vpop.xlane.xlu0 %11307 }
 0xcec   :  { %v16884_v58 = vsub.f32 %v16759_v29, %v11356_v50  ;;  %v11355_v34 = vmul.f32 0.03125, %v11308_v9 }
 0xcee   :  { %v16887_v19 = vsub.f32 %v16765_v56, %v11355_v34  ;;  %v11388_v55 = vmul.f32 %v16884_v58, %v16884_v58 }
 0xcf0   :  { %v11314_v48 = vpop.xlane.xlu0 %11313  ;;  %v11406_v63 = vsel %vm108_vm0, %v11388_v55, 0.0  ;;  %v11387_v27 = vmul.f32 %v16887_v19, %v16887_v19 }
 0xcf1   :  { %v11357_v4 = vmul.f32 0.03125, %v11314_v48  ;;  %11407 = vadd.xlane.f32.xlu0 %v11406_v63 }
 0xcf2   :  { %v11403_v49 = vsel %vm108_vm0, %v11387_v27, 0.0 }
 0xcf3   :  { %v16896_v29 = vsub.f32 %v16776_v17, %v11357_v4  ;;  %11404 = vadd.xlane.f32.xlu1 %v11403_v49 }
 0xcf4   :  { %v11320_v14 = vpop.xlane.xlu1 %11319  ;;  %v11317_v56 = vpop.xlane.xlu0 %11316 }
 0xcf5   :  { %v11359_v18 = vmul.f32 0.03125, %v11320_v14  ;;  %v11358_v37 = vmul.f32 0.03125, %v11317_v56  ;;  %v11389_v62 = vmul.f32 %v16896_v29, %v16896_v29 }
 0xcf7   :  { %v16901_v60 = vsub.f32 %v16790_v1, %v11359_v18  ;;  %v16904_v22 = vsub.f32 %v16781_v24, %v11358_v37  ;;  %v11409_v42 = vsel %vm108_vm0, %v11389_v62, 0.0 }
 0xcf8   :  { %11410 = vadd.xlane.f32.xlu1 %v11409_v42  ;;  %v11323_v15 = vpop.xlane.xlu0 %11322 }
 0xcf9   :  { %v11326_v17 = vpop.xlane.xlu1 %11325  ;;  %v11360_v30 = vmul.f32 0.03125, %v11323_v15  ;;  %v11391_v54 = vmul.f32 %v16901_v60, %v16901_v60  ;;  %v11390_v52 = vmul.f32 %v16904_v22, %v16904_v22 }
 0xcfa   :  { %v11361_v46 = vmul.f32 0.03125, %v11326_v17 }
 0xcfb   :  { %v16912_v12 = vsub.f32 %v16795_v11, %v11360_v30  ;;  %v11415_v1 = vsel %vm108_vm0, %v11391_v54, 0.0  ;;  %v11412_v24 = vsel %vm108_vm0, %v11390_v52, 0.0 }
 0xcfc   :  { %v16917_v47 = vsub.f32 %v16806_v32, %v11361_v46  ;;  %11416 = vadd.xlane.f32.xlu1 %v11415_v1  ;;  %11413 = vadd.xlane.f32.xlu0 %v11412_v24  ;;  %v11329_v36 = vpop.xlane.xlu0 %11328 }
 0xcfd   :  { %v11332_v41 = vpop.xlane.xlu1 %11331  ;;  %v11362_v5 = vmul.f32 0.03125, %v11329_v36  ;;  %v11392_v61 = vmul.f32 %v16912_v12, %v16912_v12 }
 0xcfe   :  { %v11363_v21 = vmul.f32 0.03125, %v11332_v41  ;;  %v11393_v11 = vmul.f32 %v16917_v47, %v16917_v47 }
 0xcff   :  { %v16924_v31 = vsub.f32 %v16811_v26, %v11362_v5  ;;  %v11418_v39 = vsel %vm108_vm0, %v11392_v61, 0.0 }
 0xd00   :  { %v16928_v32 = vsub.f32 %v16822_v40, %v11363_v21  ;;  %v11421_v8 = vsel %vm108_vm0, %v11393_v11, 0.0  ;;  %11419 = vadd.xlane.f32.xlu0 %v11418_v39  ;;  %v11335_v0 = vpop.xlane.xlu0 %11334  ;;  %v16989_v11 = vld [vmem:[%s17520_s4 + $0x70] sm:$0xff] }
 0xd01   :  { %11422 = vadd.xlane.f32.xlu1 %v11421_v8  ;;  %v11364_v33 = vmul.f32 0.03125, %v11335_v0  ;;  %v11394_v43 = vmul.f32 %v16924_v31, %v16924_v31  ;;  %v16996_v0 = vld [vmem:[%s17520_s4 + $0x68] sm:$0xff] }
 0xd02   :  { %v11395_v25 = vmul.f32 %v16928_v32, %v16928_v32 }
 0xd03   :  { %v16936_v26 = vsub.f32 %v16827_v35, %v11364_v33  ;;  %v11424_v28 = vsel %vm108_vm0, %v11394_v43, 0.0  ;;  %v11556_v35 = vld [vmem:[#allocation5 + $0x8] sm:$0xff]  ;;  %v17003_v43 = vld [vmem:[%s17520_s4 + $0x60] sm:$0xff] }
 0xd04   :  { %v11427_v40 = vsel %vm108_vm0, %v11395_v25, 0.0  ;;  %11425 = vadd.xlane.f32.xlu0 %v11424_v28  ;;  %13762 = vmatprep.subr.mxu0 %v11556_v35 }
 0xd05   :  { %11428 = vadd.xlane.f32.xlu1 %v11427_v40  ;;  %v11396_v10 = vmul.f32 %v16936_v26, %v16936_v26  ;;  %13763 = vmatpush3.msra.mxu0 %v11556_v35 }
 0xd06   :  { %13764 = vmatprep.subr.mxu0 %v11555_v3 }
 0xd07   :  { %v11430_v7 = vsel %vm108_vm0, %v11396_v10, 0.0  ;;  %13765 = vmatpush3.msra.mxu0 %v11555_v3  ;;  %v17018_v3 = vld [vmem:[%s17520_s4 + $0x50] sm:$0xff] }
 0xd08   :  { %11431 = vadd.xlane.f32.xlu0 %v11430_v7  ;;  %v17010_v7 = vld [vmem:[%s17520_s4 + $0x58] sm:$0xff] }
 0xd47   :  { %v11341_v6 = vpop.xlane.xlu0 %11340 }
 0xd48   :  { %v11366_v16 = vmul.f32 0.03125, %v11341_v6 }
 0xd49   :  { %v11338_v51 = vpop.xlane.xlu1 %11337 }
 0xd4a   :  { %v16944_v50 = vsub.f32 %v16839_v38, %v11366_v16  ;;  %v11365_v9 = vmul.f32 0.03125, %v11338_v51 }
 0xd4b   :  { %v11347_v34 = vpop.xlane.xlu0 %11346 }
 0xd4c   :  { %v16947_v55 = vsub.f32 %v16845_v59, %v11365_v9  ;;  %v11368_v48 = vmul.f32 0.03125, %v11347_v34  ;;  %v11398_v63 = vmul.f32 %v16944_v50, %v16944_v50  ;;  %v17025_v9 = vld [vmem:[%s17520_s4 + $0x48] sm:$0xff] }
 0xd4d   :  { %v11344_v27 = vpop.xlane.xlu1 %11343 }
 0xd4e   :  { %v16952_v4 = vsub.f32 %v16853_v23, %v11368_v48  ;;  %v11367_v49 = vmul.f32 0.03125, %v11344_v27  ;;  %v11436_v14 = vsel %vm108_vm0, %v11398_v63, 0.0  ;;  %v11397_v38 = vmul.f32 %v16947_v55, %v16947_v55 }
 0xd4f   :  { %11437 = vadd.xlane.f32.xlu0 %v11436_v14  ;;  %v17030_v63 = vrot.slane %v16750_v57, %v11517_v2  ;;  %v17036_v14 = vld [vmem:[%s17520_s4 + $0x40] sm:$0xff] }
 0xd50   :  { %v16958_v56 = vsub.f32 %v16861_v53, %v11367_v49  ;;  %v11433_v59 = vsel %vm108_vm0, %v11397_v38, 0.0  ;;  %v11400_v18 = vmul.f32 %v16952_v4, %v16952_v4  ;;  %v11537_v49 = vsub.s32 4, %v17657_v45 }
 0xd51   :  { %11434 = vadd.xlane.f32.xlu1 %v11433_v59  ;;  %v11353_v37 = vpop.xlane.xlu0 %11352 }
 0xd52   :  { %v11370_v62 = vmul.f32 0.03125, %v11353_v37  ;;  %v11442_v23 = vsel %vm108_vm0, %v11400_v18, 0.0  ;;  %v11399_v42 = vmul.f32 %v16958_v56, %v16958_v56 }
 0xd53   :  { %v11350_v15 = vpop.xlane.xlu1 %11349  ;;  %11443 = vadd.xlane.f32.xlu0 %v11442_v23 }
 0xd54   :  { %v16967_v17 = vsub.f32 %v16871_v44, %v11370_v62  ;;  %v11369_v53 = vmul.f32 0.03125, %v11350_v15  ;;  %v11439_v30 = vsel %vm108_vm0, %v11399_v42, 0.0  ;;  %v17044_v42 = vld [vmem:[%s17520_s4 + $0x38] sm:$0xff] }
 0xd55   :  { %11440 = vadd.xlane.f32.xlu1 %v11439_v30 }
 0xd56   :  { %v16971_v54 = vsub.f32 %v16877_v20, %v11369_v53  ;;  %v11402_v52 = vmul.f32 %v16967_v17, %v16967_v17  ;;  %v16982_v20 = vld [vmem:[%s17520_s4 + $0x78] sm:$0xff] }
 0xd57   :  { %13790 = vmatprep.subr.mxu0 %v16982_v20  ;;  %13857 = vmatprep.subr.mxu1 %v16982_v20 }
 0xd58   :  { %v11448_v46 = vsel %vm108_vm0, %v11402_v52, 0.0  ;;  %v11401_v1 = vmul.f32 %v16971_v54, %v16971_v54  ;;  %13873 = vmatpush3.msra.mxu1 %v16982_v20  ;;  %v17051_v52 = vrot.slane %v16750_v57, %v11537_v49 }
 0xd59   :  { %11449 = vadd.xlane.f32.xlu0 %v11448_v46  ;;  %13858 = vmatprep.subr.mxu1 %v16989_v11  ;;  %v17056_v46 = vld [vmem:[%s17520_s4 + $0x30] sm:$0xff] }
 0xd5a   :  { %v11445_v24 = vsel %vm108_vm0, %v11401_v1, 0.0  ;;  %13874 = vmatpush3.msra.mxu1 %v16989_v11 }
 0xd5b   :  { %11446 = vadd.xlane.f32.xlu1 %v11445_v24  ;;  %13859 = vmatprep.subr.mxu1 %v16996_v0 }
 0xd5c   :  { %13875 = vmatpush3.msra.mxu1 %v16996_v0 }
 0xd5d   :  { %13860 = vmatprep.subr.mxu1 %v17003_v43 }
 0xd5e   :  { %13876 = vmatpush3.msra.mxu1 %v17003_v43 }
 0xd5f   :  { %13861 = vmatprep.subr.mxu1 %v17010_v7 }
 0xd60   :  { %13877 = vmatpush3.msra.mxu1 %v17010_v7 }
 0xd61   :  { %13862 = vmatprep.subr.mxu1 %v17018_v3 }
 0xd62   :  { %13878 = vmatpush3.msra.mxu1 %v17018_v3 }
 0xd63   :  { %13863 = vmatprep.subr.mxu1 %v17025_v9 }
 0xd64   :  { %13879 = vmatpush3.msra.mxu1 %v17025_v9 }
 0xd65   :  { %13864 = vmatprep.subr.mxu1 %v17036_v14 }
 0xd66   :  { %13880 = vmatpush3.msra.mxu1 %v17036_v14 }
 0xd67   :  { %13865 = vmatprep.subr.mxu1 %v17044_v42 }
 0xd68   :  { %13881 = vmatpush3.msra.mxu1 %v17044_v42 }
 0xd69   :  { %13866 = vmatprep.subr.mxu1 %v17056_v46 }
 0xd6a   :  { %13882 = vmatpush3.msra.mxu1 %v17056_v46 }
 0xd7a   :  { %v11408_v44 = vpop.xlane.xlu0 %11407 }
 0xd7b   :  { %v11452_v36 = vmul.f32 0.03125, %v11408_v44 }
 0xd7c   :  { %v11405_v41 = vpop.xlane.xlu1 %11404 }
 0xd7d   :  { %v11468_v5 = vadd.f32 1e-05, %v11452_v36  ;;  %v11451_v61 = vmul.f32 0.03125, %v11405_v41  ;;  %v17064_v36 = vld [vmem:[%s17520_s4 + $0x28] sm:$0xff] }
 0xd7e   :  { %13867 = vmatprep.subr.mxu1 %v17064_v36 }
 0xd7f   :  { %14167 = vrsqrt.f32 %v11468_v5  ;;  %v11467_v21 = vadd.f32 1e-05, %v11451_v61  ;;  %13883 = vmatpush3.msra.mxu1 %v17064_v36 }
 0xd81   :  { %14169 = vrsqrt.f32 %v11467_v21  ;;  %v11411_v39 = vpop.xlane.xlu1 %11410 }
 0xd82   :  { %v11453_v8 = vmul.f32 0.03125, %v11411_v39 }
 0xd84   :  { %v11469_v33 = vadd.f32 1e-05, %v11453_v8  ;;  %v17078_v8 = vld [vmem:[%s17520_s4 + $0x20] sm:$0xff] }
 0xd85   :  { %v11417_v25 = vpop.xlane.xlu1 %11416  ;;  %v11414_v28 = vpop.xlane.xlu0 %11413  ;;  %13868 = vmatprep.subr.mxu1 %v17078_v8 }
 0xd86   :  { %14171 = vrsqrt.f32 %v11469_v33  ;;  %v11455_v40 = vmul.f32 0.03125, %v11417_v25  ;;  %v11454_v10 = vmul.f32 0.03125, %v11414_v28  ;;  %13884 = vmatpush3.msra.mxu1 %v17078_v8 }
 0xd88   :  { %v11471_v13 = vadd.f32 1e-05, %v11455_v40  ;;  %v11470_v35 = vadd.f32 1e-05, %v11454_v10 }
 0xd89   :  { %v11420_v6 = vpop.xlane.xlu0 %11419 }
 0xd8a   :  { %14173 = vrsqrt.f32 %v11471_v13  ;;  %v11423_v16 = vpop.xlane.xlu1 %11422  ;;  %v11456_v51 = vmul.f32 0.03125, %v11420_v6 }
 0xd8b   :  { %14175 = vrsqrt.f32 %v11470_v35  ;;  %v11457_v34 = vmul.f32 0.03125, %v11423_v16 }
 0xd8c   :  { %v14168_v48 = vpop.eup %14167  ;;  %v11472_v27 = vadd.f32 1e-05, %v11456_v51 }
 0xd8d   :  { %v11500_v38 = vmul.f32 %v14168_v48, %v16884_v58  ;;  %v11473_v59 = vadd.f32 1e-05, %v11457_v34  ;;  %v11426_v18 = vpop.xlane.xlu0 %11425 }
 0xd8e   :  { %v14170_v37 = vpop.eup %14169  ;;  %14177 = vrsqrt.f32 %v11472_v27  ;;  %v11429_v62 = vpop.xlane.xlu1 %11428  ;;  %v11458_v23 = vmul.f32 0.03125, %v11426_v18 }
 0xd8f   :  { %14179 = vrsqrt.f32 %v11473_v59  ;;  %v11459_v15 = vmul.f32 0.03125, %v11429_v62  ;;  %v11499_v53 = vmul.f32 %v14170_v37, %v16887_v19  ;;  %v11520_v58 = vmul.f32 %v17030_v63, %v11500_v38  ;;  %v11775_v59 = vld [vmem:[%s17520_s4 + $0x18] sm:$0xff] }
 0xd90   :  { %v11474_v30 = vadd.f32 1e-05, %v11458_v23  ;;  %13869 = vmatprep.subr.mxu1 %v11775_v59  ;;  %v11774_v23 = vld [vmem:[%s17520_s4 + $0x10] sm:$0xff] }
 0xd91   :  { %v11475_v1 = vadd.f32 1e-05, %v11459_v15  ;;  %v11432_v24 = vpop.xlane.xlu0 %11431  ;;  %v11519_v44 = vmul.f32 %v17030_v63, %v11499_v53  ;;  %v17072_v21 = vadd.f32 %v17051_v52, %v11520_v58  ;;  %13885 = vmatpush3.msra.mxu1 %v11775_v59 }
 0xd92   :  { %14181 = vrsqrt.f32 %v11474_v30  ;;  %v11460_v19 = vmul.f32 0.03125, %v11432_v24  ;;  %13870 = vmatprep.subr.mxu1 %v11774_v23  ;;  %v11772_v30 = vld [vmem:[%s17520_s4] sm:$0xff] }
 0xd93   :  { %v14172_v41 = vpop.eup %14171  ;;  %14183 = vrsqrt.f32 %v11475_v1  ;;  %v17068_v5 = vadd.f32 %v17051_v52, %v11519_v44  ;;  %13886 = vmatpush3.msra.mxu1 %v11774_v23 }
 0xd94   :  { %v11476_v61 = vadd.f32 1e-05, %v11460_v19  ;;  %v11501_v39 = vmul.f32 %v14172_v41, %v16896_v29 }
 0xd95   :  { %13766 = vmatprep.mubr.msk.f32.mxu0 %vm108_vm0, %v17068_v5 }
 0xd96   :  { %14185 = vrsqrt.f32 %v11476_v61  ;;  %13767 = vmatmul.mubr.msk.f32.vlgmr.msra.gmra.mxu0 %vm108_vm0, %v17072_v21  ;;  %v11521_v33 = vmul.f32 %v17030_v63, %v11501_v39 }
 0xd97   :  { %v14174_v29 = vpop.eup %14173  ;;  %13791 = vmatpush3.msra.mxu0 %v16982_v20 }
 0xd98   :  { %v14176_v25 = vpop.eup %14175  ;;  %v17090_v28 = vadd.f32 %v17051_v52, %v11521_v33  ;;  %v11503_v40 = vmul.f32 %v14174_v29, %v16901_v60  ;;  %13792 = vmatprep.subr.mxu0 %v16989_v11 }
 0xd99   :  { %v11502_v10 = vmul.f32 %v14176_v25, %v16904_v22  ;;  %13793 = vmatpush3.msra.mxu0 %v16989_v11 }
 0xd9a   :  { %13769 = vmatprep.mubr.msk.f32.mxu0 %vm108_vm0, %v17090_v28  ;;  %v11523_v2 = vmul.f32 %v17030_v63, %v11503_v40  ;;  %13794 = vmatprep.subr.mxu0 %v16996_v0 }
 0xd9b   :  { %v14178_v20 = vpop.eup %14177  ;;  %v11522_v13 = vmul.f32 %v17030_v63, %v11502_v10  ;;  %13795 = vmatpush3.msra.mxu0 %v16996_v0 }
 0xd9c   :  { %v14180_v35 = vpop.eup %14179  ;;  %v11504_v60 = vmul.f32 %v14178_v20, %v16912_v12  ;;  %v17104_v6 = vadd.f32 %v17051_v52, %v11523_v2  ;;  %13796 = vmatprep.subr.mxu0 %v17003_v43 }
 0xd9d   :  { %v17108_v22 = vadd.f32 %v17051_v52, %v11522_v13  ;;  %v11505_v11 = vmul.f32 %v14180_v35, %v16917_v47  ;;  %13797 = vmatpush3.msra.mxu0 %v17003_v43 }
 0xd9e   :  { %v11524_v16 = vmul.f32 %v17030_v63, %v11504_v60  ;;  %13798 = vmatprep.subr.mxu0 %v17010_v7 }
 0xd9f   :  { %v14182_v0 = vpop.eup %14181  ;;  %13770 = vmatmul.mubr.msk.f32.gmra.mxu0 %vm108_vm0, %v17108_v22  ;;  %v11525_v12 = vmul.f32 %v17030_v63, %v11505_v11 }
 0xda0   :  { %v14184_v51 = vpop.eup %14183  ;;  %v11506_v34 = vmul.f32 %v14182_v0, %v16924_v31  ;;  %13772 = vmatprep.mubr.msk.f32.mxu0 %vm108_vm0, %v17104_v6  ;;  %v17121_v47 = vadd.f32 %v17051_v52, %v11524_v16  ;;  %13799 = vmatpush3.msra.mxu0 %v17010_v7 }
 0xda1   :  { %v17125_v43 = vadd.f32 %v17051_v52, %v11525_v12  ;;  %v11507_v48 = vmul.f32 %v14184_v51, %v16928_v32  ;;  %13800 = vmatprep.subr.mxu0 %v17018_v3 }
 0xda2   :  { %v11526_v27 = vmul.f32 %v17030_v63, %v11506_v34  ;;  %13801 = vmatpush3.msra.mxu0 %v17018_v3 }
 0xda3   :  { %v14186_v31 = vpop.eup %14185  ;;  %13773 = vmatmul.mubr.msk.f32.gmra.mxu0 %vm108_vm0, %v17121_v47  ;;  %v11527_v49 = vmul.f32 %v17030_v63, %v11507_v48  ;;  %13802 = vmatprep.subr.mxu0 %v17025_v9 }
 0xda4   :  { %v11508_v7 = vmul.f32 %v14186_v31, %v16936_v26  ;;  %13775 = vmatprep.mubr.msk.f32.mxu0 %vm108_vm0, %v17125_v43  ;;  %v17139_v32 = vadd.f32 %v17051_v52, %v11526_v27  ;;  %13803 = vmatpush3.msra.mxu0 %v17025_v9 }
 0xda5   :  { %v17143_v3 = vadd.f32 %v17051_v52, %v11527_v49  ;;  %13804 = vmatprep.subr.mxu0 %v17036_v14 }
 0xda6   :  { %v11528_v38 = vmul.f32 %v17030_v63, %v11508_v7  ;;  %13805 = vmatpush3.msra.mxu0 %v17036_v14 }
 0xda7   :  { %13776 = vmatmul.mubr.msk.f32.gmra.mxu0 %vm108_vm0, %v17139_v32  ;;  %13806 = vmatprep.subr.mxu0 %v17044_v42 }
 0xda8   :  { %13778 = vmatprep.mubr.msk.f32.mxu0 %vm108_vm0, %v17143_v3  ;;  %v17154_v26 = vadd.f32 %v17051_v52, %v11528_v38  ;;  %13807 = vmatpush3.msra.mxu0 %v17044_v42  ;;  %v11773_v42 = vld [vmem:[%s17520_s4 + $0x8] sm:$0xff]  ;;  %s14378_s4 = smov [#allocation10]  }
 0xda9   :  { %13808 = vmatprep.subr.mxu0 %v17056_v46  ;;  %13871 = vmatprep.subr.mxu1 %v11773_v42  ;;  %s12444_s9 = sshll.u32 %s14378_s4, 4  ;;  %s12445_s9 = int_to_ptr.vmem [resolvable:$true] %s12444_s9 }
 0xdaa   :  { %13809 = vmatpush3.msra.mxu0 %v17056_v46  ;;  %13887 = vmatpush3.msra.mxu1 %v11773_v42  ;;  %s14329_s10 = scalar_lea.vmem %s12445_s9, 256  ;;  %p14334_p7 = scmp.lt.s32.totalorder %s12445_s9, %s12445_s9 }
 0xdab   :  { %13779 = vmatmul.mubr.msk.f32.gmra.mxu0 %vm108_vm0, %v17154_v26  ;;  %13810 = vmatprep.subr.mxu0 %v17064_v36  ;;  %p14330_p6 = scmp.ne.s32.totalorder %s12445_s9, %s14329_s10  ;;  %p14335_p8 = scmp.lt.s32.totalorder %s14329_s10, %s14329_s10 }
 0xdac   :  { %13811 = vmatpush3.msra.mxu0 %v17064_v36  ;;  %13872 = vmatprep.subr.mxu1 %v11772_v30 }
 0xdad   :  { %13812 = vmatprep.subr.mxu0 %v17078_v8  ;;  %13888 = vmatpush3.msra.mxu1 %v11772_v30  ;;  %p14336_p9 = por %p14335_p8, %p14334_p7 }
 0xdae   :  { %13813 = vmatpush3.msra.mxu0 %v17078_v8 }
 0xdaf   :  { %13814 = vmatprep.subr.mxu0 %v11775_v59  ;;  %p14337_p10 = pnand %p14336_p9, %p14330_p6 }
 0xdb0   :  { %13815 = vmatpush3.msra.mxu0 %v11775_v59 }
 0xdb1   :  { %13816 = vmatprep.subr.mxu0 %v11774_v23 }
 0xdb2   :  { %13817 = vmatpush3.msra.mxu0 %v11774_v23 }
 0xdb3   :  { %13818 = vmatprep.subr.mxu0 %v11773_v42 }
 0xdb4   :  { %13819 = vmatpush3.msra.mxu0 %v11773_v42 }
 0xdb5   :  { %13820 = vmatprep.subr.mxu0 %v11772_v30 }
 0xdb6   :  { %13821 = vmatpush3.msra.mxu0 %v11772_v30 }
 0xdd8   :  { %v11438_v9 = vpop.xlane.xlu0 %11437 }
 0xdd9   :  { %v11462_v14 = vmul.f32 0.03125, %v11438_v9 }
 0xdda   :  { %v11435_v18 = vpop.xlane.xlu1 %11434 }
 0xddb   :  { %v11478_v37 = vadd.f32 1e-05, %v11462_v14  ;;  %v11461_v62 = vmul.f32 0.03125, %v11435_v18 }
 0xddc   :  { %v11444_v15 = vpop.xlane.xlu0 %11443 }
 0xddd   :  { %14187 = vrsqrt.f32 %v11478_v37  ;;  %v11477_v53 = vadd.f32 1e-05, %v11461_v62  ;;  %v11464_v58 = vmul.f32 0.03125, %v11444_v15 }
 0xdde   :  { %v11441_v46 = vpop.xlane.xlu1 %11440 }
 0xddf   :  { %14189 = vrsqrt.f32 %v11477_v53  ;;  %v11480_v1 = vadd.f32 1e-05, %v11464_v58  ;;  %v11463_v24 = vmul.f32 0.03125, %v11441_v46 }
 0xde1   :  { %14191 = vrsqrt.f32 %v11480_v1  ;;  %v11479_v44 = vadd.f32 1e-05, %v11463_v24 }
 0xde2   :  { %v11450_v19 = vpop.xlane.xlu0 %11449 }
 0xde3   :  { %14193 = vrsqrt.f32 %v11479_v44  ;;  %v11466_v36 = vmul.f32 0.03125, %v11450_v19 }
 0xde4   :  { %v11447_v41 = vpop.xlane.xlu1 %11446 }
 0xde5   :  { %v11482_v61 = vadd.f32 1e-05, %v11466_v36  ;;  %v11465_v39 = vmul.f32 0.03125, %v11447_v41 }
 0xde7   :  { %14195 = vrsqrt.f32 %v11482_v61  ;;  %v11481_v8 = vadd.f32 1e-05, %v11465_v39 }
 0xde9   :  { %14197 = vrsqrt.f32 %v11481_v8 }
 0xdea   :  { %v14188_v33 = vpop.eup %14187 }
 0xdeb   :  { %v11510_v29 = vmul.f32 %v14188_v33, %v16944_v50 }
 0xdec   :  { %v14190_v25 = vpop.eup %14189 }
 0xded   :  { %v11509_v40 = vmul.f32 %v14190_v25, %v16947_v55  ;;  %v11530_v2 = vmul.f32 %v17030_v63, %v11510_v29 }
 0xdee   :  { %v14192_v10 = vpop.eup %14191 }
 0xdef   :  { %v11512_v20 = vmul.f32 %v14192_v10, %v16952_v4  ;;  %v11529_v13 = vmul.f32 %v17030_v63, %v11509_v40  ;;  %v17187_v16 = vadd.f32 %v17051_v52, %v11530_v2 }
 0xdf0   :  { %v14194_v35 = vpop.eup %14193 }
 0xdf1   :  { %v17183_v60 = vadd.f32 %v17051_v52, %v11529_v13  ;;  %v11511_v11 = vmul.f32 %v14194_v35, %v16958_v56  ;;  %v11532_v50 = vmul.f32 %v17030_v63, %v11512_v20 }
 0xdf3   :  { %13781 = vmatprep.mubr.msk.f32.mxu0 %vm108_vm0, %v17183_v60  ;;  %v11531_v55 = vmul.f32 %v17030_v63, %v11511_v11  ;;  %v17200_v51 = vadd.f32 %v17051_v52, %v11532_v50 }
 0xdf4   :  { %v14196_v0 = vpop.eup %14195  ;;  %13782 = vmatmul.mubr.msk.f32.gmra.mxu0 %vm108_vm0, %v17187_v16 }
 0xdf5   :  { %v11514_v4 = vmul.f32 %v14196_v0, %v16967_v17  ;;  %v17197_v12 = vadd.f32 %v17051_v52, %v11531_v55 }
 0xdf6   :  { %v14198_v56 = vpop.eup %14197 }
 0xdf7   :  { %13784 = vmatprep.mubr.msk.f32.mxu0 %vm108_vm0, %v17197_v12  ;;  %v11513_v34 = vmul.f32 %v14198_v56, %v16971_v54  ;;  %v11534_v48 = vmul.f32 %v17030_v63, %v11514_v4  ;;  %v11561_v54 = vsub.s32 1, %v17657_v45 }
 0xdf8   :  { %13785 = vmatmul.mubr.msk.f32.gmra.mxu0 %vm108_vm0, %v17200_v51 }
 0xdf9   :  { %v11533_v27 = vmul.f32 %v17030_v63, %v11513_v34  ;;  %v17213_v31 = vadd.f32 %v17051_v52, %v11534_v48  ;;  %v11562_v49 = vrot.slane %v16750_v57, %v11561_v54 }
 0xdfb   :  { %v17210_v17 = vadd.f32 %v17051_v52, %v11533_v27 }
 0xdfd   :  { %13787 = vmatprep.mubr.msk.f32.mxu0 %vm108_vm0, %v17210_v17 }
 0xdfe   :  { %13788 = vmatmul.mubr.msk.f32.gmra.mxu0 %vm108_vm0, %v17213_v31 }
 0xe56   :  { %v13768_v7 = vpop.f32.mrf.mxu0 }
 0xe57   :  { %v11683_v38 = vadd.f32 %v13768_v7, %v11562_v49 }
 0xe58   :  { %v11677_v9 = vpop.f32.mrf.mxu0 }
 0xe59   :  { %v11678_v63 = vadd.f32 %v11677_v9, %v11562_v49  ;;  %v11757_v59 = vmax.f32 %v11683_v38, 0.0 }
 0xe5b   :  { %v11756_v14 = vmax.f32 %v11678_v63, 0.0  ;;  %v11790_v63 = vsub.s32 5, %v17657_v45 }
 0xe5d   :  { %13822 = vmatprep.mubr.f32.mxu0 %v11756_v14  ;;  %v17223_v14 = vrot.slane %v16750_v57, %v11790_v63 }
 0xe5e   :  { %13823 = vmatmul.mubr.f32.vlgmr.msra.gmra.mxu0 %v11757_v59 }
 0xe5f   :  { %v13771_v52 = vpop.f32.mrf.mxu0 }
 0xe60   :  { %v11693_v18 = vadd.f32 %v13771_v52, %v11562_v49 }
 0xe61   :  { %v11687_v37 = vpop.f32.mrf.mxu0 }
 0xe62   :  { %v11688_v62 = vadd.f32 %v11687_v37, %v11562_v49  ;;  %v11759_v15 = vmax.f32 %v11693_v18, 0.0 }
 0xe63   :  { %v13774_v23 = vpop.f32.mrf.mxu0 }
 0xe64   :  { %v11758_v42 = vmax.f32 %v11688_v62, 0.0  ;;  %v11703_v53 = vadd.f32 %v13774_v23, %v11562_v49 }
 0xe65   :  { %v11697_v58 = vpop.f32.mrf.mxu0 }
 0xe66   :  { %v11698_v30 = vadd.f32 %v11697_v58, %v11562_v49  ;;  %13825 = vmatprep.mubr.f32.mxu0 %v11758_v42  ;;  %v11761_v24 = vmax.f32 %v11703_v53, 0.0 }
 0xe67   :  { %v13777_v46 = vpop.f32.mrf.mxu0  ;;  %13826 = vmatmul.mubr.f32.gmra.mxu0 %v11759_v15 }
 0xe68   :  { %v11760_v1 = vmax.f32 %v11698_v30, 0.0  ;;  %v11713_v44 = vadd.f32 %v13777_v46, %v11562_v49 }
 0xe69   :  { %v11707_v19 = vpop.f32.mrf.mxu0 }
 0xe6a   :  { %v11708_v36 = vadd.f32 %v11707_v19, %v11562_v49  ;;  %13828 = vmatprep.mubr.f32.mxu0 %v11760_v1  ;;  %v11763_v39 = vmax.f32 %v11713_v44, 0.0 }
 0xe6b   :  { %v13780_v41 = vpop.f32.mrf.mxu0  ;;  %13829 = vmatmul.mubr.f32.gmra.mxu0 %v11761_v24 }
 0xe6c   :  { %v11762_v61 = vmax.f32 %v11708_v36, 0.0  ;;  %v11723_v8 = vadd.f32 %v13780_v41, %v11562_v49 }
 0xe6d   :  { %v11717_v33 = vpop.f32.mrf.mxu0 }
 0xe6e   :  { %v11718_v29 = vadd.f32 %v11717_v33, %v11562_v49  ;;  %13831 = vmatprep.mubr.f32.mxu1 %v11762_v61  ;;  %v11765_v40 = vmax.f32 %v11723_v8, 0.0 }
 0xe6f   :  { %13832 = vmatmul.mubr.f32.vlgmr.msra.gmra.mxu1 %v11763_v39 }
 0xe70   :  { %v11764_v25 = vmax.f32 %v11718_v29, 0.0 }
 0xe72   :  { %13834 = vmatprep.mubr.f32.mxu1 %v11764_v25 }
 0xe73   :  { %13835 = vmatmul.mubr.f32.gmra.mxu1 %v11765_v40 }
 0xeb4   :  { %v13783_v10 = vpop.f32.mrf.mxu0 }
 0xeb5   :  { %v11733_v2 = vadd.f32 %v13783_v10, %v11562_v49 }
 0xeb6   :  { %v11727_v20 = vpop.f32.mrf.mxu0 }
 0xeb7   :  { %v11728_v13 = vadd.f32 %v11727_v20, %v11562_v49  ;;  %v11767_v50 = vmax.f32 %v11733_v2, 0.0 }
 0xeb8   :  { %v13786_v35 = vpop.f32.mrf.mxu0 }
 0xeb9   :  { %v11766_v11 = vmax.f32 %v11728_v13, 0.0  ;;  %v11743_v55 = vadd.f32 %v13786_v35, %v11562_v49 }
 0xeba   :  { %v11737_v0 = vpop.f32.mrf.mxu0 }
 0xebb   :  { %v11738_v4 = vadd.f32 %v11737_v0, %v11562_v49  ;;  %13837 = vmatprep.mubr.f32.mxu1 %v11766_v11  ;;  %v11769_v34 = vmax.f32 %v11743_v55, 0.0 }
 0xebc   :  { %13838 = vmatmul.mubr.f32.gmra.mxu1 %v11767_v50 }
 0xebd   :  { %v11768_v56 = vmax.f32 %v11738_v4, 0.0 }
 0xebe   :  { %v13789_v48 = vpop.f32.mrf.mxu0 }
 0xebf   :  { %13840 = vmatprep.mubr.f32.mxu1 %v11768_v56  ;;  %v11753_v27 = vadd.f32 %v13789_v48, %v11562_v49 }
 0xec0   :  { %v11747_v54 = vpop.f32.mrf.mxu0  ;;  %13841 = vmatmul.mubr.f32.gmra.mxu1 %v11769_v34 }
 0xec1   :  { %v11748_v7 = vadd.f32 %v11747_v54, %v11562_v49  ;;  %v11771_v9 = vmax.f32 %v11753_v27, 0.0 }
 0xec3   :  { %v11770_v38 = vmax.f32 %v11748_v7, 0.0 }
 0xec5   :  { %13843 = vmatprep.mubr.f32.mxu1 %v11770_v38 }
 0xec6   :  { %13844 = vmatmul.mubr.f32.gmra.mxu1 %v11771_v9 }
 0xf1e   :  { %v13824_v59 = vpop.f32.mrf.mxu0 }
 0xf1f   :  { %v11864_v52 = vadd.f32 %v13824_v59, %v17223_v14 }
 0xf20   :  { %v11858_v18 = vpop.f32.mrf.mxu0 }
 0xf21   :  { %v17227_v37 = vadd.f32 %v11864_v52, %v17072_v21  ;;  %v11859_v62 = vadd.f32 %v11858_v18, %v17223_v14 }
 0xf23   :  { %v17231_v49 = vadd.f32 %v11859_v62, %v17068_v5  ;;  %v11956_v23 = vsel %vm108_vm0, %v17227_v37, 0.0 }
 0xf24   :  { %11957 = vadd.xlane.f32.xlu0 %v11956_v23 }
 0xf25   :  { %v11953_v57 = vsel %vm108_vm0, %v17231_v49, 0.0 }
 0xf26   :  { %11954 = vadd.xlane.f32.xlu1 %v11953_v57 }
 0xf27   :  { %v13827_v42 = vpop.f32.mrf.mxu0 }
 0xf28   :  { %v11874_v15 = vadd.f32 %v13827_v42, %v17223_v14 }
 0xf29   :  { %v11868_v53 = vpop.f32.mrf.mxu0 }
 0xf2a   :  { %v17239_v21 = vadd.f32 %v11874_v15, %v17108_v22  ;;  %v11869_v58 = vadd.f32 %v11868_v53, %v17223_v14 }
 0xf2b   :  { %v13830_v30 = vpop.f32.mrf.mxu0 }
 0xf2c   :  { %v17243_v5 = vadd.f32 %v11869_v58, %v17090_v28  ;;  %v11884_v46 = vadd.f32 %v13830_v30, %v17223_v14  ;;  %v11962_v1 = vsel %vm108_vm0, %v17239_v21, 0.0 }
 0xf2d   :  { %11963 = vadd.xlane.f32.xlu0 %v11962_v1  ;;  %v11878_v24 = vpop.f32.mrf.mxu0 }
 0xf2e   :  { %v17249_v44 = vadd.f32 %v11884_v46, %v17121_v47  ;;  %v11879_v19 = vadd.f32 %v11878_v24, %v17223_v14  ;;  %v11959_v22 = vsel %vm108_vm0, %v17243_v5, 0.0 }
 0xf2f   :  { %v13833_v36 = vpop.f32.mrf.mxu1  ;;  %11960 = vadd.xlane.f32.xlu1 %v11959_v22 }
 0xf30   :  { %v17255_v28 = vadd.f32 %v11879_v19, %v17104_v6  ;;  %v11968_v41 = vsel %vm108_vm0, %v17249_v44, 0.0  ;;  %v11894_v10 = vadd.f32 %v13833_v36, %v17223_v14 }
 0xf31   :  { %v11888_v61 = vpop.f32.mrf.mxu1  ;;  %11969 = vadd.xlane.f32.xlu0 %v11968_v41 }
 0xf32   :  { %v11889_v39 = vadd.f32 %v11888_v61, %v17223_v14  ;;  %v11965_v29 = vsel %vm108_vm0, %v17255_v28, 0.0  ;;  %v17279_v13 = vadd.f32 %v11894_v10, %v17139_v32 }
 0xf33   :  { %v13836_v8 = vpop.f32.mrf.mxu1 }
 0xf34   :  { %v17261_v47 = vadd.f32 %v11889_v39, %v17125_v43  ;;  %v11904_v33 = vadd.f32 %v13836_v8, %v17223_v14  ;;  %v11974_v35 = vsel %vm108_vm0, %v17279_v13, 0.0 }
 0xf35   :  { %v11898_v25 = vpop.f32.mrf.mxu1  ;;  %11966 = vadd.xlane.f32.xlu0 %v11965_v29 }
 0xf36   :  { %v17267_v6 = vadd.f32 %v11904_v33, %v17154_v26  ;;  %v11899_v40 = vadd.f32 %v11898_v25, %v17223_v14  ;;  %v11971_v43 = vsel %vm108_vm0, %v17261_v47, 0.0 }
 0xf38   :  { %v17272_v2 = vadd.f32 %v11899_v40, %v17143_v3  ;;  %v11980_v20 = vsel %vm108_vm0, %v17267_v6, 0.0 }
 0xf39   :  { %11972 = vadd.xlane.f32.xlu0 %v11971_v43  ;;  %11981 = vadd.xlane.f32.xlu1 %v11980_v20 }
 0xf3a   :  { %v11977_v26 = vsel %vm108_vm0, %v17272_v2, 0.0 }
 0xf3d   :  { %11978 = vadd.xlane.f32.xlu0 %v11977_v26 }
 0xf41   :  { %11975 = vadd.xlane.f32.xlu0 %v11974_v35 }
 0xf7c   :  { %v13839_v3 = vpop.f32.mrf.mxu1 }
 0xf7d   :  { %v11914_v11 = vadd.f32 %v13839_v3, %v17223_v14 }
 0xf7e   :  { %v11908_v50 = vpop.f32.mrf.mxu1 }
 0xf7f   :  { %v17287_v55 = vadd.f32 %v11914_v11, %v17187_v16  ;;  %v11909_v0 = vadd.f32 %v11908_v50, %v17223_v14 }
 0xf80   :  { %v13842_v4 = vpop.f32.mrf.mxu1 }
 0xf81   :  { %v17291_v32 = vadd.f32 %v11909_v0, %v17183_v60  ;;  %v11924_v56 = vadd.f32 %v13842_v4, %v17223_v14  ;;  %v11986_v34 = vsel %vm108_vm0, %v17287_v55, 0.0 }
 0xf82   :  { %v11918_v48 = vpop.f32.mrf.mxu1  ;;  %11987 = vadd.xlane.f32.xlu1 %v11986_v34 }
 0xf83   :  { %v17297_v27 = vadd.f32 %v11924_v56, %v17200_v51  ;;  %v11919_v54 = vadd.f32 %v11918_v48, %v17223_v14  ;;  %v11983_v16 = vsel %vm108_vm0, %v17291_v32, 0.0 }
 0xf85   :  { %v17304_v9 = vadd.f32 %v11919_v54, %v17197_v12  ;;  %v11992_v51 = vsel %vm108_vm0, %v17297_v27, 0.0 }
 0xf86   :  { %11984 = vadd.xlane.f32.xlu1 %v11983_v16  ;;  %v13845_v7 = vpop.f32.mrf.mxu1 }
 0xf87   :  { %v11934_v60 = vadd.f32 %v13845_v7, %v17223_v14  ;;  %v11989_v12 = vsel %vm108_vm0, %v17304_v9, 0.0 }
 0xf88   :  { %v11928_v38 = vpop.f32.mrf.mxu1 }
 0xf89   :  { %v17307_v63 = vadd.f32 %v11934_v60, %v17213_v31  ;;  %v11929_v59 = vadd.f32 %v11928_v38, %v17223_v14 }
 0xf8a   :  { %11993 = vadd.xlane.f32.xlu1 %v11992_v51 }
 0xf8b   :  { %v11998_v52 = vsel %vm108_vm0, %v17307_v63, 0.0  ;;  %v17315_v18 = vadd.f32 %v11929_v59, %v17210_v17 }
 0xf8c   :  { %11999 = vadd.xlane.f32.xlu0 %v11998_v52 }
 0xf8d   :  { %v11995_v31 = vsel %vm108_vm0, %v17315_v18, 0.0 }
 0xf8e   :  { %11990 = vadd.xlane.f32.xlu1 %v11989_v12 }
 0xf92   :  { %11996 = vadd.xlane.f32.xlu1 %v11995_v31 }
 0xfad   :  { %v11958_v14 = vpop.xlane.xlu0 %11957 }
 0xfae   :  { %v12002_v62 = vmul.f32 0.03125, %v11958_v14 }
 0xfaf   :  { %v11955_v23 = vpop.xlane.xlu1 %11954 }
 0xfb0   :  { %v17322_v57 = vsub.f32 %v17227_v37, %v12002_v62  ;;  %v12001_v42 = vmul.f32 0.03125, %v11955_v23 }
 0xfb2   :  { %v17325_v15 = vsub.f32 %v17231_v49, %v12001_v42  ;;  %v12034_v17 = vmul.f32 %v17322_v57, %v17322_v57 }
 0xfb4   :  { %v12052_v53 = vsel %vm108_vm0, %v12034_v17, 0.0  ;;  %v12033_v58 = vmul.f32 %v17325_v15, %v17325_v15 }
 0xfb5   :  { %12053 = vadd.xlane.f32.xlu0 %v12052_v53 }
 0xfb6   :  { %v11964_v30 = vpop.xlane.xlu0 %11963  ;;  %v12049_v46 = vsel %vm108_vm0, %v12033_v58, 0.0 }
 0xfb7   :  { %v12004_v1 = vmul.f32 0.03125, %v11964_v30  ;;  %12050 = vadd.xlane.f32.xlu1 %v12049_v46 }
 0xfb8   :  { %v11961_v37 = vpop.xlane.xlu1 %11960 }
 0xfb9   :  { %v17334_v24 = vsub.f32 %v17239_v21, %v12004_v1  ;;  %v12003_v49 = vmul.f32 0.03125, %v11961_v37 }
 0xfba   :  { %v11970_v19 = vpop.xlane.xlu0 %11969 }
 0xfbb   :  { %v17337_v22 = vsub.f32 %v17243_v5, %v12003_v49  ;;  %v12006_v36 = vmul.f32 0.03125, %v11970_v19  ;;  %v12036_v41 = vmul.f32 %v17334_v24, %v17334_v24 }
 0xfbd   :  { %v17342_v61 = vsub.f32 %v17249_v44, %v12006_v36  ;;  %v12058_v39 = vsel %vm108_vm0, %v12036_v41, 0.0  ;;  %v12035_v8 = vmul.f32 %v17337_v22, %v17337_v22 }
 0xfbe   :  { %v11967_v33 = vpop.xlane.xlu0 %11966  ;;  %12059 = vadd.xlane.f32.xlu0 %v12058_v39 }
 0xfbf   :  { %v12005_v21 = vmul.f32 0.03125, %v11967_v33  ;;  %v12055_v29 = vsel %vm108_vm0, %v12035_v8, 0.0  ;;  %v12038_v5 = vmul.f32 %v17342_v61, %v17342_v61 }
 0xfc0   :  { %12056 = vadd.xlane.f32.xlu1 %v12055_v29 }
 0xfc1   :  { %v17351_v25 = vsub.f32 %v17255_v28, %v12005_v21  ;;  %v12064_v44 = vsel %vm108_vm0, %v12038_v5, 0.0 }
 0xfc2   :  { %v11973_v40 = vpop.xlane.xlu0 %11972  ;;  %v11982_v10 = vpop.xlane.xlu1 %11981  ;;  %12065 = vadd.xlane.f32.xlu0 %v12064_v44 }
 0xfc3   :  { %v12007_v43 = vmul.f32 0.03125, %v11973_v40  ;;  %v12010_v20 = vmul.f32 0.03125, %v11982_v10  ;;  %v12037_v26 = vmul.f32 %v17351_v25, %v17351_v25 }
 0xfc5   :  { %v17357_v35 = vsub.f32 %v17261_v47, %v12007_v43  ;;  %v17360_v3 = vsub.f32 %v17267_v6, %v12010_v20  ;;  %v12061_v11 = vsel %vm108_vm0, %v12037_v26, 0.0  ;;  %v12316_v20 = vld [vmem:[#allocation7 + $0x18] sm:$0xff]  ;;  %v12315_v26 = vld [vmem:[#allocation7 + $0x10] sm:$0xff] }
 0xfc6   :  { %v11979_v28 = vpop.xlane.xlu0 %11978  ;;  %12062 = vadd.xlane.f32.xlu0 %v12061_v11  ;;  %13846 = vmatprep.subr.mxu0 %v12316_v20 }
 0xfc7   :  { %v12009_v50 = vmul.f32 0.03125, %v11979_v28  ;;  %v12039_v0 = vmul.f32 %v17357_v35, %v17357_v35  ;;  %v12042_v4 = vmul.f32 %v17360_v3, %v17360_v3  ;;  %13847 = vmatpush3.msra.mxu0 %v12316_v20 }
 0xfc8   :  { %13848 = vmatprep.subr.mxu0 %v12315_v26 }
 0xfc9   :  { %v17368_v56 = vsub.f32 %v17272_v2, %v12009_v50  ;;  %v12067_v47 = vsel %vm108_vm0, %v12039_v0, 0.0  ;;  %v12076_v34 = vsel %vm108_vm0, %v12042_v4, 0.0  ;;  %v12314_v0 = vld [vmem:[#allocation7 + $0x8] sm:$0xff]  ;;  %13849 = vmatpush3.msra.mxu0 %v12315_v26 }
 0xfca   :  { %v11976_v6 = vpop.xlane.xlu0 %11975  ;;  %12068 = vadd.xlane.f32.xlu0 %v12067_v47  ;;  %12077 = vadd.xlane.f32.xlu1 %v12076_v34  ;;  %v12163_v47 = vsub.s32 6, %v17657_v45 }
 0xfcb   :  { %v12008_v48 = vmul.f32 0.03125, %v11976_v6  ;;  %v12041_v54 = vmul.f32 %v17368_v56, %v17368_v56  ;;  %13850 = vmatprep.subr.mxu0 %v12314_v0 }
 0xfcc   :  { %13851 = vmatpush3.msra.mxu0 %v12314_v0 }
 0xfcd   :  { %v17375_v16 = vsub.f32 %v17279_v13, %v12008_v48  ;;  %v12073_v7 = vsel %vm108_vm0, %v12041_v54, 0.0  ;;  %v12313_v48 = vld [vmem:[#allocation7] sm:$0xff] }
 0xfce   :  { %12074 = vadd.xlane.f32.xlu0 %v12073_v7  ;;  %v12183_v7 = vsub.s32 7, %v17657_v45  ;;  %13852 = vmatprep.subr.mxu0 %v12313_v48 }
 0xfcf   :  { %v12040_v2 = vmul.f32 %v17375_v16, %v17375_v16  ;;  %13853 = vmatpush3.msra.mxu0 %v12313_v48 }
 0xfd1   :  { %v12070_v60 = vsel %vm108_vm0, %v12040_v2, 0.0 }
 0xfd2   :  { %12071 = vadd.xlane.f32.xlu0 %v12070_v60 }
0x100b   :  { %v11988_v38 = vpop.xlane.xlu1 %11987 }
0x100c   :  { %v12012_v59 = vmul.f32 0.03125, %v11988_v38  ;;  %v14248_v38 = vld [vmem:[#allocation8] sm:$0xff] }
0x100e   :  { %v17382_v51 = vsub.f32 %v17287_v55, %v12012_v59  ;;  %v17419_v59 = vrot.slane %v14248_v38, %v12163_v47 }
0x100f   :  { %v11985_v52 = vpop.xlane.xlu1 %11984 }
0x1010   :  { %v12011_v12 = vmul.f32 0.03125, %v11985_v52  ;;  %v12044_v13 = vmul.f32 %v17382_v51, %v17382_v51 }
0x1012   :  { %v17387_v31 = vsub.f32 %v17291_v32, %v12011_v12  ;;  %v12082_v14 = vsel %vm108_vm0, %v12044_v13, 0.0 }
0x1013   :  { %v11994_v62 = vpop.xlane.xlu1 %11993  ;;  %12083 = vadd.xlane.f32.xlu1 %v12082_v14 }
0x1014   :  { %v12014_v23 = vmul.f32 0.03125, %v11994_v62  ;;  %v12043_v42 = vmul.f32 %v17387_v31, %v17387_v31  ;;  %v17422_v62 = vrot.slane %v14248_v38, %v12183_v7 }
0x1015   :  { %v12000_v17 = vpop.xlane.xlu0 %11999 }
0x1016   :  { %v17393_v55 = vsub.f32 %v17297_v27, %v12014_v23  ;;  %v12016_v53 = vmul.f32 0.03125, %v12000_v17  ;;  %v12079_v58 = vsel %vm108_vm0, %v12043_v42, 0.0 }
0x1017   :  { %v11991_v30 = vpop.xlane.xlu1 %11990  ;;  %12080 = vadd.xlane.f32.xlu1 %v12079_v58 }
0x1018   :  { %v17397_v32 = vsub.f32 %v17307_v63, %v12016_v53  ;;  %v12013_v46 = vmul.f32 0.03125, %v11991_v30  ;;  %v12046_v1 = vmul.f32 %v17393_v55, %v17393_v55 }
0x101a   :  { %v17402_v37 = vsub.f32 %v17304_v9, %v12013_v46  ;;  %v12088_v49 = vsel %vm108_vm0, %v12046_v1, 0.0  ;;  %v12048_v27 = vmul.f32 %v17397_v32, %v17397_v32 }
0x101b   :  { %12089 = vadd.xlane.f32.xlu1 %v12088_v49  ;;  %v11997_v19 = vpop.xlane.xlu1 %11996 }
0x101c   :  { %v12015_v36 = vmul.f32 0.03125, %v11997_v19  ;;  %v12094_v41 = vsel %vm108_vm0, %v12048_v27, 0.0  ;;  %v12045_v63 = vmul.f32 %v17402_v37, %v17402_v37 }
0x101d   :  { %12095 = vadd.xlane.f32.xlu0 %v12094_v41 }
0x101e   :  { %v17411_v39 = vsub.f32 %v17315_v18, %v12015_v36  ;;  %v12085_v9 = vsel %vm108_vm0, %v12045_v63, 0.0 }
0x101f   :  { %12086 = vadd.xlane.f32.xlu1 %v12085_v9 }
0x1020   :  { %v12047_v8 = vmul.f32 %v17411_v39, %v17411_v39 }
0x1022   :  { %v12091_v33 = vsel %vm108_vm0, %v12047_v8, 0.0 }
0x1023   :  { %12092 = vadd.xlane.f32.xlu1 %v12091_v33 }
0x103e   :  { %v12054_v21 = vpop.xlane.xlu0 %12053 }
0x103f   :  { %v12098_v29 = vmul.f32 0.03125, %v12054_v21 }
0x1040   :  { %v12051_v5 = vpop.xlane.xlu1 %12050 }
0x1041   :  { %v12114_v44 = vadd.f32 1e-05, %v12098_v29  ;;  %v12097_v40 = vmul.f32 0.03125, %v12051_v5 }
0x1043   :  { %14199 = vrsqrt.f32 %v12114_v44  ;;  %v12113_v10 = vadd.f32 1e-05, %v12097_v40 }
0x1045   :  { %14201 = vrsqrt.f32 %v12113_v10 }
0x1047   :  { %v12060_v43 = vpop.xlane.xlu0 %12059 }
0x1048   :  { %v12100_v18 = vmul.f32 0.03125, %v12060_v43 }
0x1049   :  { %v12057_v11 = vpop.xlane.xlu1 %12056 }
0x104a   :  { %v12116_v28 = vadd.f32 1e-05, %v12100_v18  ;;  %v12099_v50 = vmul.f32 0.03125, %v12057_v11 }
0x104b   :  { %v12066_v4 = vpop.xlane.xlu0 %12065 }
0x104c   :  { %14203 = vrsqrt.f32 %v12116_v28  ;;  %v12115_v34 = vadd.f32 1e-05, %v12099_v50  ;;  %v12102_v6 = vmul.f32 0.03125, %v12066_v4 }
0x104e   :  { %14205 = vrsqrt.f32 %v12115_v34  ;;  %v12118_v54 = vadd.f32 1e-05, %v12102_v6 }
0x104f   :  { %v12063_v2 = vpop.xlane.xlu0 %12062 }
0x1050   :  { %v14200_v60 = vpop.eup %14199  ;;  %14207 = vrsqrt.f32 %v12118_v54  ;;  %v12101_v52 = vmul.f32 0.03125, %v12063_v2 }
0x1051   :  { %v12146_v12 = vmul.f32 %v14200_v60, %v17322_v57 }
0x1052   :  { %v14202_v13 = vpop.eup %14201  ;;  %v12117_v14 = vadd.f32 1e-05, %v12101_v52 }
0x1053   :  { %v12145_v23 = vmul.f32 %v14202_v13, %v17325_v15  ;;  %v12069_v42 = vpop.xlane.xlu0 %12068  ;;  %v12078_v17 = vpop.xlane.xlu1 %12077  ;;  %v12166_v53 = vmul.f32 %v17419_v59, %v12146_v12 }
0x1054   :  { %14209 = vrsqrt.f32 %v12117_v14  ;;  %v12103_v58 = vmul.f32 0.03125, %v12069_v42  ;;  %v12106_v30 = vmul.f32 0.03125, %v12078_v17 }
0x1055   :  { %v12165_v46 = vmul.f32 %v17419_v59, %v12145_v23  ;;  %v12186_v57 = vadd.f32 %v17422_v62, %v12166_v53 }
0x1056   :  { %v12119_v1 = vadd.f32 1e-05, %v12103_v58  ;;  %v12122_v49 = vadd.f32 1e-05, %v12106_v30 }
0x1057   :  { %v12075_v27 = vpop.xlane.xlu0 %12074  ;;  %v12185_v41 = vadd.f32 %v17422_v62, %v12165_v46  ;;  %v12208_v33 = vsel %vm108_vm0, %v12186_v57, 0.0 }
0x1058   :  { %14211 = vrsqrt.f32 %v12119_v1  ;;  %v12105_v19 = vmul.f32 0.03125, %v12075_v27  ;;  %v12209_v18 = vrot.slane %v12208_v33, 4 }
0x1059   :  { %v14204_v36 = vpop.eup %14203  ;;  %14213 = vrsqrt.f32 %v12122_v49  ;;  %v12201_v44 = vsel %vm108_vm0, %v12185_v41, 0.0 }
0x105a   :  { %v12148_v15 = vmul.f32 %v14204_v36, %v17334_v24  ;;  %v12121_v63 = vadd.f32 1e-05, %v12105_v19  ;;  %v12202_v26 = vrot.slane %v12201_v44, 4  ;;  %v12210_v4 = vadd.f32 %v12209_v18, %v12208_v33 }
0x105b   :  { %v14206_v9 = vpop.eup %14205  ;;  %v12072_v8 = vpop.xlane.xlu0 %12071 }
0x105c   :  { %v12168_v21 = vmul.f32 %v17419_v59, %v12148_v15  ;;  %v12147_v29 = vmul.f32 %v14206_v9, %v17337_v22  ;;  %14215 = vrsqrt.f32 %v12121_v63  ;;  %v12104_v40 = vmul.f32 0.03125, %v12072_v8 }
0x105d   :  { %v14208_v5 = vpop.eup %14207  ;;  %v12203_v6 = vadd.f32 %v12202_v26, %v12201_v44  ;;  %v12211_v12 = vrot.slane %v12210_v4, 2 }
0x105e   :  { %v12167_v10 = vmul.f32 %v17419_v59, %v12147_v29  ;;  %v12150_v43 = vmul.f32 %v14208_v5, %v17342_v61  ;;  %v12188_v24 = vadd.f32 %v17422_v62, %v12168_v21  ;;  %v12120_v20 = vadd.f32 1e-05, %v12104_v40 }
0x105f   :  { %v12204_v14 = vrot.slane %v12203_v6, 2  ;;  %v12212_v27 = vadd.f32 %v12211_v12, %v12210_v4 }
0x1060   :  { %v12187_v11 = vadd.f32 %v17422_v62, %v12167_v10  ;;  %v12170_v28 = vmul.f32 %v17419_v59, %v12150_v43  ;;  %14217 = vrsqrt.f32 %v12120_v20  ;;  %v12222_v47 = vsel %vm108_vm0, %v12188_v24, 0.0 }
0x1061   :  { %v14210_v50 = vpop.eup %14209  ;;  %v12223_v60 = vrot.slane %v12222_v47, 4  ;;  %v12205_v57 = vadd.f32 %v12204_v14, %v12203_v6  ;;  %v12213_v18 = vrot.slane %v12212_v27, 1 }
0x1062   :  { %v12215_v22 = vsel %vm108_vm0, %v12187_v11, 0.0  ;;  %v12149_v0 = vmul.f32 %v14210_v50, %v17351_v25  ;;  %v12190_v61 = vadd.f32 %v17422_v62, %v12170_v28 }
0x1063   :  { %v12216_v34 = vrot.slane %v12215_v22, 4  ;;  %v12224_v1 = vadd.f32 %v12223_v60, %v12222_v47  ;;  %v12206_v43 = vrot.slane %v12205_v57, 1  ;;  %v12214_v6 = vadd.f32 %v12213_v18, %v12212_v27 }
0x1064   :  { %v12169_v48 = vmul.f32 %v17419_v59, %v12149_v0  ;;  %v12236_v13 = vsel %vm108_vm0, %v12190_v61, 0.0 }
0x1065   :  { %v14212_v54 = vpop.eup %14211  ;;  %v12217_v7 = vadd.f32 %v12216_v34, %v12215_v22  ;;  %v12237_v49 = vrot.slane %v12236_v13, 4  ;;  %v12225_v21 = vrot.slane %v12224_v1, 2  ;;  %v12207_v61 = vadd.f32 %v12206_v43, %v12205_v57 }
0x1066   :  { %v14214_v2 = vpop.eup %14213  ;;  %v12189_v38 = vadd.f32 %v17422_v62, %v12169_v48  ;;  %v12151_v52 = vmul.f32 %v14212_v54, %v17357_v35 }
0x1067   :  { %v12154_v25 = vmul.f32 %v14214_v2, %v17360_v3  ;;  %v12218_v42 = vrot.slane %v12217_v7, 2  ;;  %v12238_v5 = vadd.f32 %v12237_v49, %v12236_v13  ;;  %v12226_v0 = vadd.f32 %v12225_v21, %v12224_v1 }
0x1068   :  { %v12171_v23 = vmul.f32 %v17419_v59, %v12151_v52  ;;  %v12229_v17 = vsel %vm108_vm0, %v12189_v38, 0.0 }
0x1069   :  { %v12174_v53 = vmul.f32 %v17419_v59, %v12154_v25  ;;  %v12230_v58 = vrot.slane %v12229_v17, 4  ;;  %v14216_v30 = vpop.eup %14215  ;;  %v12219_v19 = vadd.f32 %v12218_v42, %v12217_v7  ;;  %v12239_v4 = vrot.slane %v12238_v5, 2 }
0x106a   :  { %v12191_v46 = vadd.f32 %v17422_v62, %v12171_v23  ;;  %v12153_v3 = vmul.f32 %v14216_v30, %v17368_v56  ;;  %v12227_v38 = vrot.slane %v12226_v0, 1  ;;  %v12338_v23 = vsel %vm12337_vm5, %v12214_v6, %v12207_v61 }
0x106b   :  { %v12194_v35 = vadd.f32 %v17422_v62, %v12174_v53  ;;  %v12231_v36 = vadd.f32 %v12230_v58, %v12229_v17  ;;  %v12220_v24 = vrot.slane %v12219_v19, 1  ;;  %v12240_v52 = vadd.f32 %v12239_v4, %v12238_v5 }
0x106c   :  { %v12243_v41 = vsel %vm108_vm0, %v12191_v46, 0.0  ;;  %v12173_v63 = vmul.f32 %v17419_v59, %v12153_v3  ;;  %v12228_v30 = vadd.f32 %v12227_v38, %v12226_v0 }
0x106d   :  { %v12264_v15 = vsel %vm108_vm0, %v12194_v35, 0.0  ;;  %v12244_v9 = vrot.slane %v12243_v41, 4  ;;  %v14218_v8 = vpop.eup %14217  ;;  %v12232_v29 = vrot.slane %v12231_v36, 2  ;;  %v12221_v48 = vadd.f32 %v12220_v24, %v12219_v19 }
0x106e   :  { %v12265_v33 = vrot.slane %v12264_v15, 4  ;;  %v12193_v44 = vadd.f32 %v17422_v62, %v12173_v63  ;;  %v12152_v56 = vmul.f32 %v14218_v8, %v17375_v16  ;;  %v12241_v46 = vrot.slane %v12240_v52, 1 }
0x106f   :  { %v12245_v40 = vadd.f32 %v12244_v9, %v12243_v41  ;;  %v12233_v11 = vadd.f32 %v12232_v29, %v12231_v36  ;;  %v12340_v53 = vsel %vm12339_vm6, %v12221_v48, %v12338_v23 }
0x1070   :  { %v12266_v10 = vadd.f32 %v12265_v33, %v12264_v15  ;;  %v12257_v20 = vsel %vm108_vm0, %v12193_v44, 0.0  ;;  %v12172_v26 = vmul.f32 %v17419_v59, %v12152_v56  ;;  %v12342_v27 = vsel %vm12341_vm7, %v12228_v30, %v12340_v53 }
0x1071   :  { %v12246_v28 = vrot.slane %v12245_v40, 2  ;;  %v12258_v22 = vrot.slane %v12257_v20, 4  ;;  %v12234_v54 = vrot.slane %v12233_v11, 1  ;;  %v12242_v36 = vadd.f32 %v12241_v46, %v12240_v52 }
0x1072   :  { %v12267_v50 = vrot.slane %v12266_v10, 2  ;;  %v12192_v47 = vadd.f32 %v17422_v62, %v12172_v26 }
0x1073   :  { %v12259_v34 = vadd.f32 %v12258_v22, %v12257_v20  ;;  %v12247_v7 = vadd.f32 %v12246_v28, %v12245_v40  ;;  %v12235_v42 = vadd.f32 %v12234_v54, %v12233_v11 }
0x1074   :  { %v12268_v16 = vadd.f32 %v12267_v50, %v12266_v10  ;;  %v12250_v2 = vsel %vm108_vm0, %v12192_v47, 0.0 }
0x1075   :  { %v12260_v60 = vrot.slane %v12259_v34, 2  ;;  %v12251_v12 = vrot.slane %v12250_v2, 4  ;;  %v12248_v17 = vrot.slane %v12247_v7, 1  ;;  %v12344_v19 = vsel %vm12343_vm8, %v12235_v42, %v12342_v27 }
0x1076   :  { %v12269_v25 = vrot.slane %v12268_v16, 1  ;;  %v12346_v9 = vsel %vm12345_vm9, %v12242_v36, %v12344_v19 }
0x1077   :  { %v12261_v13 = vadd.f32 %v12260_v60, %v12259_v34  ;;  %v12252_v14 = vadd.f32 %v12251_v12, %v12250_v2  ;;  %v12249_v57 = vadd.f32 %v12248_v17, %v12247_v7 }
0x1078   :  { %v12270_v3 = vadd.f32 %v12269_v25, %v12268_v16 }
0x1079   :  { %v12262_v58 = vrot.slane %v12261_v13, 1  ;;  %v12253_v1 = vrot.slane %v12252_v14, 2  ;;  %v12348_v8 = vsel %vm12347_vm10, %v12249_v57, %v12346_v9 }
0x107b   :  { %v12254_v49 = vadd.f32 %v12253_v1, %v12252_v14  ;;  %v12263_v35 = vadd.f32 %v12262_v58, %v12261_v13 }
0x107d   :  { %v12255_v41 = vrot.slane %v12254_v49, 1  ;;  %v17468_v15 = vsel %vm12337_vm5, %v12270_v3, %v12263_v35 }
0x107f   :  { %v12256_v63 = vadd.f32 %v12255_v41, %v12254_v49 }
0x1081   :  { %v12350_v33 = vsel %vm12349_vm11, %v12256_v63, %v12348_v8 }
0x1082   :  { %13854 = vmatprep.mubr.msk.f32.mxu0 %vm108_vm0, %v12350_v33 }
0x109c   :  { %v12084_v21 = vpop.xlane.xlu1 %12083 }
0x109d   :  { %v12108_v29 = vmul.f32 0.03125, %v12084_v21 }
0x109f   :  { %v12124_v5 = vadd.f32 1e-05, %v12108_v29 }
0x10a0   :  { %v12081_v44 = vpop.xlane.xlu1 %12080 }
0x10a1   :  { %14219 = vrsqrt.f32 %v12124_v5  ;;  %v12107_v56 = vmul.f32 0.03125, %v12081_v44 }
0x10a3   :  { %v12123_v40 = vadd.f32 1e-05, %v12107_v56 }
0x10a4   :  { %v12090_v10 = vpop.xlane.xlu1 %12089 }
0x10a5   :  { %14221 = vrsqrt.f32 %v12123_v40  ;;  %v12110_v43 = vmul.f32 0.03125, %v12090_v10 }
0x10a6   :  { %v12096_v18 = vpop.xlane.xlu0 %12095 }
0x10a7   :  { %v12126_v24 = vadd.f32 1e-05, %v12110_v43  ;;  %v12112_v20 = vmul.f32 0.03125, %v12096_v18 }
0x10a8   :  { %v12087_v26 = vpop.xlane.xlu1 %12086 }
0x10a9   :  { %14223 = vrsqrt.f32 %v12126_v24  ;;  %v12128_v11 = vadd.f32 1e-05, %v12112_v20  ;;  %v12109_v28 = vmul.f32 0.03125, %v12087_v26 }
0x10ab   :  { %14225 = vrsqrt.f32 %v12128_v11  ;;  %v12125_v50 = vadd.f32 1e-05, %v12109_v28 }
0x10ac   :  { %v12093_v22 = vpop.xlane.xlu1 %12092 }
0x10ad   :  { %14227 = vrsqrt.f32 %v12125_v50  ;;  %v12111_v0 = vmul.f32 0.03125, %v12093_v22 }
0x10ae   :  { %v14220_v4 = vpop.eup %14219 }
0x10af   :  { %v12156_v47 = vmul.f32 %v14220_v4, %v17382_v51  ;;  %v12127_v16 = vadd.f32 1e-05, %v12111_v0 }
0x10b1   :  { %v12176_v34 = vmul.f32 %v17419_v59, %v12156_v47  ;;  %14229 = vrsqrt.f32 %v12127_v16 }
0x10b2   :  { %v14222_v61 = vpop.eup %14221 }
0x10b3   :  { %v12196_v6 = vadd.f32 %v17422_v62, %v12176_v34  ;;  %v12155_v48 = vmul.f32 %v14222_v61, %v17387_v31 }
0x10b5   :  { %v12278_v54 = vsel %vm108_vm0, %v12196_v6, 0.0  ;;  %v12175_v7 = vmul.f32 %v17419_v59, %v12155_v48 }
0x10b6   :  { %v14224_v2 = vpop.eup %14223  ;;  %v12279_v60 = vrot.slane %v12278_v54, 4 }
0x10b7   :  { %v12195_v38 = vadd.f32 %v17422_v62, %v12175_v7  ;;  %v12158_v52 = vmul.f32 %v14224_v2, %v17393_v55 }
0x10b8   :  { %v14226_v51 = vpop.eup %14225  ;;  %v12280_v31 = vadd.f32 %v12279_v60, %v12278_v54 }
0x10b9   :  { %v12271_v12 = vsel %vm108_vm0, %v12195_v38, 0.0  ;;  %v12178_v25 = vmul.f32 %v17419_v59, %v12158_v52  ;;  %v12160_v13 = vmul.f32 %v14226_v51, %v17397_v32  ;;  %v17658_v38 = vsub.s32 0, %v17657_v45 }
0x10ba   :  { %v14228_v14 = vpop.eup %14227  ;;  %v12272_v23 = vrot.slane %v12271_v12, 4  ;;  %v12281_v32 = vrot.slane %v12280_v31, 2 }
0x10bb   :  { %v12198_v42 = vadd.f32 %v17422_v62, %v12178_v25  ;;  %v12180_v17 = vmul.f32 %v17419_v59, %v12160_v13  ;;  %v12157_v53 = vmul.f32 %v14228_v14, %v17402_v37 }
0x10bc   :  { %v12273_v58 = vadd.f32 %v12272_v23, %v12271_v12  ;;  %v12282_v21 = vadd.f32 %v12281_v32, %v12280_v31 }
0x10bd   :  { %v12292_v30 = vsel %vm108_vm0, %v12198_v42, 0.0  ;;  %v12200_v55 = vadd.f32 %v17422_v62, %v12180_v17  ;;  %v12177_v46 = vmul.f32 %v17419_v59, %v12157_v53 }
0x10be   :  { %v14230_v1 = vpop.eup %14229  ;;  %v12274_v49 = vrot.slane %v12273_v58, 2  ;;  %v12293_v35 = vrot.slane %v12292_v30, 4  ;;  %v12283_v18 = vrot.slane %v12282_v21, 1 }
0x10bf   :  { %v12306_v3 = vsel %vm108_vm0, %v12200_v55, 0.0  ;;  %v12197_v27 = vadd.f32 %v17422_v62, %v12177_v46  ;;  %v12159_v57 = vmul.f32 %v14230_v1, %v17411_v39 }
0x10c0   :  { %v12275_v19 = vadd.f32 %v12274_v49, %v12273_v58  ;;  %v12294_v36 = vadd.f32 %v12293_v35, %v12292_v30  ;;  %v12307_v37 = vrot.slane %v12306_v3, 4  ;;  %v12284_v22 = vadd.f32 %v12283_v18, %v12282_v21 }
0x10c1   :  { %v12285_v41 = vsel %vm108_vm0, %v12197_v27, 0.0  ;;  %v12179_v63 = vmul.f32 %v17419_v59, %v12159_v57 }
0x10c2   :  { %v12276_v9 = vrot.slane %v12275_v19, 1  ;;  %v12286_v8 = vrot.slane %v12285_v41, 4  ;;  %v12308_v33 = vadd.f32 %v12307_v37, %v12306_v3  ;;  %v12295_v29 = vrot.slane %v12294_v36, 2 }
0x10c3   :  { %v12199_v5 = vadd.f32 %v17422_v62, %v12179_v63 }
0x10c4   :  { %v12287_v44 = vadd.f32 %v12286_v8, %v12285_v41  ;;  %v12309_v40 = vrot.slane %v12308_v33, 2  ;;  %v12277_v10 = vadd.f32 %v12276_v9, %v12275_v19  ;;  %v12296_v24 = vadd.f32 %v12295_v29, %v12294_v36 }
0x10c5   :  { %v12299_v56 = vsel %vm108_vm0, %v12199_v5, 0.0 }
0x10c6   :  { %v12288_v39 = vrot.slane %v12287_v44, 2  ;;  %v12300_v43 = vrot.slane %v12299_v56, 4  ;;  %v12310_v11 = vadd.f32 %v12309_v40, %v12308_v33  ;;  %v12352_v50 = vsel %vm12339_vm6, %v12277_v10, %v17468_v15  ;;  %v99_v15 = vld [vmem:[#allocation8 + $0x8] sm:$0xff] }
0x10c7   :  { %v12297_v0 = vrot.slane %v12296_v24, 1  ;;  %v12353_v16 = vsel %vm12341_vm7, %v12284_v22, %v12352_v50  ;;  %v12320_v52 = vrot.slane %v99_v15, %v17658_v38 }
0x10c8   :  { %v12289_v20 = vadd.f32 %v12288_v39, %v12287_v44  ;;  %v12301_v26 = vadd.f32 %v12300_v43, %v12299_v56  ;;  %v12311_v47 = vrot.slane %v12310_v11, 1 }
0x10c9   :  { %v12298_v6 = vadd.f32 %v12297_v0, %v12296_v24 }
0x10ca   :  { %v12290_v59 = vrot.slane %v12289_v20, 1  ;;  %v12302_v28 = vrot.slane %v12301_v26, 2  ;;  %v12312_v54 = vadd.f32 %v12311_v47, %v12310_v11 }
0x10cc   :  { %v12291_v62 = vadd.f32 %v12290_v59, %v12289_v20  ;;  %v12303_v4 = vadd.f32 %v12302_v28, %v12301_v26 }
0x10ce   :  { %v12304_v34 = vrot.slane %v12303_v4, 1  ;;  %v12354_v61 = vsel %vm12343_vm8, %v12291_v62, %v12353_v16 }
0x10cf   :  { %v12355_v7 = vsel %vm12345_vm9, %v12298_v6, %v12354_v61 }
0x10d0   :  { %v12305_v48 = vadd.f32 %v12304_v34, %v12303_v4 }
0x10d2   :  { %v12356_v2 = vsel %vm12347_vm10, %v12305_v48, %v12355_v7 }
0x10d3   :  { %v12357_v60 = vsel %vm12349_vm11, %v12312_v54, %v12356_v2 }
0x10d4   :  { %13855 = vmatmul.mubr.msk.f32.vlgmr.msra.gmra.mxu0 %vm108_vm0, %v12357_v60 }
0x1194   :  { %v13856_v51 = vpop.f32.mrf.mxu0 }
0x1195   :  { %v12434_v12 = vadd.f32 %v13856_v51, %v12320_v52 }
0x1196   :  { %v12428_v25 = vpop.f32.mrf.mxu0 }
0x1197   :  { %12438 = vst.msk [vmem:[#allocation10 + $0x8] sm:$0xff] %vm108_vm0, %v12434_v12  ;;  %v12429_v13 = vadd.f32 %v12428_v25, %v12320_v52 }
0x1199   :  { %12437 = vst.msk [vmem:[#allocation10] sm:$0xff] %vm108_vm0, %v12429_v13 }
0x119a   :  { %14340 = shalt.err (!%p14337_p10)
}
0x119b   :  { %12450 = dma.vmem_to_hbm [thread:$0]  %s12445_s9, 256, %s17523_s7, [#allocation4], %s14359_s29, %s14359_s29, %s14360_s30  }
0x119c   :  { %14355 = dma.done.wait [#allocation4], 256  }
0x119d   :  { %14356 = vsyncadd [#allocation4], 4294967040 }
0x119e   :  { %12454 = vsyncpa [#allocation3], 1 }
0x119f   :  { %12455 = vsyncpa [#allocation6], 1 }
0x11a0   :  { %12456 = vsyncpa [#allocation9], 1 }
0x11a1   :  { %12457 = vsyncpa [#allocation4], 1 }

</bundles_post_ra>
